<compile_context>
chip_gen: v7x
topology: tpu7x:2x2x1
jax: 0.10.0
libtpu: 0.0.40
codegen_flags: <defaults>
</compile_context>

<pallas_src>
import functools

import jax
import jax.numpy as jnp
from jax import lax
from jax.experimental import pallas as pl
from jax.experimental.pallas import tpu as pltpu

_VMEM_LIMIT = 32 * 1024 * 1024   # safe on v5e/v6e (128 MiB) and v7x (64 MiB)
_EPS = 1e-5                      # nn.InstanceNorm2d default


def _round_up(n, m=128):
    return ((n + m - 1) // m) * m


# ------------------------------ Pallas kernels ------------------------------

def _in_scale_shift(acc, g, b, eps):
    """InstanceNorm + affine folded into y = acc*scale + shift (all f32)."""
    mean = jnp.mean(acc, axis=0, keepdims=True)
    var = jnp.mean(jnp.square(acc - mean), axis=0, keepdims=True)
    scale = lax.rsqrt(var + eps) * g
    return scale, b - mean * scale


def _conv_in_relu_kernel(a_ref, w_ref, g_ref, b_ref, o_ref, *, eps):
    # a: (M=Ho*Wo, K) bf16 patches of ONE image; w: (K, Npad) bf16.
    acc = jnp.dot(a_ref[0], w_ref[...], preferred_element_type=jnp.float32)
    scale, shift = _in_scale_shift(acc, g_ref[...], b_ref[...], eps)
    o_ref[0] = jnp.maximum(acc * scale + shift, 0.0)


def _conv_in_res_kernel(a_ref, w_ref, g_ref, b_ref, r_ref, o_ref, *, eps):
    acc = jnp.dot(a_ref[0], w_ref[...], preferred_element_type=jnp.float32)
    scale, shift = _in_scale_shift(acc, g_ref[...], b_ref[...], eps)
    o_ref[0] = r_ref[0] + acc * scale + shift        # x + main(x), no ReLU


def _conv_tanh_kernel(a_ref, w_ref, o_ref):
    acc = jnp.dot(a_ref[0], w_ref[...], preferred_element_type=jnp.float32)
    o_ref[0] = jnp.tanh(acc)


def _deconv_in_relu_kernel(a_ref, w_ref, g_ref, b_ref, o_ref, *, eps):
    # a: (4, M=H*W, K=4*Cin) sub-pixel patches of ONE image (bf16),
    # w: (4, K, Npad) bf16.  IN stats run over all 4 parities, i.e. over the
    # full (2H, 2W) output instance.
    a = a_ref[0]
    w = w_ref[...]
    accs = [jnp.dot(a[p], w[p], preferred_element_type=jnp.float32)
            for p in range(4)]
    cnt = 4.0 * a.shape[1]
    mean = sum(jnp.sum(x, axis=0, keepdims=True) for x in accs) / cnt
    var = sum(jnp.sum(jnp.square(x - mean), axis=0, keepdims=True)
              for x in accs) / cnt
    scale = lax.rsqrt(var + eps) * g_ref[...]
    shift = b_ref[...] - mean * scale
    for p in range(4):
        o_ref[0, p] = jnp.maximum(accs[p] * scale + shift, 0.0)


# ------------------------- im2col / weight packing --------------------------

def _im2col(x, k, stride, pad):
    """NHWC -> bf16 patches (B, Ho*Wo, k*k*C); tap order (kh, kw, Cin)."""
    B, H, W, C = x.shape
    xp = jnp.pad(x.astype(jnp.bfloat16),
                 ((0, 0), (pad, pad), (pad, pad), (0, 0)))
    Ho = (H + 2 * pad - k) // stride + 1
    Wo = (W + 2 * pad - k) // stride + 1
    cols = [xp[:, i:i + stride * Ho:stride, j:j + stride * Wo:stride, :]
            for i in range(k) for j in range(k)]
    return (jnp.concatenate(cols, axis=-1).reshape(B, Ho * Wo, k * k * C),
            Ho, Wo)


def _im2col_deconv(x):
    """Sub-pixel patches for ConvTranspose2d(k=4, s=2, p=1).

    Returns (B, 4, H*W, 4*C) bf16; parity p = ey*2+ex covers output pixels
    (2m+ey, 2n+ex); tap order within K is (dy, dx, Cin).
    """
    B, H, W, C = x.shape
    xp = jnp.pad(x.astype(jnp.bfloat16), ((0, 0), (1, 1), (1, 1), (0, 0)))
    subs = []
    for ey in (0, 1):
        for ex in (0, 1):
            cols = [xp[:, ey + dy: ey + dy + H, ex + dx: ex + dx + W, :]
                    for dy in (0, 1) for dx in (0, 1)]
            subs.append(jnp.concatenate(cols, axis=-1).reshape(B, H * W, 4 * C))
    return jnp.stack(subs, axis=1)                      # (B, 4, H*W, 4C)


def _pack_conv_weight(w):
    """PyTorch (Cout, Cin, kh, kw) -> (kh*kw*Cin, Npad) bf16, N zero-padded."""
    Cout, Cin, kh, kw = w.shape
    n_pad = _round_up(Cout)
    wm = jnp.transpose(w, (2, 3, 1, 0)).reshape(kh * kw * Cin, Cout)
    return jnp.pad(wm, ((0, 0), (0, n_pad - Cout))).astype(jnp.bfloat16)


def _pack_deconv_weight(w):
    """PyTorch ConvTranspose2d (Cin, Cout, 4, 4), s=2, p=1 -> (4, 4*Cin, Npad).

    Sub-pixel decomposition: parity (ey, ex) uses kernel taps
    ky = (3-ey) - 2*dy, kx = (3-ex) - 2*dx for the (dy, dx) 2x2 window.
    """
    Cin, Cout, kh, kw = w.shape
    assert kh == 4 and kw == 4
    n_pad = _round_up(Cout)
    subs = []
    for ey in (0, 1):
        for ex in (0, 1):
            taps = [w[:, :, (3 - ey) - 2 * dy, (3 - ex) - 2 * dx]
                    for dy in (0, 1) for dx in (0, 1)]          # (Cin, Cout)
            sub = jnp.stack(taps, axis=0).reshape(4 * Cin, Cout)
            subs.append(jnp.pad(sub, ((0, 0), (0, n_pad - Cout))))
    return jnp.stack(subs, axis=0).astype(jnp.bfloat16)          # (4, 4Cin, Npad)


# ----------------------------- fused layer calls -----------------------------

def conv_block(x, wm, *, k, stride, pad, gamma=None, beta=None,
               residual=None, mode="in_relu", eps=_EPS):
    """Fused conv + {IN+ReLU | IN+residual | tanh}.  One image per grid step.

    x: (B,H,W,Cin) NHWC; wm: packed (k*k*Cin, Npad) bf16.
    Returns ((B, Ho*Wo, Npad) f32 lane-padded output, Ho, Wo).
    """
    B = x.shape[0]
    a, Ho, Wo = _im2col(x, k, stride, pad)
    M, K = Ho * Wo, a.shape[-1]
    Npad = wm.shape[1]
    assert M % 8 == 0, "fused-IN design needs Ho*Wo % 8 == 0"
    x_spec = pl.BlockSpec((1, M, K), lambda i: (i, 0, 0))
    w_spec = pl.BlockSpec((K, Npad), lambda i: (0, 0))
    v_spec = pl.BlockSpec((1, Npad), lambda i: (0, 0))
    o_spec = pl.BlockSpec((1, M, Npad), lambda i: (i, 0, 0))
    bytes_acc = a.size * 2 + wm.size * 2 + B * M * Npad * 4
    if residual is not None:
        bytes_acc += residual.size * 4
    common = dict(
        out_shape=jax.ShapeDtypeStruct((B, M, Npad), jnp.float32),
        grid=(B,),
        out_specs=o_spec,
        compiler_params=pltpu.CompilerParams(
            dimension_semantics=("parallel",),
            vmem_limit_bytes=_VMEM_LIMIT),
        cost_estimate=pl.CostEstimate(
            flops=2 * B * M * K * Npad,
            transcendentals=(B * M * Npad) if mode == "tanh" else B * Npad,
            bytes_accessed=bytes_acc),
    )
    if mode == "in_relu":
        out = pl.pallas_call(
            functools.partial(_conv_in_relu_kernel, eps=eps),
            in_specs=[x_spec, w_spec, v_spec, v_spec], **common,
        )(a, wm, gamma, beta)
    elif mode == "in_res":
        out = pl.pallas_call(
            functools.partial(_conv_in_res_kernel, eps=eps),
            in_specs=[x_spec, w_spec, v_spec, v_spec, o_spec],
            input_output_aliases={4: 0},      # write back into residual buffer
            **common,
        )(a, wm, gamma, beta, residual)
    elif mode == "tanh":
        out = pl.pallas_call(
            _conv_tanh_kernel, in_specs=[x_spec, w_spec], **common,
        )(a, wm)
    else:
        raise ValueError(mode)
    return out, Ho, Wo


def deconv_in_relu(x, w4, gamma, beta, *, eps=_EPS):
    """Fused ConvTranspose2d(k=4,s=2,p=1) + IN + ReLU via sub-pixel decomposition.

    x: (B,H,W,Cin) NHWC; w4: (4, 4*Cin, Npad) bf16.
    Returns (B, 4, H*W, Npad) f32 parity-major quarters of the (2H,2W) output.
    """
    B, H, W, C = x.shape
    a = _im2col_deconv(x)
    M, K = H * W, 4 * C
    Npad = w4.shape[2]
    assert M % 8 == 0
    return pl.pallas_call(
        functools.partial(_deconv_in_relu_kernel, eps=eps),
        out_shape=jax.ShapeDtypeStruct((B, 4, M, Npad), jnp.float32),
        grid=(B,),
        in_specs=[pl.BlockSpec((1, 4, M, K), lambda i: (i, 0, 0, 0)),
                  pl.BlockSpec((4, K, Npad), lambda i: (0, 0, 0)),
                  pl.BlockSpec((1, Npad), lambda i: (0, 0)),
                  pl.BlockSpec((1, Npad), lambda i: (0, 0))],
        out_specs=pl.BlockSpec((1, 4, M, Npad), lambda i: (i, 0, 0, 0)),
        compiler_params=pltpu.CompilerParams(
            dimension_semantics=("parallel",),
            vmem_limit_bytes=_VMEM_LIMIT),
        cost_estimate=pl.CostEstimate(
            flops=2 * B * 4 * M * K * Npad,
            transcendentals=B * Npad,
            bytes_accessed=a.size * 2 + w4.size * 2 + B * 4 * M * Npad * 4),
    )(a, w4, gamma, beta)


def _crop(y_pad, H, W, C):
    """(B, H*W, Npad) -> (B, H, W, C) real channels (drop zero lanes)."""
    return y_pad[:, :, :C].reshape(y_pad.shape[0], H, W, C)


def _pixel_shuffle(out4, H, W, C):
    """(B, 4, H*W, C) parity-major -> (B, 2H, 2W, C)."""
    B = out4.shape[0]
    y = out4.reshape(B, 2, 2, H, W, C)           # (B, ey, ex, m, n, C)
    y = jnp.transpose(y, (0, 3, 1, 4, 2, 5))     # (B, m, ey, n, ex, C)
    return y.reshape(B, 2 * H, 2 * W, C)


# ---------------------------- parameters / model -----------------------------

def init_params(key, conv_dim=16, c_dim=5, repeat_num=2):
    keys = iter(jax.random.split(key, 256))

    def conv_w(cout, cin, k):
        return 0.05 * jax.random.normal(next(keys), (cout, cin, k, k), jnp.float32)

    def deconv_w(cin, cout, k):
        return 0.05 * jax.random.normal(next(keys), (cin, cout, k, k), jnp.float32)

    def in_aff(c):
        return (1.0 + 0.1 * jax.random.normal(next(keys), (c,), jnp.float32),
                0.1 * jax.random.normal(next(keys), (c,), jnp.float32))

    p = {"conv0": conv_w(conv_dim, 3 + c_dim, 7), "in0": in_aff(conv_dim)}
    curr = conv_dim
    p["down"] = []
    for _ in range(2):
        p["down"].append({"w": conv_w(curr * 2, curr, 4), "in": in_aff(curr * 2)})
        curr *= 2
    p["res"] = []
    for _ in range(repeat_num):
        p["res"].append({"w1": conv_w(curr, curr, 3), "in1": in_aff(curr),
                         "w2": conv_w(curr, curr, 3), "in2": in_aff(curr)})
    p["up"] = []
    for _ in range(2):
        p["up"].append({"w": deconv_w(curr, curr // 2, 4), "in": in_aff(curr // 2)})
        curr //= 2
    p["conv_last"] = conv_w(3, curr, 7)
    return p


def pack_params(p):
    """One-time repack: transpose/reshape, zero-pad N to 128 lanes, cast bf16."""
    def aff(gb, n_pad):
        g, b = gb
        C = g.shape[0]
        return (jnp.pad(g, (0, n_pad - C)).reshape(1, n_pad).astype(jnp.float32),
                jnp.pad(b, (0, n_pad - C)).reshape(1, n_pad).astype(jnp.float32))

    q = {}
    w = _pack_conv_weight(p["conv0"]); g, b = aff(p["in0"], w.shape[1])
    q["conv0"] = {"w": w, "g": g, "b": b}
    q["down"] = []
    for d in p["down"]:
        w = _pack_conv_weight(d["w"]); g, b = aff(d["in"], w.shape[1])
        q["down"].append({"w": w, "g": g, "b": b})
    q["res"] = []
    for r in p["res"]:
        w1 = _pack_conv_weight(r["w1"]); g1, b1 = aff(r["in1"], w1.shape[1])
        w2 = _pack_conv_weight(r["w2"]); g2, b2 = aff(r["in2"], w2.shape[1])
        q["res"].append({"w1": w1, "g1": g1, "b1": b1,
                         "w2": w2, "g2": g2, "b2": b2})
    q["up"] = []
    for u in p["up"]:
        w = _pack_deconv_weight(u["w"]); g, b = aff(u["in"], w.shape[2])
        q["up"].append({"w": w, "g": g, "b": b})
    q["last"] = {"w": _pack_conv_weight(p["conv_last"])}
    return q


def generator_forward(packed, x_nchw, c, *, conv_dim):
    B, _, H, W = x_nchw.shape
    c_map = jnp.broadcast_to(c[:, :, None, None], (B, c.shape[1], H, W))
    x = jnp.concatenate([x_nchw, c_map], axis=1)
    x = jnp.transpose(x, (0, 2, 3, 1)).astype(jnp.float32)       # NCHW -> NHWC

    C = conv_dim
    q0 = packed["conv0"]
    y_pad, H, W = conv_block(x, q0["w"], k=7, stride=1, pad=3,
                             gamma=q0["g"], beta=q0["b"], mode="in_relu")
    y = _crop(y_pad, H, W, C)
    for d in packed["down"]:
        y_pad, H, W = conv_block(y, d["w"], k=4, stride=2, pad=1,
                                 gamma=d["g"], beta=d["b"], mode="in_relu")
        C *= 2
        y = _crop(y_pad, H, W, C)
    for r in packed["res"]:
        h_pad, _, _ = conv_block(y, r["w1"], k=3, stride=1, pad=1,
                                 gamma=r["g1"], beta=r["b1"], mode="in_relu")
        h = _crop(h_pad, H, W, C)
        y_pad, _, _ = conv_block(h, r["w2"], k=3, stride=1, pad=1,
                                 gamma=r["g2"], beta=r["b2"],
                                 residual=y_pad, mode="in_res")
        y = _crop(y_pad, H, W, C)
    for u in packed["up"]:
        out4 = deconv_in_relu(y, u["w"], u["g"], u["b"])
        C //= 2
        y = _pixel_shuffle(out4[..., :C], H, W, C)
        H, W = 2 * H, 2 * W
    out_pad, _, _ = conv_block(y, packed["last"]["w"], k=7, stride=1, pad=3,
                               mode="tanh")
    out = out_pad[:, :, :3].reshape(B, H, W, 3)
    return jnp.transpose(out, (0, 3, 1, 2))                      # NHWC -> NCHW


# --------------------- pure-JAX f32 reference (for checking) -----------------

def _ref_conv(x, w_pt, stride, pad):
    w = jnp.transpose(w_pt, (2, 3, 1, 0))                        # HWIO
    return lax.conv_general_dilated(
        x, w, (stride, stride), [(pad, pad), (pad, pad)],
        dimension_numbers=("NHWC", "HWIO", "NHWC"),
        precision=lax.Precision.HIGHEST)


def _ref_deconv(x, w_pt):    # ConvTranspose2d k=4 s=2 p=1 as dilated conv
    w_eq = jnp.transpose(w_pt[:, :, ::-1, ::-1], (1, 0, 2, 3))   # (Cout,Cin,4,4)
    w = jnp.transpose(w_eq, (2, 3, 1, 0))
    return lax.conv_general_dilated(
        x, w, (1, 1), [(2, 2), (2, 2)], lhs_dilation=(2, 2),
        dimension_numbers=("NHWC", "HWIO", "NHWC"),
        precision=lax.Precision.HIGHEST)


def _ref_in(x, g, b, relu=False, eps=_EPS):
    mean = jnp.mean(x, axis=(1, 2), keepdims=True)
    var = jnp.mean(jnp.square(x - mean), axis=(1, 2), keepdims=True)
    y = (x - mean) * lax.rsqrt(var + eps) * g + b
    return jnp.maximum(y, 0.0) if relu else y


def reference_forward(p, x_nchw, c):
    B, _, H, W = x_nchw.shape
    c_map = jnp.broadcast_to(c[:, :, None, None], (B, c.shape[1], H, W))
    x = jnp.concatenate([x_nchw, c_map], axis=1)
    y = jnp.transpose(x, (0, 2, 3, 1)).astype(jnp.float32)
    y = _ref_in(_ref_conv(y, p["conv0"], 1, 3), *p["in0"], relu=True)
    for d in p["down"]:
        y = _ref_in(_ref_conv(y, d["w"], 2, 1), *d["in"], relu=True)
    for r in p["res"]:
        h = _ref_in(_ref_conv(y, r["w1"], 1, 1), *r["in1"], relu=True)
        y = y + _ref_in(_ref_conv(h, r["w2"], 1, 1), *r["in2"], relu=False)
    for u in p["up"]:
        y = _ref_in(_ref_deconv(y, u["w"]), *u["in"], relu=True)
    y = jnp.tanh(_ref_conv(y, p["conv_last"], 1, 3))
    return jnp.transpose(y, (0, 3, 1, 2))


# ----------------------------------- main ------------------------------------

if __name__ == "__main__":
    key = jax.random.PRNGKey(0)
    k_x, k_c, k_p = jax.random.split(key, 3)

    B, Cin, H, W = 2, 3, 16, 16
    conv_dim, c_dim, repeat_num = 16, 5, 2

    x = jax.random.normal(k_x, (B, Cin, H, W), jnp.float32)
    c = jax.random.uniform(k_c, (B, c_dim), jnp.float32)
    params = init_params(k_p, conv_dim=conv_dim, c_dim=c_dim,
                         repeat_num=repeat_num)
    packed = pack_params(params)     # one-time weight repack (pad + bf16 cast)

    fwd = jax.jit(functools.partial(generator_forward, conv_dim=conv_dim))
    out = jax.block_until_ready(fwd(packed, x, c))
    assert out.shape == (B, 3, H, W) and out.dtype == jnp.float32
    assert bool(jnp.all(jnp.isfinite(out)))

    # bf16-MXU kernel vs f32 XLA reference (explicit tolerance per review).
    ref = jax.block_until_ready(jax.jit(reference_forward)(params, x, c))
    max_err = float(jnp.max(jnp.abs(out - ref)))
    assert max_err < 0.2, f"bf16 kernel deviates from f32 reference: {max_err}"

    print("KERNEL_OK")
</pallas_src>

<mosaic_0001>
module attributes {stable_mosaic.version = 11 : i64} {
  func.func @_conv_in_relu_kernel(%arg0: i32, %arg1: memref<1x256x392xbf16, #tpu.memory_space<vmem>>, %arg2: memref<392x128xbf16, #tpu.memory_space<vmem>>, %arg3: memref<1x128xf32, #tpu.memory_space<vmem>>, %arg4: memref<1x128xf32, #tpu.memory_space<vmem>>, %arg5: memref<1x256x128xf32, #tpu.memory_space<vmem>>) attributes {dimension_semantics = [#tpu.dimension_semantics<parallel>], iteration_bounds = array<i64: 2>, scalar_prefetch = 0 : i64, scratch_operands = 0 : i64, tpu.core_type = #tpu.core_type<tc>, window_params = [{transform_indices = @transform_0, window_bounds = array<i64: 1, 256, 392>}, {pipeline_mode = #tpu.pipeline_mode<synchronous>, transform_indices = @transform_1, window_bounds = array<i64: 392, 128>}, {pipeline_mode = #tpu.pipeline_mode<synchronous>, transform_indices = @transform_2, window_bounds = array<i64: 1, 128>}, {pipeline_mode = #tpu.pipeline_mode<synchronous>, transform_indices = @transform_3, window_bounds = array<i64: 1, 128>}, {transform_indices = @transform_4, window_bounds = array<i64: 1, 256, 128>}]} {
    %c0 = arith.constant 0 : index
    %c0_0 = arith.constant 0 : index
    %c0_1 = arith.constant 0 : index
    %0 = vector.load %arg1[%c0, %c0_0, %c0_1] : memref<1x256x392xbf16, #tpu.memory_space<vmem>>, vector<1x256x392xbf16>
    %1 = vector.shape_cast %0 : vector<1x256x392xbf16> to vector<256x392xbf16>
    %c0_2 = arith.constant 0 : index
    %c0_3 = arith.constant 0 : index
    %2 = vector.load %arg2[%c0_2, %c0_3] : memref<392x128xbf16, #tpu.memory_space<vmem>>, vector<392x128xbf16>
    %cst = arith.constant dense<0.000000e+00> : vector<256x128xf32>
    %3 = tpu.matmul %1, %2, %cst {dimension_numbers = #tpu.dot_dimension_numbers<[1], [0], [0], [1], [0, 0, 1, 1], [], []>} : vector<256x392xbf16>, vector<392x128xbf16>, vector<256x128xf32> -> vector<256x128xf32>
    %c0_4 = arith.constant 0 : index
    %c0_5 = arith.constant 0 : index
    %4 = vector.load %arg3[%c0_4, %c0_5] : memref<1x128xf32, #tpu.memory_space<vmem>>, vector<1x128xf32>
    %c0_6 = arith.constant 0 : index
    %c0_7 = arith.constant 0 : index
    %5 = vector.load %arg4[%c0_6, %c0_7] : memref<1x128xf32, #tpu.memory_space<vmem>>, vector<1x128xf32>
    %cst_8 = arith.constant dense<0.000000e+00> : vector<128xf32>
    %6 = vector.multi_reduction <add>, %3, %cst_8 [0] : vector<256x128xf32> to vector<128xf32>
    %7 = vector.shape_cast %6 : vector<128xf32> to vector<1x128xf32>
    %cst_9 = arith.constant 2.560000e+02 : f32
    %8 = vector.broadcast %cst_9 : f32 to vector<1x128xf32>
    %9 = arith.divf %7, %8 : vector<1x128xf32>
    %10 = vector.broadcast %9 : vector<1x128xf32> to vector<256x128xf32>
    %11 = arith.subf %3, %10 : vector<256x128xf32>
    %12 = arith.mulf %11, %11 : vector<256x128xf32>
    %cst_10 = arith.constant dense<0.000000e+00> : vector<128xf32>
    %13 = vector.multi_reduction <add>, %12, %cst_10 [0] : vector<256x128xf32> to vector<128xf32>
    %14 = vector.shape_cast %13 : vector<128xf32> to vector<1x128xf32>
    %cst_11 = arith.constant 2.560000e+02 : f32
    %15 = vector.broadcast %cst_11 : f32 to vector<1x128xf32>
    %16 = arith.divf %14, %15 : vector<1x128xf32>
    %cst_12 = arith.constant 9.99999974E-6 : f32
    %17 = vector.broadcast %cst_12 : f32 to vector<1x128xf32>
    %18 = arith.addf %16, %17 : vector<1x128xf32>
    %19 = math.rsqrt %18 : vector<1x128xf32>
    %20 = arith.mulf %19, %4 : vector<1x128xf32>
    %21 = arith.mulf %9, %20 : vector<1x128xf32>
    %22 = arith.subf %5, %21 : vector<1x128xf32>
    %23 = vector.broadcast %20 : vector<1x128xf32> to vector<256x128xf32>
    %24 = arith.mulf %3, %23 : vector<256x128xf32>
    %25 = vector.broadcast %22 : vector<1x128xf32> to vector<256x128xf32>
    %26 = arith.addf %24, %25 : vector<256x128xf32>
    %cst_13 = arith.constant 0.000000e+00 : f32
    %27 = vector.broadcast %cst_13 : f32 to vector<256x128xf32>
    %28 = arith.maximumf %26, %27 : vector<256x128xf32>
    %c0_14 = arith.constant 0 : index
    %c0_15 = arith.constant 0 : index
    %c0_16 = arith.constant 0 : index
    %29 = vector.load %arg5[%c0_14, %c0_15, %c0_16] : memref<1x256x128xf32, #tpu.memory_space<vmem>>, vector<1x256x128xf32>
    %30 = vector.shape_cast %29 : vector<1x256x128xf32> to vector<256x128xf32>
    %31 = vector.shape_cast %28 : vector<256x128xf32> to vector<1x256x128xf32>
    tpu.vector_store %arg5[%c0_14, %c0_15, %c0_16], %31 {strides = array<i32>} : memref<1x256x128xf32, #tpu.memory_space<vmem>>, vector<1x256x128xf32>,
    return
  }
  func.func @transform_0(%arg0: i32) -> (i32, i32, i32) {
    %c0_i32 = arith.constant 0 : i32
    %c0_i32_0 = arith.constant 0 : i32
    %c0_i32_1 = arith.constant 0 : i32
    return %arg0, %c0_i32, %c0_i32_0 : i32, i32, i32
  }
  func.func @transform_1(%arg0: i32) -> (i32, i32) {
    %c0_i32 = arith.constant 0 : i32
    %c0_i32_0 = arith.constant 0 : i32
    %c0_i32_1 = arith.constant 0 : i32
    return %c0_i32, %c0_i32_0 : i32, i32
  }
  func.func @transform_2(%arg0: i32) -> (i32, i32) {
    %c0_i32 = arith.constant 0 : i32
    %c0_i32_0 = arith.constant 0 : i32
    %c0_i32_1 = arith.constant 0 : i32
    return %c0_i32, %c0_i32_0 : i32, i32
  }
  func.func @transform_3(%arg0: i32) -> (i32, i32) {
    %c0_i32 = arith.constant 0 : i32
    %c0_i32_0 = arith.constant 0 : i32
    %c0_i32_1 = arith.constant 0 : i32
    return %c0_i32, %c0_i32_0 : i32, i32
  }
  func.func @transform_4(%arg0: i32) -> (i32, i32, i32) {
    %c0_i32 = arith.constant 0 : i32
    %c0_i32_0 = arith.constant 0 : i32
    %c0_i32_1 = arith.constant 0 : i32
    return %arg0, %c0_i32, %c0_i32_0 : i32, i32, i32
  }
}

module attributes {stable_mosaic.version = 11 : i64} {
  func.func @_conv_in_relu_kernel(%arg0: i32, %arg1: memref<1x64x256xbf16, #tpu.memory_space<vmem>>, %arg2: memref<256x128xbf16, #tpu.memory_space<vmem>>, %arg3: memref<1x128xf32, #tpu.memory_space<vmem>>, %arg4: memref<1x128xf32, #tpu.memory_space<vmem>>, %arg5: memref<1x64x128xf32, #tpu.memory_space<vmem>>) attributes {dimension_semantics = [#tpu.dimension_semantics<parallel>], iteration_bounds = array<i64: 2>, scalar_prefetch = 0 : i64, scratch_operands = 0 : i64, tpu.core_type = #tpu.core_type<tc>, window_params = [{transform_indices = @transform_0, window_bounds = array<i64: 1, 64, 256>}, {pipeline_mode = #tpu.pipeline_mode<synchronous>, transform_indices = @transform_1, window_bounds = array<i64: 256, 128>}, {pipeline_mode = #tpu.pipeline_mode<synchronous>, transform_indices = @transform_2, window_bounds = array<i64: 1, 128>}, {pipeline_mode = #tpu.pipeline_mode<synchronous>, transform_indices = @transform_3, window_bounds = array<i64: 1, 128>}, {transform_indices = @transform_4, window_bounds = array<i64: 1, 64, 128>}]} {
    %c0 = arith.constant 0 : index
    %c0_0 = arith.constant 0 : index
    %c0_1 = arith.constant 0 : index
    %0 = vector.load %arg1[%c0, %c0_0, %c0_1] : memref<1x64x256xbf16, #tpu.memory_space<vmem>>, vector<1x64x256xbf16>
    %1 = vector.shape_cast %0 : vector<1x64x256xbf16> to vector<64x256xbf16>
    %c0_2 = arith.constant 0 : index
    %c0_3 = arith.constant 0 : index
    %2 = vector.load %arg2[%c0_2, %c0_3] : memref<256x128xbf16, #tpu.memory_space<vmem>>, vector<256x128xbf16>
    %cst = arith.constant dense<0.000000e+00> : vector<64x128xf32>
    %3 = tpu.matmul %1, %2, %cst {dimension_numbers = #tpu.dot_dimension_numbers<[1], [0], [0], [1], [0, 0, 1, 1], [], []>} : vector<64x256xbf16>, vector<256x128xbf16>, vector<64x128xf32> -> vector<64x128xf32>
    %c0_4 = arith.constant 0 : index
    %c0_5 = arith.constant 0 : index
    %4 = vector.load %arg3[%c0_4, %c0_5] : memref<1x128xf32, #tpu.memory_space<vmem>>, vector<1x128xf32>
    %c0_6 = arith.constant 0 : index
    %c0_7 = arith.constant 0 : index
    %5 = vector.load %arg4[%c0_6, %c0_7] : memref<1x128xf32, #tpu.memory_space<vmem>>, vector<1x128xf32>
    %cst_8 = arith.constant dense<0.000000e+00> : vector<128xf32>
    %6 = vector.multi_reduction <add>, %3, %cst_8 [0] : vector<64x128xf32> to vector<128xf32>
    %7 = vector.shape_cast %6 : vector<128xf32> to vector<1x128xf32>
    %cst_9 = arith.constant 6.400000e+01 : f32
    %8 = vector.broadcast %cst_9 : f32 to vector<1x128xf32>
    %9 = arith.divf %7, %8 : vector<1x128xf32>
    %10 = vector.broadcast %9 : vector<1x128xf32> to vector<64x128xf32>
    %11 = arith.subf %3, %10 : vector<64x128xf32>
    %12 = arith.mulf %11, %11 : vector<64x128xf32>
    %cst_10 = arith.constant dense<0.000000e+00> : vector<128xf32>
    %13 = vector.multi_reduction <add>, %12, %cst_10 [0] : vector<64x128xf32> to vector<128xf32>
    %14 = vector.shape_cast %13 : vector<128xf32> to vector<1x128xf32>
    %cst_11 = arith.constant 6.400000e+01 : f32
    %15 = vector.broadcast %cst_11 : f32 to vector<1x128xf32>
    %16 = arith.divf %14, %15 : vector<1x128xf32>
    %cst_12 = arith.constant 9.99999974E-6 : f32
    %17 = vector.broadcast %cst_12 : f32 to vector<1x128xf32>
    %18 = arith.addf %16, %17 : vector<1x128xf32>
    %19 = math.rsqrt %18 : vector<1x128xf32>
    %20 = arith.mulf %19, %4 : vector<1x128xf32>
    %21 = arith.mulf %9, %20 : vector<1x128xf32>
    %22 = arith.subf %5, %21 : vector<1x128xf32>
    %23 = vector.broadcast %20 : vector<1x128xf32> to vector<64x128xf32>
    %24 = arith.mulf %3, %23 : vector<64x128xf32>
    %25 = vector.broadcast %22 : vector<1x128xf32> to vector<64x128xf32>
    %26 = arith.addf %24, %25 : vector<64x128xf32>
    %cst_13 = arith.constant 0.000000e+00 : f32
    %27 = vector.broadcast %cst_13 : f32 to vector<64x128xf32>
    %28 = arith.maximumf %26, %27 : vector<64x128xf32>
    %c0_14 = arith.constant 0 : index
    %c0_15 = arith.constant 0 : index
    %c0_16 = arith.constant 0 : index
    %29 = vector.load %arg5[%c0_14, %c0_15, %c0_16] : memref<1x64x128xf32, #tpu.memory_space<vmem>>, vector<1x64x128xf32>
    %30 = vector.shape_cast %29 : vector<1x64x128xf32> to vector<64x128xf32>
    %31 = vector.shape_cast %28 : vector<64x128xf32> to vector<1x64x128xf32>
    tpu.vector_store %arg5[%c0_14, %c0_15, %c0_16], %31 {strides = array<i32>} : memref<1x64x128xf32, #tpu.memory_space<vmem>>, vector<1x64x128xf32>,
    return
  }
  func.func @transform_0(%arg0: i32) -> (i32, i32, i32) {
    %c0_i32 = arith.constant 0 : i32
    %c0_i32_0 = arith.constant 0 : i32
    %c0_i32_1 = arith.constant 0 : i32
    return %arg0, %c0_i32, %c0_i32_0 : i32, i32, i32
  }
  func.func @transform_1(%arg0: i32) -> (i32, i32) {
    %c0_i32 = arith.constant 0 : i32
    %c0_i32_0 = arith.constant 0 : i32
    %c0_i32_1 = arith.constant 0 : i32
    return %c0_i32, %c0_i32_0 : i32, i32
  }
  func.func @transform_2(%arg0: i32) -> (i32, i32) {
    %c0_i32 = arith.constant 0 : i32
    %c0_i32_0 = arith.constant 0 : i32
    %c0_i32_1 = arith.constant 0 : i32
    return %c0_i32, %c0_i32_0 : i32, i32
  }
  func.func @transform_3(%arg0: i32) -> (i32, i32) {
    %c0_i32 = arith.constant 0 : i32
    %c0_i32_0 = arith.constant 0 : i32
    %c0_i32_1 = arith.constant 0 : i32
    return %c0_i32, %c0_i32_0 : i32, i32
  }
  func.func @transform_4(%arg0: i32) -> (i32, i32, i32) {
    %c0_i32 = arith.constant 0 : i32
    %c0_i32_0 = arith.constant 0 : i32
    %c0_i32_1 = arith.constant 0 : i32
    return %arg0, %c0_i32, %c0_i32_0 : i32, i32, i32
  }
}

module attributes {stable_mosaic.version = 11 : i64} {
  func.func @_conv_in_relu_kernel(%arg0: i32, %arg1: memref<1x16x512xbf16, #tpu.memory_space<vmem>>, %arg2: memref<512x128xbf16, #tpu.memory_space<vmem>>, %arg3: memref<1x128xf32, #tpu.memory_space<vmem>>, %arg4: memref<1x128xf32, #tpu.memory_space<vmem>>, %arg5: memref<1x16x128xf32, #tpu.memory_space<vmem>>) attributes {dimension_semantics = [#tpu.dimension_semantics<parallel>], iteration_bounds = array<i64: 2>, scalar_prefetch = 0 : i64, scratch_operands = 0 : i64, tpu.core_type = #tpu.core_type<tc>, window_params = [{transform_indices = @transform_0, window_bounds = array<i64: 1, 16, 512>}, {pipeline_mode = #tpu.pipeline_mode<synchronous>, transform_indices = @transform_1, window_bounds = array<i64: 512, 128>}, {pipeline_mode = #tpu.pipeline_mode<synchronous>, transform_indices = @transform_2, window_bounds = array<i64: 1, 128>}, {pipeline_mode = #tpu.pipeline_mode<synchronous>, transform_indices = @transform_3, window_bounds = array<i64: 1, 128>}, {transform_indices = @transform_4, window_bounds = array<i64: 1, 16, 128>}]} {
    %c0 = arith.constant 0 : index
    %c0_0 = arith.constant 0 : index
    %c0_1 = arith.constant 0 : index
    %0 = vector.load %arg1[%c0, %c0_0, %c0_1] : memref<1x16x512xbf16, #tpu.memory_space<vmem>>, vector<1x16x512xbf16>
    %1 = vector.shape_cast %0 : vector<1x16x512xbf16> to vector<16x512xbf16>
    %c0_2 = arith.constant 0 : index
    %c0_3 = arith.constant 0 : index
    %2 = vector.load %arg2[%c0_2, %c0_3] : memref<512x128xbf16, #tpu.memory_space<vmem>>, vector<512x128xbf16>
    %cst = arith.constant dense<0.000000e+00> : vector<16x128xf32>
    %3 = tpu.matmul %1, %2, %cst {dimension_numbers = #tpu.dot_dimension_numbers<[1], [0], [0], [1], [0, 0, 1, 1], [], []>} : vector<16x512xbf16>, vector<512x128xbf16>, vector<16x128xf32> -> vector<16x128xf32>
    %c0_4 = arith.constant 0 : index
    %c0_5 = arith.constant 0 : index
    %4 = vector.load %arg3[%c0_4, %c0_5] : memref<1x128xf32, #tpu.memory_space<vmem>>, vector<1x128xf32>
    %c0_6 = arith.constant 0 : index
    %c0_7 = arith.constant 0 : index
    %5 = vector.load %arg4[%c0_6, %c0_7] : memref<1x128xf32, #tpu.memory_space<vmem>>, vector<1x128xf32>
    %cst_8 = arith.constant dense<0.000000e+00> : vector<128xf32>
    %6 = vector.multi_reduction <add>, %3, %cst_8 [0] : vector<16x128xf32> to vector<128xf32>
    %7 = vector.shape_cast %6 : vector<128xf32> to vector<1x128xf32>
    %cst_9 = arith.constant 1.600000e+01 : f32
    %8 = vector.broadcast %cst_9 : f32 to vector<1x128xf32>
    %9 = arith.divf %7, %8 : vector<1x128xf32>
    %10 = vector.broadcast %9 : vector<1x128xf32> to vector<16x128xf32>
    %11 = arith.subf %3, %10 : vector<16x128xf32>
    %12 = arith.mulf %11, %11 : vector<16x128xf32>
    %cst_10 = arith.constant dense<0.000000e+00> : vector<128xf32>
    %13 = vector.multi_reduction <add>, %12, %cst_10 [0] : vector<16x128xf32> to vector<128xf32>
    %14 = vector.shape_cast %13 : vector<128xf32> to vector<1x128xf32>
    %cst_11 = arith.constant 1.600000e+01 : f32
    %15 = vector.broadcast %cst_11 : f32 to vector<1x128xf32>
    %16 = arith.divf %14, %15 : vector<1x128xf32>
    %cst_12 = arith.constant 9.99999974E-6 : f32
    %17 = vector.broadcast %cst_12 : f32 to vector<1x128xf32>
    %18 = arith.addf %16, %17 : vector<1x128xf32>
    %19 = math.rsqrt %18 : vector<1x128xf32>
    %20 = arith.mulf %19, %4 : vector<1x128xf32>
    %21 = arith.mulf %9, %20 : vector<1x128xf32>
    %22 = arith.subf %5, %21 : vector<1x128xf32>
    %23 = vector.broadcast %20 : vector<1x128xf32> to vector<16x128xf32>
    %24 = arith.mulf %3, %23 : vector<16x128xf32>
    %25 = vector.broadcast %22 : vector<1x128xf32> to vector<16x128xf32>
    %26 = arith.addf %24, %25 : vector<16x128xf32>
    %cst_13 = arith.constant 0.000000e+00 : f32
    %27 = vector.broadcast %cst_13 : f32 to vector<16x128xf32>
    %28 = arith.maximumf %26, %27 : vector<16x128xf32>
    %c0_14 = arith.constant 0 : index
    %c0_15 = arith.constant 0 : index
    %c0_16 = arith.constant 0 : index
    %29 = vector.load %arg5[%c0_14, %c0_15, %c0_16] : memref<1x16x128xf32, #tpu.memory_space<vmem>>, vector<1x16x128xf32>
    %30 = vector.shape_cast %29 : vector<1x16x128xf32> to vector<16x128xf32>
    %31 = vector.shape_cast %28 : vector<16x128xf32> to vector<1x16x128xf32>
    tpu.vector_store %arg5[%c0_14, %c0_15, %c0_16], %31 {strides = array<i32>} : memref<1x16x128xf32, #tpu.memory_space<vmem>>, vector<1x16x128xf32>,
    return
  }
  func.func @transform_0(%arg0: i32) -> (i32, i32, i32) {
    %c0_i32 = arith.constant 0 : i32
    %c0_i32_0 = arith.constant 0 : i32
    %c0_i32_1 = arith.constant 0 : i32
    return %arg0, %c0_i32, %c0_i32_0 : i32, i32, i32
  }
  func.func @transform_1(%arg0: i32) -> (i32, i32) {
    %c0_i32 = arith.constant 0 : i32
    %c0_i32_0 = arith.constant 0 : i32
    %c0_i32_1 = arith.constant 0 : i32
    return %c0_i32, %c0_i32_0 : i32, i32
  }
  func.func @transform_2(%arg0: i32) -> (i32, i32) {
    %c0_i32 = arith.constant 0 : i32
    %c0_i32_0 = arith.constant 0 : i32
    %c0_i32_1 = arith.constant 0 : i32
    return %c0_i32, %c0_i32_0 : i32, i32
  }
  func.func @transform_3(%arg0: i32) -> (i32, i32) {
    %c0_i32 = arith.constant 0 : i32
    %c0_i32_0 = arith.constant 0 : i32
    %c0_i32_1 = arith.constant 0 : i32
    return %c0_i32, %c0_i32_0 : i32, i32
  }
  func.func @transform_4(%arg0: i32) -> (i32, i32, i32) {
    %c0_i32 = arith.constant 0 : i32
    %c0_i32_0 = arith.constant 0 : i32
    %c0_i32_1 = arith.constant 0 : i32
    return %arg0, %c0_i32, %c0_i32_0 : i32, i32, i32
  }
}

module attributes {stable_mosaic.version = 11 : i64} {
  func.func @_conv_in_relu_kernel(%arg0: i32, %arg1: memref<1x16x576xbf16, #tpu.memory_space<vmem>>, %arg2: memref<576x128xbf16, #tpu.memory_space<vmem>>, %arg3: memref<1x128xf32, #tpu.memory_space<vmem>>, %arg4: memref<1x128xf32, #tpu.memory_space<vmem>>, %arg5: memref<1x16x128xf32, #tpu.memory_space<vmem>>) attributes {dimension_semantics = [#tpu.dimension_semantics<parallel>], iteration_bounds = array<i64: 2>, scalar_prefetch = 0 : i64, scratch_operands = 0 : i64, tpu.core_type = #tpu.core_type<tc>, window_params = [{transform_indices = @transform_0, window_bounds = array<i64: 1, 16, 576>}, {pipeline_mode = #tpu.pipeline_mode<synchronous>, transform_indices = @transform_1, window_bounds = array<i64: 576, 128>}, {pipeline_mode = #tpu.pipeline_mode<synchronous>, transform_indices = @transform_2, window_bounds = array<i64: 1, 128>}, {pipeline_mode = #tpu.pipeline_mode<synchronous>, transform_indices = @transform_3, window_bounds = array<i64: 1, 128>}, {transform_indices = @transform_4, window_bounds = array<i64: 1, 16, 128>}]} {
    %c0 = arith.constant 0 : index
    %c0_0 = arith.constant 0 : index
    %c0_1 = arith.constant 0 : index
    %0 = vector.load %arg1[%c0, %c0_0, %c0_1] : memref<1x16x576xbf16, #tpu.memory_space<vmem>>, vector<1x16x576xbf16>
    %1 = vector.shape_cast %0 : vector<1x16x576xbf16> to vector<16x576xbf16>
    %c0_2 = arith.constant 0 : index
    %c0_3 = arith.constant 0 : index
    %2 = vector.load %arg2[%c0_2, %c0_3] : memref<576x128xbf16, #tpu.memory_space<vmem>>, vector<576x128xbf16>
    %cst = arith.constant dense<0.000000e+00> : vector<16x128xf32>
    %3 = tpu.matmul %1, %2, %cst {dimension_numbers = #tpu.dot_dimension_numbers<[1], [0], [0], [1], [0, 0, 1, 1], [], []>} : vector<16x576xbf16>, vector<576x128xbf16>, vector<16x128xf32> -> vector<16x128xf32>
    %c0_4 = arith.constant 0 : index
    %c0_5 = arith.constant 0 : index
    %4 = vector.load %arg3[%c0_4, %c0_5] : memref<1x128xf32, #tpu.memory_space<vmem>>, vector<1x128xf32>
    %c0_6 = arith.constant 0 : index
    %c0_7 = arith.constant 0 : index
    %5 = vector.load %arg4[%c0_6, %c0_7] : memref<1x128xf32, #tpu.memory_space<vmem>>, vector<1x128xf32>
    %cst_8 = arith.constant dense<0.000000e+00> : vector<128xf32>
    %6 = vector.multi_reduction <add>, %3, %cst_8 [0] : vector<16x128xf32> to vector<128xf32>
    %7 = vector.shape_cast %6 : vector<128xf32> to vector<1x128xf32>
    %cst_9 = arith.constant 1.600000e+01 : f32
    %8 = vector.broadcast %cst_9 : f32 to vector<1x128xf32>
    %9 = arith.divf %7, %8 : vector<1x128xf32>
    %10 = vector.broadcast %9 : vector<1x128xf32> to vector<16x128xf32>
    %11 = arith.subf %3, %10 : vector<16x128xf32>
    %12 = arith.mulf %11, %11 : vector<16x128xf32>
    %cst_10 = arith.constant dense<0.000000e+00> : vector<128xf32>
    %13 = vector.multi_reduction <add>, %12, %cst_10 [0] : vector<16x128xf32> to vector<128xf32>
    %14 = vector.shape_cast %13 : vector<128xf32> to vector<1x128xf32>
    %cst_11 = arith.constant 1.600000e+01 : f32
    %15 = vector.broadcast %cst_11 : f32 to vector<1x128xf32>
    %16 = arith.divf %14, %15 : vector<1x128xf32>
    %cst_12 = arith.constant 9.99999974E-6 : f32
    %17 = vector.broadcast %cst_12 : f32 to vector<1x128xf32>
    %18 = arith.addf %16, %17 : vector<1x128xf32>
    %19 = math.rsqrt %18 : vector<1x128xf32>
    %20 = arith.mulf %19, %4 : vector<1x128xf32>
    %21 = arith.mulf %9, %20 : vector<1x128xf32>
    %22 = arith.subf %5, %21 : vector<1x128xf32>
    %23 = vector.broadcast %20 : vector<1x128xf32> to vector<16x128xf32>
    %24 = arith.mulf %3, %23 : vector<16x128xf32>
    %25 = vector.broadcast %22 : vector<1x128xf32> to vector<16x128xf32>
    %26 = arith.addf %24, %25 : vector<16x128xf32>
    %cst_13 = arith.constant 0.000000e+00 : f32
    %27 = vector.broadcast %cst_13 : f32 to vector<16x128xf32>
    %28 = arith.maximumf %26, %27 : vector<16x128xf32>
    %c0_14 = arith.constant 0 : index
    %c0_15 = arith.constant 0 : index
    %c0_16 = arith.constant 0 : index
    %29 = vector.load %arg5[%c0_14, %c0_15, %c0_16] : memref<1x16x128xf32, #tpu.memory_space<vmem>>, vector<1x16x128xf32>
    %30 = vector.shape_cast %29 : vector<1x16x128xf32> to vector<16x128xf32>
    %31 = vector.shape_cast %28 : vector<16x128xf32> to vector<1x16x128xf32>
    tpu.vector_store %arg5[%c0_14, %c0_15, %c0_16], %31 {strides = array<i32>} : memref<1x16x128xf32, #tpu.memory_space<vmem>>, vector<1x16x128xf32>,
    return
  }
  func.func @transform_0(%arg0: i32) -> (i32, i32, i32) {
    %c0_i32 = arith.constant 0 : i32
    %c0_i32_0 = arith.constant 0 : i32
    %c0_i32_1 = arith.constant 0 : i32
    return %arg0, %c0_i32, %c0_i32_0 : i32, i32, i32
  }
  func.func @transform_1(%arg0: i32) -> (i32, i32) {
    %c0_i32 = arith.constant 0 : i32
    %c0_i32_0 = arith.constant 0 : i32
    %c0_i32_1 = arith.constant 0 : i32
    return %c0_i32, %c0_i32_0 : i32, i32
  }
  func.func @transform_2(%arg0: i32) -> (i32, i32) {
    %c0_i32 = arith.constant 0 : i32
    %c0_i32_0 = arith.constant 0 : i32
    %c0_i32_1 = arith.constant 0 : i32
    return %c0_i32, %c0_i32_0 : i32, i32
  }
  func.func @transform_3(%arg0: i32) -> (i32, i32) {
    %c0_i32 = arith.constant 0 : i32
    %c0_i32_0 = arith.constant 0 : i32
    %c0_i32_1 = arith.constant 0 : i32
    return %c0_i32, %c0_i32_0 : i32, i32
  }
  func.func @transform_4(%arg0: i32) -> (i32, i32, i32) {
    %c0_i32 = arith.constant 0 : i32
    %c0_i32_0 = arith.constant 0 : i32
    %c0_i32_1 = arith.constant 0 : i32
    return %arg0, %c0_i32, %c0_i32_0 : i32, i32, i32
  }
}

module attributes {stable_mosaic.version = 11 : i64} {
  func.func @_conv_in_res_kernel(%arg0: i32, %arg1: memref<1x16x576xbf16, #tpu.memory_space<vmem>>, %arg2: memref<576x128xbf16, #tpu.memory_space<vmem>>, %arg3: memref<1x128xf32, #tpu.memory_space<vmem>>, %arg4: memref<1x128xf32, #tpu.memory_space<vmem>>, %arg5: memref<1x16x128xf32, #tpu.memory_space<vmem>>, %arg6: memref<1x16x128xf32, #tpu.memory_space<vmem>>) attributes {dimension_semantics = [#tpu.dimension_semantics<parallel>], iteration_bounds = array<i64: 2>, scalar_prefetch = 0 : i64, scratch_operands = 0 : i64, tpu.core_type = #tpu.core_type<tc>, window_params = [{transform_indices = @transform_0, window_bounds = array<i64: 1, 16, 576>}, {pipeline_mode = #tpu.pipeline_mode<synchronous>, transform_indices = @transform_1, window_bounds = array<i64: 576, 128>}, {pipeline_mode = #tpu.pipeline_mode<synchronous>, transform_indices = @transform_2, window_bounds = array<i64: 1, 128>}, {pipeline_mode = #tpu.pipeline_mode<synchronous>, transform_indices = @transform_3, window_bounds = array<i64: 1, 128>}, {transform_indices = @transform_4, window_bounds = array<i64: 1, 16, 128>}, {transform_indices = @transform_5, window_bounds = array<i64: 1, 16, 128>}]} {
    %c0 = arith.constant 0 : index
    %c0_0 = arith.constant 0 : index
    %c0_1 = arith.constant 0 : index
    %0 = vector.load %arg1[%c0, %c0_0, %c0_1] : memref<1x16x576xbf16, #tpu.memory_space<vmem>>, vector<1x16x576xbf16>
    %1 = vector.shape_cast %0 : vector<1x16x576xbf16> to vector<16x576xbf16>
    %c0_2 = arith.constant 0 : index
    %c0_3 = arith.constant 0 : index
    %2 = vector.load %arg2[%c0_2, %c0_3] : memref<576x128xbf16, #tpu.memory_space<vmem>>, vector<576x128xbf16>
    %cst = arith.constant dense<0.000000e+00> : vector<16x128xf32>
    %3 = tpu.matmul %1, %2, %cst {dimension_numbers = #tpu.dot_dimension_numbers<[1], [0], [0], [1], [0, 0, 1, 1], [], []>} : vector<16x576xbf16>, vector<576x128xbf16>, vector<16x128xf32> -> vector<16x128xf32>
    %c0_4 = arith.constant 0 : index
    %c0_5 = arith.constant 0 : index
    %4 = vector.load %arg3[%c0_4, %c0_5] : memref<1x128xf32, #tpu.memory_space<vmem>>, vector<1x128xf32>
    %c0_6 = arith.constant 0 : index
    %c0_7 = arith.constant 0 : index
    %5 = vector.load %arg4[%c0_6, %c0_7] : memref<1x128xf32, #tpu.memory_space<vmem>>, vector<1x128xf32>
    %cst_8 = arith.constant dense<0.000000e+00> : vector<128xf32>
    %6 = vector.multi_reduction <add>, %3, %cst_8 [0] : vector<16x128xf32> to vector<128xf32>
    %7 = vector.shape_cast %6 : vector<128xf32> to vector<1x128xf32>
    %cst_9 = arith.constant 1.600000e+01 : f32
    %8 = vector.broadcast %cst_9 : f32 to vector<1x128xf32>
    %9 = arith.divf %7, %8 : vector<1x128xf32>
    %10 = vector.broadcast %9 : vector<1x128xf32> to vector<16x128xf32>
    %11 = arith.subf %3, %10 : vector<16x128xf32>
    %12 = arith.mulf %11, %11 : vector<16x128xf32>
    %cst_10 = arith.constant dense<0.000000e+00> : vector<128xf32>
    %13 = vector.multi_reduction <add>, %12, %cst_10 [0] : vector<16x128xf32> to vector<128xf32>
    %14 = vector.shape_cast %13 : vector<128xf32> to vector<1x128xf32>
    %cst_11 = arith.constant 1.600000e+01 : f32
    %15 = vector.broadcast %cst_11 : f32 to vector<1x128xf32>
    %16 = arith.divf %14, %15 : vector<1x128xf32>
    %cst_12 = arith.constant 9.99999974E-6 : f32
    %17 = vector.broadcast %cst_12 : f32 to vector<1x128xf32>
    %18 = arith.addf %16, %17 : vector<1x128xf32>
    %19 = math.rsqrt %18 : vector<1x128xf32>
    %20 = arith.mulf %19, %4 : vector<1x128xf32>
    %21 = arith.mulf %9, %20 : vector<1x128xf32>
    %22 = arith.subf %5, %21 : vector<1x128xf32>
    %c0_13 = arith.constant 0 : index
    %c0_14 = arith.constant 0 : index
    %c0_15 = arith.constant 0 : index
    %23 = vector.load %arg5[%c0_13, %c0_14, %c0_15] : memref<1x16x128xf32, #tpu.memory_space<vmem>>, vector<1x16x128xf32>
    %24 = vector.shape_cast %23 : vector<1x16x128xf32> to vector<16x128xf32>
    %25 = vector.broadcast %20 : vector<1x128xf32> to vector<16x128xf32>
    %26 = arith.mulf %3, %25 : vector<16x128xf32>
    %27 = arith.addf %24, %26 : vector<16x128xf32>
    %28 = vector.broadcast %22 : vector<1x128xf32> to vector<16x128xf32>
    %29 = arith.addf %27, %28 : vector<16x128xf32>
    %c0_16 = arith.constant 0 : index
    %c0_17 = arith.constant 0 : index
    %c0_18 = arith.constant 0 : index
    %30 = vector.load %arg6[%c0_16, %c0_17, %c0_18] : memref<1x16x128xf32, #tpu.memory_space<vmem>>, vector<1x16x128xf32>
    %31 = vector.shape_cast %30 : vector<1x16x128xf32> to vector<16x128xf32>
    %32 = vector.shape_cast %29 : vector<16x128xf32> to vector<1x16x128xf32>
    tpu.vector_store %arg6[%c0_16, %c0_17, %c0_18], %32 {strides = array<i32>} : memref<1x16x128xf32, #tpu.memory_space<vmem>>, vector<1x16x128xf32>,
    return
  }
  func.func @transform_0(%arg0: i32) -> (i32, i32, i32) {
    %c0_i32 = arith.constant 0 : i32
    %c0_i32_0 = arith.constant 0 : i32
    %c0_i32_1 = arith.constant 0 : i32
    return %arg0, %c0_i32, %c0_i32_0 : i32, i32, i32
  }
  func.func @transform_1(%arg0: i32) -> (i32, i32) {
    %c0_i32 = arith.constant 0 : i32
    %c0_i32_0 = arith.constant 0 : i32
    %c0_i32_1 = arith.constant 0 : i32
    return %c0_i32, %c0_i32_0 : i32, i32
  }
  func.func @transform_2(%arg0: i32) -> (i32, i32) {
    %c0_i32 = arith.constant 0 : i32
    %c0_i32_0 = arith.constant 0 : i32
    %c0_i32_1 = arith.constant 0 : i32
    return %c0_i32, %c0_i32_0 : i32, i32
  }
  func.func @transform_3(%arg0: i32) -> (i32, i32) {
    %c0_i32 = arith.constant 0 : i32
    %c0_i32_0 = arith.constant 0 : i32
    %c0_i32_1 = arith.constant 0 : i32
    return %c0_i32, %c0_i32_0 : i32, i32
  }
  func.func @transform_4(%arg0: i32) -> (i32, i32, i32) {
    %c0_i32 = arith.constant 0 : i32
    %c0_i32_0 = arith.constant 0 : i32
    %c0_i32_1 = arith.constant 0 : i32
    return %arg0, %c0_i32, %c0_i32_0 : i32, i32, i32
  }
  func.func @transform_5(%arg0: i32) -> (i32, i32, i32) {
    %c0_i32 = arith.constant 0 : i32
    %c0_i32_0 = arith.constant 0 : i32
    %c0_i32_1 = arith.constant 0 : i32
    return %arg0, %c0_i32, %c0_i32_0 : i32, i32, i32
  }
}

module attributes {stable_mosaic.version = 11 : i64} {
  func.func @_deconv_in_relu_kernel(%arg0: i32, %arg1: memref<1x4x16x256xbf16, #tpu.memory_space<vmem>>, %arg2: memref<4x256x128xbf16, #tpu.memory_space<vmem>>, %arg3: memref<1x128xf32, #tpu.memory_space<vmem>>, %arg4: memref<1x128xf32, #tpu.memory_space<vmem>>, %arg5: memref<1x4x16x128xf32, #tpu.memory_space<vmem>>) attributes {dimension_semantics = [#tpu.dimension_semantics<parallel>], iteration_bounds = array<i64: 2>, scalar_prefetch = 0 : i64, scratch_operands = 0 : i64, tpu.core_type = #tpu.core_type<tc>, window_params = [{transform_indices = @transform_0, window_bounds = array<i64: 1, 4, 16, 256>}, {pipeline_mode = #tpu.pipeline_mode<synchronous>, transform_indices = @transform_1, window_bounds = array<i64: 4, 256, 128>}, {pipeline_mode = #tpu.pipeline_mode<synchronous>, transform_indices = @transform_2, window_bounds = array<i64: 1, 128>}, {pipeline_mode = #tpu.pipeline_mode<synchronous>, transform_indices = @transform_3, window_bounds = array<i64: 1, 128>}, {transform_indices = @transform_4, window_bounds = array<i64: 1, 4, 16, 128>}]} {
    %c0 = arith.constant 0 : index
    %c0_0 = arith.constant 0 : index
    %c0_1 = arith.constant 0 : index
    %c0_2 = arith.constant 0 : index
    %0 = vector.load %arg1[%c0, %c0_0, %c0_1, %c0_2] : memref<1x4x16x256xbf16, #tpu.memory_space<vmem>>, vector<1x4x16x256xbf16>
    %1 = vector.shape_cast %0 : vector<1x4x16x256xbf16> to vector<4x16x256xbf16>
    %c0_3 = arith.constant 0 : index
    %c0_4 = arith.constant 0 : index
    %c0_5 = arith.constant 0 : index
    %2 = vector.load %arg2[%c0_3, %c0_4, %c0_5] : memref<4x256x128xbf16, #tpu.memory_space<vmem>>, vector<4x256x128xbf16>
    %3 = vector.extract_strided_slice %1 {offsets = [0, 0, 0], sizes = [1, 16, 256], strides = [1, 1, 1]} : vector<4x16x256xbf16> to vector<1x16x256xbf16>
    %4 = vector.shape_cast %3 : vector<1x16x256xbf16> to vector<16x256xbf16>
    %5 = vector.extract_strided_slice %2 {offsets = [0, 0, 0], sizes = [1, 256, 128], strides = [1, 1, 1]} : vector<4x256x128xbf16> to vector<1x256x128xbf16>
    %6 = vector.shape_cast %5 : vector<1x256x128xbf16> to vector<256x128xbf16>
    %cst = arith.constant dense<0.000000e+00> : vector<16x128xf32>
    %7 = tpu.matmul %4, %6, %cst {dimension_numbers = #tpu.dot_dimension_numbers<[1], [0], [0], [1], [0, 0, 1, 1], [], []>} : vector<16x256xbf16>, vector<256x128xbf16>, vector<16x128xf32> -> vector<16x128xf32>
    %8 = vector.extract_strided_slice %1 {offsets = [1, 0, 0], sizes = [1, 16, 256], strides = [1, 1, 1]} : vector<4x16x256xbf16> to vector<1x16x256xbf16>
    %9 = vector.shape_cast %8 : vector<1x16x256xbf16> to vector<16x256xbf16>
    %10 = vector.extract_strided_slice %2 {offsets = [1, 0, 0], sizes = [1, 256, 128], strides = [1, 1, 1]} : vector<4x256x128xbf16> to vector<1x256x128xbf16>
    %11 = vector.shape_cast %10 : vector<1x256x128xbf16> to vector<256x128xbf16>
    %cst_6 = arith.constant dense<0.000000e+00> : vector<16x128xf32>
    %12 = tpu.matmul %9, %11, %cst_6 {dimension_numbers = #tpu.dot_dimension_numbers<[1], [0], [0], [1], [0, 0, 1, 1], [], []>} : vector<16x256xbf16>, vector<256x128xbf16>, vector<16x128xf32> -> vector<16x128xf32>
    %13 = vector.extract_strided_slice %1 {offsets = [2, 0, 0], sizes = [1, 16, 256], strides = [1, 1, 1]} : vector<4x16x256xbf16> to vector<1x16x256xbf16>
    %14 = vector.shape_cast %13 : vector<1x16x256xbf16> to vector<16x256xbf16>
    %15 = vector.extract_strided_slice %2 {offsets = [2, 0, 0], sizes = [1, 256, 128], strides = [1, 1, 1]} : vector<4x256x128xbf16> to vector<1x256x128xbf16>
    %16 = vector.shape_cast %15 : vector<1x256x128xbf16> to vector<256x128xbf16>
    %cst_7 = arith.constant dense<0.000000e+00> : vector<16x128xf32>
    %17 = tpu.matmul %14, %16, %cst_7 {dimension_numbers = #tpu.dot_dimension_numbers<[1], [0], [0], [1], [0, 0, 1, 1], [], []>} : vector<16x256xbf16>, vector<256x128xbf16>, vector<16x128xf32> -> vector<16x128xf32>
    %18 = vector.extract_strided_slice %1 {offsets = [3, 0, 0], sizes = [1, 16, 256], strides = [1, 1, 1]} : vector<4x16x256xbf16> to vector<1x16x256xbf16>
    %19 = vector.shape_cast %18 : vector<1x16x256xbf16> to vector<16x256xbf16>
    %20 = vector.extract_strided_slice %2 {offsets = [3, 0, 0], sizes = [1, 256, 128], strides = [1, 1, 1]} : vector<4x256x128xbf16> to vector<1x256x128xbf16>
    %21 = vector.shape_cast %20 : vector<1x256x128xbf16> to vector<256x128xbf16>
    %cst_8 = arith.constant dense<0.000000e+00> : vector<16x128xf32>
    %22 = tpu.matmul %19, %21, %cst_8 {dimension_numbers = #tpu.dot_dimension_numbers<[1], [0], [0], [1], [0, 0, 1, 1], [], []>} : vector<16x256xbf16>, vector<256x128xbf16>, vector<16x128xf32> -> vector<16x128xf32>
    %cst_9 = arith.constant dense<0.000000e+00> : vector<128xf32>
    %23 = vector.multi_reduction <add>, %7, %cst_9 [0] : vector<16x128xf32> to vector<128xf32>
    %24 = vector.shape_cast %23 : vector<128xf32> to vector<1x128xf32>
    %cst_10 = arith.constant 0.000000e+00 : f32
    %25 = vector.broadcast %cst_10 : f32 to vector<1x128xf32>
    %26 = arith.addf %25, %24 : vector<1x128xf32>
    %cst_11 = arith.constant dense<0.000000e+00> : vector<128xf32>
    %27 = vector.multi_reduction <add>, %12, %cst_11 [0] : vector<16x128xf32> to vector<128xf32>
    %28 = vector.shape_cast %27 : vector<128xf32> to vector<1x128xf32>
    %29 = arith.addf %26, %28 : vector<1x128xf32>
    %cst_12 = arith.constant dense<0.000000e+00> : vector<128xf32>
    %30 = vector.multi_reduction <add>, %17, %cst_12 [0] : vector<16x128xf32> to vector<128xf32>
    %31 = vector.shape_cast %30 : vector<128xf32> to vector<1x128xf32>
    %32 = arith.addf %29, %31 : vector<1x128xf32>
    %cst_13 = arith.constant dense<0.000000e+00> : vector<128xf32>
    %33 = vector.multi_reduction <add>, %22, %cst_13 [0] : vector<16x128xf32> to vector<128xf32>
    %34 = vector.shape_cast %33 : vector<128xf32> to vector<1x128xf32>
    %35 = arith.addf %32, %34 : vector<1x128xf32>
    %cst_14 = arith.constant 6.400000e+01 : f32
    %36 = vector.broadcast %cst_14 : f32 to vector<1x128xf32>
    %37 = arith.divf %35, %36 : vector<1x128xf32>
    %38 = vector.broadcast %37 : vector<1x128xf32> to vector<16x128xf32>
    %39 = arith.subf %7, %38 : vector<16x128xf32>
    %40 = arith.mulf %39, %39 : vector<16x128xf32>
    %cst_15 = arith.constant dense<0.000000e+00> : vector<128xf32>
    %41 = vector.multi_reduction <add>, %40, %cst_15 [0] : vector<16x128xf32> to vector<128xf32>
    %42 = vector.shape_cast %41 : vector<128xf32> to vector<1x128xf32>
    %cst_16 = arith.constant 0.000000e+00 : f32
    %43 = vector.broadcast %cst_16 : f32 to vector<1x128xf32>
    %44 = arith.addf %43, %42 : vector<1x128xf32>
    %45 = vector.broadcast %37 : vector<1x128xf32> to vector<16x128xf32>
    %46 = arith.subf %12, %45 : vector<16x128xf32>
    %47 = arith.mulf %46, %46 : vector<16x128xf32>
    %cst_17 = arith.constant dense<0.000000e+00> : vector<128xf32>
    %48 = vector.multi_reduction <add>, %47, %cst_17 [0] : vector<16x128xf32> to vector<128xf32>
    %49 = vector.shape_cast %48 : vector<128xf32> to vector<1x128xf32>
    %50 = arith.addf %44, %49 : vector<1x128xf32>
    %51 = vector.broadcast %37 : vector<1x128xf32> to vector<16x128xf32>
    %52 = arith.subf %17, %51 : vector<16x128xf32>
    %53 = arith.mulf %52, %52 : vector<16x128xf32>
    %cst_18 = arith.constant dense<0.000000e+00> : vector<128xf32>
    %54 = vector.multi_reduction <add>, %53, %cst_18 [0] : vector<16x128xf32> to vector<128xf32>
    %55 = vector.shape_cast %54 : vector<128xf32> to vector<1x128xf32>
    %56 = arith.addf %50, %55 : vector<1x128xf32>
    %57 = vector.broadcast %37 : vector<1x128xf32> to vector<16x128xf32>
    %58 = arith.subf %22, %57 : vector<16x128xf32>
    %59 = arith.mulf %58, %58 : vector<16x128xf32>
    %cst_19 = arith.constant dense<0.000000e+00> : vector<128xf32>
    %60 = vector.multi_reduction <add>, %59, %cst_19 [0] : vector<16x128xf32> to vector<128xf32>
    %61 = vector.shape_cast %60 : vector<128xf32> to vector<1x128xf32>
    %62 = arith.addf %56, %61 : vector<1x128xf32>
    %cst_20 = arith.constant 6.400000e+01 : f32
    %63 = vector.broadcast %cst_20 : f32 to vector<1x128xf32>
    %64 = arith.divf %62, %63 : vector<1x128xf32>
    %cst_21 = arith.constant 9.99999974E-6 : f32
    %65 = vector.broadcast %cst_21 : f32 to vector<1x128xf32>
    %66 = arith.addf %64, %65 : vector<1x128xf32>
    %67 = math.rsqrt %66 : vector<1x128xf32>
    %c0_22 = arith.constant 0 : index
    %c0_23 = arith.constant 0 : index
    %68 = vector.load %arg3[%c0_22, %c0_23] : memref<1x128xf32, #tpu.memory_space<vmem>>, vector<1x128xf32>
    %69 = arith.mulf %67, %68 : vector<1x128xf32>
    %c0_24 = arith.constant 0 : index
    %c0_25 = arith.constant 0 : index
    %70 = vector.load %arg4[%c0_24, %c0_25] : memref<1x128xf32, #tpu.memory_space<vmem>>, vector<1x128xf32>
    %71 = arith.mulf %37, %69 : vector<1x128xf32>
    %72 = arith.subf %70, %71 : vector<1x128xf32>
    %73 = vector.broadcast %69 : vector<1x128xf32> to vector<16x128xf32>
    %74 = arith.mulf %7, %73 : vector<16x128xf32>
    %75 = vector.broadcast %72 : vector<1x128xf32> to vector<16x128xf32>
    %76 = arith.addf %74, %75 : vector<16x128xf32>
    %cst_26 = arith.constant 0.000000e+00 : f32
    %77 = vector.broadcast %cst_26 : f32 to vector<16x128xf32>
    %78 = arith.maximumf %76, %77 : vector<16x128xf32>
    %c0_27 = arith.constant 0 : index
    %c0_28 = arith.constant 0 : index
    %c0_29 = arith.constant 0 : index
    %c0_30 = arith.constant 0 : index
    %79 = vector.load %arg5[%c0_27, %c0_28, %c0_29, %c0_30] : memref<1x4x16x128xf32, #tpu.memory_space<vmem>>, vector<1x1x16x128xf32>
    %80 = vector.shape_cast %79 : vector<1x1x16x128xf32> to vector<16x128xf32>
    %81 = vector.shape_cast %78 : vector<16x128xf32> to vector<1x1x16x128xf32>
    tpu.vector_store %arg5[%c0_27, %c0_28, %c0_29, %c0_30], %81 {strides = array<i32>} : memref<1x4x16x128xf32, #tpu.memory_space<vmem>>, vector<1x1x16x128xf32>,
    %82 = vector.broadcast %69 : vector<1x128xf32> to vector<16x128xf32>
    %83 = arith.mulf %12, %82 : vector<16x128xf32>
    %84 = vector.broadcast %72 : vector<1x128xf32> to vector<16x128xf32>
    %85 = arith.addf %83, %84 : vector<16x128xf32>
    %cst_31 = arith.constant 0.000000e+00 : f32
    %86 = vector.broadcast %cst_31 : f32 to vector<16x128xf32>
    %87 = arith.maximumf %85, %86 : vector<16x128xf32>
    %c0_32 = arith.constant 0 : index
    %c1 = arith.constant 1 : index
    %c0_33 = arith.constant 0 : index
    %c0_34 = arith.constant 0 : index
    %88 = vector.load %arg5[%c0_32, %c1, %c0_33, %c0_34] : memref<1x4x16x128xf32, #tpu.memory_space<vmem>>, vector<1x1x16x128xf32>
    %89 = vector.shape_cast %88 : vector<1x1x16x128xf32> to vector<16x128xf32>
    %90 = vector.shape_cast %87 : vector<16x128xf32> to vector<1x1x16x128xf32>
    tpu.vector_store %arg5[%c0_32, %c1, %c0_33, %c0_34], %90 {strides = array<i32>} : memref<1x4x16x128xf32, #tpu.memory_space<vmem>>, vector<1x1x16x128xf32>,
    %91 = vector.broadcast %69 : vector<1x128xf32> to vector<16x128xf32>
    %92 = arith.mulf %17, %91 : vector<16x128xf32>
    %93 = vector.broadcast %72 : vector<1x128xf32> to vector<16x128xf32>
    %94 = arith.addf %92, %93 : vector<16x128xf32>
    %cst_35 = arith.constant 0.000000e+00 : f32
    %95 = vector.broadcast %cst_35 : f32 to vector<16x128xf32>
    %96 = arith.maximumf %94, %95 : vector<16x128xf32>
    %c0_36 = arith.constant 0 : index
    %c2 = arith.constant 2 : index
    %c0_37 = arith.constant 0 : index
    %c0_38 = arith.constant 0 : index
    %97 = vector.load %arg5[%c0_36, %c2, %c0_37, %c0_38] : memref<1x4x16x128xf32, #tpu.memory_space<vmem>>, vector<1x1x16x128xf32>
    %98 = vector.shape_cast %97 : vector<1x1x16x128xf32> to vector<16x128xf32>
    %99 = vector.shape_cast %96 : vector<16x128xf32> to vector<1x1x16x128xf32>
    tpu.vector_store %arg5[%c0_36, %c2, %c0_37, %c0_38], %99 {strides = array<i32>} : memref<1x4x16x128xf32, #tpu.memory_space<vmem>>, vector<1x1x16x128xf32>,
    %100 = vector.broadcast %69 : vector<1x128xf32> to vector<16x128xf32>
    %101 = arith.mulf %22, %100 : vector<16x128xf32>
    %102 = vector.broadcast %72 : vector<1x128xf32> to vector<16x128xf32>
    %103 = arith.addf %101, %102 : vector<16x128xf32>
    %cst_39 = arith.constant 0.000000e+00 : f32
    %104 = vector.broadcast %cst_39 : f32 to vector<16x128xf32>
    %105 = arith.maximumf %103, %104 : vector<16x128xf32>
    %c0_40 = arith.constant 0 : index
    %c3 = arith.constant 3 : index
    %c0_41 = arith.constant 0 : index
    %c0_42 = arith.constant 0 : index
    %106 = vector.load %arg5[%c0_40, %c3, %c0_41, %c0_42] : memref<1x4x16x128xf32, #tpu.memory_space<vmem>>, vector<1x1x16x128xf32>
    %107 = vector.shape_cast %106 : vector<1x1x16x128xf32> to vector<16x128xf32>
    %108 = vector.shape_cast %105 : vector<16x128xf32> to vector<1x1x16x128xf32>
    tpu.vector_store %arg5[%c0_40, %c3, %c0_41, %c0_42], %108 {strides = array<i32>} : memref<1x4x16x128xf32, #tpu.memory_space<vmem>>, vector<1x1x16x128xf32>,
    return
  }
  func.func @transform_0(%arg0: i32) -> (i32, i32, i32, i32) {
    %c0_i32 = arith.constant 0 : i32
    %c0_i32_0 = arith.constant 0 : i32
    %c0_i32_1 = arith.constant 0 : i32
    %c0_i32_2 = arith.constant 0 : i32
    return %arg0, %c0_i32, %c0_i32_0, %c0_i32_1 : i32, i32, i32, i32
  }
  func.func @transform_1(%arg0: i32) -> (i32, i32, i32) {
    %c0_i32 = arith.constant 0 : i32
    %c0_i32_0 = arith.constant 0 : i32
    %c0_i32_1 = arith.constant 0 : i32
    %c0_i32_2 = arith.constant 0 : i32
    return %c0_i32, %c0_i32_0, %c0_i32_1 : i32, i32, i32
  }
  func.func @transform_2(%arg0: i32) -> (i32, i32) {
    %c0_i32 = arith.constant 0 : i32
    %c0_i32_0 = arith.constant 0 : i32
    %c0_i32_1 = arith.constant 0 : i32
    return %c0_i32, %c0_i32_0 : i32, i32
  }
  func.func @transform_3(%arg0: i32) -> (i32, i32) {
    %c0_i32 = arith.constant 0 : i32
    %c0_i32_0 = arith.constant 0 : i32
    %c0_i32_1 = arith.constant 0 : i32
    return %c0_i32, %c0_i32_0 : i32, i32
  }
  func.func @transform_4(%arg0: i32) -> (i32, i32, i32, i32) {
    %c0_i32 = arith.constant 0 : i32
    %c0_i32_0 = arith.constant 0 : i32
    %c0_i32_1 = arith.constant 0 : i32
    %c0_i32_2 = arith.constant 0 : i32
    return %arg0, %c0_i32, %c0_i32_0, %c0_i32_1 : i32, i32, i32, i32
  }
}

module attributes {stable_mosaic.version = 11 : i64} {
  func.func @_deconv_in_relu_kernel(%arg0: i32, %arg1: memref<1x4x64x128xbf16, #tpu.memory_space<vmem>>, %arg2: memref<4x128x128xbf16, #tpu.memory_space<vmem>>, %arg3: memref<1x128xf32, #tpu.memory_space<vmem>>, %arg4: memref<1x128xf32, #tpu.memory_space<vmem>>, %arg5: memref<1x4x64x128xf32, #tpu.memory_space<vmem>>) attributes {dimension_semantics = [#tpu.dimension_semantics<parallel>], iteration_bounds = array<i64: 2>, scalar_prefetch = 0 : i64, scratch_operands = 0 : i64, tpu.core_type = #tpu.core_type<tc>, window_params = [{transform_indices = @transform_0, window_bounds = array<i64: 1, 4, 64, 128>}, {pipeline_mode = #tpu.pipeline_mode<synchronous>, transform_indices = @transform_1, window_bounds = array<i64: 4, 128, 128>}, {pipeline_mode = #tpu.pipeline_mode<synchronous>, transform_indices = @transform_2, window_bounds = array<i64: 1, 128>}, {pipeline_mode = #tpu.pipeline_mode<synchronous>, transform_indices = @transform_3, window_bounds = array<i64: 1, 128>}, {transform_indices = @transform_4, window_bounds = array<i64: 1, 4, 64, 128>}]} {
    %c0 = arith.constant 0 : index
    %c0_0 = arith.constant 0 : index
    %c0_1 = arith.constant 0 : index
    %c0_2 = arith.constant 0 : index
    %0 = vector.load %arg1[%c0, %c0_0, %c0_1, %c0_2] : memref<1x4x64x128xbf16, #tpu.memory_space<vmem>>, vector<1x4x64x128xbf16>
    %1 = vector.shape_cast %0 : vector<1x4x64x128xbf16> to vector<4x64x128xbf16>
    %c0_3 = arith.constant 0 : index
    %c0_4 = arith.constant 0 : index
    %c0_5 = arith.constant 0 : index
    %2 = vector.load %arg2[%c0_3, %c0_4, %c0_5] : memref<4x128x128xbf16, #tpu.memory_space<vmem>>, vector<4x128x128xbf16>
    %3 = vector.extract_strided_slice %1 {offsets = [0, 0, 0], sizes = [1, 64, 128], strides = [1, 1, 1]} : vector<4x64x128xbf16> to vector<1x64x128xbf16>
    %4 = vector.shape_cast %3 : vector<1x64x128xbf16> to vector<64x128xbf16>
    %5 = vector.extract_strided_slice %2 {offsets = [0, 0, 0], sizes = [1, 128, 128], strides = [1, 1, 1]} : vector<4x128x128xbf16> to vector<1x128x128xbf16>
    %6 = vector.shape_cast %5 : vector<1x128x128xbf16> to vector<128x128xbf16>
    %cst = arith.constant dense<0.000000e+00> : vector<64x128xf32>
    %7 = tpu.matmul %4, %6, %cst {dimension_numbers = #tpu.dot_dimension_numbers<[1], [0], [0], [1], [0, 0, 1, 1], [], []>} : vector<64x128xbf16>, vector<128x128xbf16>, vector<64x128xf32> -> vector<64x128xf32>
    %8 = vector.extract_strided_slice %1 {offsets = [1, 0, 0], sizes = [1, 64, 128], strides = [1, 1, 1]} : vector<4x64x128xbf16> to vector<1x64x128xbf16>
    %9 = vector.shape_cast %8 : vector<1x64x128xbf16> to vector<64x128xbf16>
    %10 = vector.extract_strided_slice %2 {offsets = [1, 0, 0], sizes = [1, 128, 128], strides = [1, 1, 1]} : vector<4x128x128xbf16> to vector<1x128x128xbf16>
    %11 = vector.shape_cast %10 : vector<1x128x128xbf16> to vector<128x128xbf16>
    %cst_6 = arith.constant dense<0.000000e+00> : vector<64x128xf32>
    %12 = tpu.matmul %9, %11, %cst_6 {dimension_numbers = #tpu.dot_dimension_numbers<[1], [0], [0], [1], [0, 0, 1, 1], [], []>} : vector<64x128xbf16>, vector<128x128xbf16>, vector<64x128xf32> -> vector<64x128xf32>
    %13 = vector.extract_strided_slice %1 {offsets = [2, 0, 0], sizes = [1, 64, 128], strides = [1, 1, 1]} : vector<4x64x128xbf16> to vector<1x64x128xbf16>
    %14 = vector.shape_cast %13 : vector<1x64x128xbf16> to vector<64x128xbf16>
    %15 = vector.extract_strided_slice %2 {offsets = [2, 0, 0], sizes = [1, 128, 128], strides = [1, 1, 1]} : vector<4x128x128xbf16> to vector<1x128x128xbf16>
    %16 = vector.shape_cast %15 : vector<1x128x128xbf16> to vector<128x128xbf16>
    %cst_7 = arith.constant dense<0.000000e+00> : vector<64x128xf32>
    %17 = tpu.matmul %14, %16, %cst_7 {dimension_numbers = #tpu.dot_dimension_numbers<[1], [0], [0], [1], [0, 0, 1, 1], [], []>} : vector<64x128xbf16>, vector<128x128xbf16>, vector<64x128xf32> -> vector<64x128xf32>
    %18 = vector.extract_strided_slice %1 {offsets = [3, 0, 0], sizes = [1, 64, 128], strides = [1, 1, 1]} : vector<4x64x128xbf16> to vector<1x64x128xbf16>
    %19 = vector.shape_cast %18 : vector<1x64x128xbf16> to vector<64x128xbf16>
    %20 = vector.extract_strided_slice %2 {offsets = [3, 0, 0], sizes = [1, 128, 128], strides = [1, 1, 1]} : vector<4x128x128xbf16> to vector<1x128x128xbf16>
    %21 = vector.shape_cast %20 : vector<1x128x128xbf16> to vector<128x128xbf16>
    %cst_8 = arith.constant dense<0.000000e+00> : vector<64x128xf32>
    %22 = tpu.matmul %19, %21, %cst_8 {dimension_numbers = #tpu.dot_dimension_numbers<[1], [0], [0], [1], [0, 0, 1, 1], [], []>} : vector<64x128xbf16>, vector<128x128xbf16>, vector<64x128xf32> -> vector<64x128xf32>
    %cst_9 = arith.constant dense<0.000000e+00> : vector<128xf32>
    %23 = vector.multi_reduction <add>, %7, %cst_9 [0] : vector<64x128xf32> to vector<128xf32>
    %24 = vector.shape_cast %23 : vector<128xf32> to vector<1x128xf32>
    %cst_10 = arith.constant 0.000000e+00 : f32
    %25 = vector.broadcast %cst_10 : f32 to vector<1x128xf32>
    %26 = arith.addf %25, %24 : vector<1x128xf32>
    %cst_11 = arith.constant dense<0.000000e+00> : vector<128xf32>
    %27 = vector.multi_reduction <add>, %12, %cst_11 [0] : vector<64x128xf32> to vector<128xf32>
    %28 = vector.shape_cast %27 : vector<128xf32> to vector<1x128xf32>
    %29 = arith.addf %26, %28 : vector<1x128xf32>
    %cst_12 = arith.constant dense<0.000000e+00> : vector<128xf32>
    %30 = vector.multi_reduction <add>, %17, %cst_12 [0] : vector<64x128xf32> to vector<128xf32>
    %31 = vector.shape_cast %30 : vector<128xf32> to vector<1x128xf32>
    %32 = arith.addf %29, %31 : vector<1x128xf32>
    %cst_13 = arith.constant dense<0.000000e+00> : vector<128xf32>
    %33 = vector.multi_reduction <add>, %22, %cst_13 [0] : vector<64x128xf32> to vector<128xf32>
    %34 = vector.shape_cast %33 : vector<128xf32> to vector<1x128xf32>
    %35 = arith.addf %32, %34 : vector<1x128xf32>
    %cst_14 = arith.constant 2.560000e+02 : f32
    %36 = vector.broadcast %cst_14 : f32 to vector<1x128xf32>
    %37 = arith.divf %35, %36 : vector<1x128xf32>
    %38 = vector.broadcast %37 : vector<1x128xf32> to vector<64x128xf32>
    %39 = arith.subf %7, %38 : vector<64x128xf32>
    %40 = arith.mulf %39, %39 : vector<64x128xf32>
    %cst_15 = arith.constant dense<0.000000e+00> : vector<128xf32>
    %41 = vector.multi_reduction <add>, %40, %cst_15 [0] : vector<64x128xf32> to vector<128xf32>
    %42 = vector.shape_cast %41 : vector<128xf32> to vector<1x128xf32>
    %cst_16 = arith.constant 0.000000e+00 : f32
    %43 = vector.broadcast %cst_16 : f32 to vector<1x128xf32>
    %44 = arith.addf %43, %42 : vector<1x128xf32>
    %45 = vector.broadcast %37 : vector<1x128xf32> to vector<64x128xf32>
    %46 = arith.subf %12, %45 : vector<64x128xf32>
    %47 = arith.mulf %46, %46 : vector<64x128xf32>
    %cst_17 = arith.constant dense<0.000000e+00> : vector<128xf32>
    %48 = vector.multi_reduction <add>, %47, %cst_17 [0] : vector<64x128xf32> to vector<128xf32>
    %49 = vector.shape_cast %48 : vector<128xf32> to vector<1x128xf32>
    %50 = arith.addf %44, %49 : vector<1x128xf32>
    %51 = vector.broadcast %37 : vector<1x128xf32> to vector<64x128xf32>
    %52 = arith.subf %17, %51 : vector<64x128xf32>
    %53 = arith.mulf %52, %52 : vector<64x128xf32>
    %cst_18 = arith.constant dense<0.000000e+00> : vector<128xf32>
    %54 = vector.multi_reduction <add>, %53, %cst_18 [0] : vector<64x128xf32> to vector<128xf32>
    %55 = vector.shape_cast %54 : vector<128xf32> to vector<1x128xf32>
    %56 = arith.addf %50, %55 : vector<1x128xf32>
    %57 = vector.broadcast %37 : vector<1x128xf32> to vector<64x128xf32>
    %58 = arith.subf %22, %57 : vector<64x128xf32>
    %59 = arith.mulf %58, %58 : vector<64x128xf32>
    %cst_19 = arith.constant dense<0.000000e+00> : vector<128xf32>
    %60 = vector.multi_reduction <add>, %59, %cst_19 [0] : vector<64x128xf32> to vector<128xf32>
    %61 = vector.shape_cast %60 : vector<128xf32> to vector<1x128xf32>
    %62 = arith.addf %56, %61 : vector<1x128xf32>
    %cst_20 = arith.constant 2.560000e+02 : f32
    %63 = vector.broadcast %cst_20 : f32 to vector<1x128xf32>
    %64 = arith.divf %62, %63 : vector<1x128xf32>
    %cst_21 = arith.constant 9.99999974E-6 : f32
    %65 = vector.broadcast %cst_21 : f32 to vector<1x128xf32>
    %66 = arith.addf %64, %65 : vector<1x128xf32>
    %67 = math.rsqrt %66 : vector<1x128xf32>
    %c0_22 = arith.constant 0 : index
    %c0_23 = arith.constant 0 : index
    %68 = vector.load %arg3[%c0_22, %c0_23] : memref<1x128xf32, #tpu.memory_space<vmem>>, vector<1x128xf32>
    %69 = arith.mulf %67, %68 : vector<1x128xf32>
    %c0_24 = arith.constant 0 : index
    %c0_25 = arith.constant 0 : index
    %70 = vector.load %arg4[%c0_24, %c0_25] : memref<1x128xf32, #tpu.memory_space<vmem>>, vector<1x128xf32>
    %71 = arith.mulf %37, %69 : vector<1x128xf32>
    %72 = arith.subf %70, %71 : vector<1x128xf32>
    %73 = vector.broadcast %69 : vector<1x128xf32> to vector<64x128xf32>
    %74 = arith.mulf %7, %73 : vector<64x128xf32>
    %75 = vector.broadcast %72 : vector<1x128xf32> to vector<64x128xf32>
    %76 = arith.addf %74, %75 : vector<64x128xf32>
    %cst_26 = arith.constant 0.000000e+00 : f32
    %77 = vector.broadcast %cst_26 : f32 to vector<64x128xf32>
    %78 = arith.maximumf %76, %77 : vector<64x128xf32>
    %c0_27 = arith.constant 0 : index
    %c0_28 = arith.constant 0 : index
    %c0_29 = arith.constant 0 : index
    %c0_30 = arith.constant 0 : index
    %79 = vector.load %arg5[%c0_27, %c0_28, %c0_29, %c0_30] : memref<1x4x64x128xf32, #tpu.memory_space<vmem>>, vector<1x1x64x128xf32>
    %80 = vector.shape_cast %79 : vector<1x1x64x128xf32> to vector<64x128xf32>
    %81 = vector.shape_cast %78 : vector<64x128xf32> to vector<1x1x64x128xf32>
    tpu.vector_store %arg5[%c0_27, %c0_28, %c0_29, %c0_30], %81 {strides = array<i32>} : memref<1x4x64x128xf32, #tpu.memory_space<vmem>>, vector<1x1x64x128xf32>,
    %82 = vector.broadcast %69 : vector<1x128xf32> to vector<64x128xf32>
    %83 = arith.mulf %12, %82 : vector<64x128xf32>
    %84 = vector.broadcast %72 : vector<1x128xf32> to vector<64x128xf32>
    %85 = arith.addf %83, %84 : vector<64x128xf32>
    %cst_31 = arith.constant 0.000000e+00 : f32
    %86 = vector.broadcast %cst_31 : f32 to vector<64x128xf32>
    %87 = arith.maximumf %85, %86 : vector<64x128xf32>
    %c0_32 = arith.constant 0 : index
    %c1 = arith.constant 1 : index
    %c0_33 = arith.constant 0 : index
    %c0_34 = arith.constant 0 : index
    %88 = vector.load %arg5[%c0_32, %c1, %c0_33, %c0_34] : memref<1x4x64x128xf32, #tpu.memory_space<vmem>>, vector<1x1x64x128xf32>
    %89 = vector.shape_cast %88 : vector<1x1x64x128xf32> to vector<64x128xf32>
    %90 = vector.shape_cast %87 : vector<64x128xf32> to vector<1x1x64x128xf32>
    tpu.vector_store %arg5[%c0_32, %c1, %c0_33, %c0_34], %90 {strides = array<i32>} : memref<1x4x64x128xf32, #tpu.memory_space<vmem>>, vector<1x1x64x128xf32>,
    %91 = vector.broadcast %69 : vector<1x128xf32> to vector<64x128xf32>
    %92 = arith.mulf %17, %91 : vector<64x128xf32>
    %93 = vector.broadcast %72 : vector<1x128xf32> to vector<64x128xf32>
    %94 = arith.addf %92, %93 : vector<64x128xf32>
    %cst_35 = arith.constant 0.000000e+00 : f32
    %95 = vector.broadcast %cst_35 : f32 to vector<64x128xf32>
    %96 = arith.maximumf %94, %95 : vector<64x128xf32>
    %c0_36 = arith.constant 0 : index
    %c2 = arith.constant 2 : index
    %c0_37 = arith.constant 0 : index
    %c0_38 = arith.constant 0 : index
    %97 = vector.load %arg5[%c0_36, %c2, %c0_37, %c0_38] : memref<1x4x64x128xf32, #tpu.memory_space<vmem>>, vector<1x1x64x128xf32>
    %98 = vector.shape_cast %97 : vector<1x1x64x128xf32> to vector<64x128xf32>
    %99 = vector.shape_cast %96 : vector<64x128xf32> to vector<1x1x64x128xf32>
    tpu.vector_store %arg5[%c0_36, %c2, %c0_37, %c0_38], %99 {strides = array<i32>} : memref<1x4x64x128xf32, #tpu.memory_space<vmem>>, vector<1x1x64x128xf32>,
    %100 = vector.broadcast %69 : vector<1x128xf32> to vector<64x128xf32>
    %101 = arith.mulf %22, %100 : vector<64x128xf32>
    %102 = vector.broadcast %72 : vector<1x128xf32> to vector<64x128xf32>
    %103 = arith.addf %101, %102 : vector<64x128xf32>
    %cst_39 = arith.constant 0.000000e+00 : f32
    %104 = vector.broadcast %cst_39 : f32 to vector<64x128xf32>
    %105 = arith.maximumf %103, %104 : vector<64x128xf32>
    %c0_40 = arith.constant 0 : index
    %c3 = arith.constant 3 : index
    %c0_41 = arith.constant 0 : index
    %c0_42 = arith.constant 0 : index
    %106 = vector.load %arg5[%c0_40, %c3, %c0_41, %c0_42] : memref<1x4x64x128xf32, #tpu.memory_space<vmem>>, vector<1x1x64x128xf32>
    %107 = vector.shape_cast %106 : vector<1x1x64x128xf32> to vector<64x128xf32>
    %108 = vector.shape_cast %105 : vector<64x128xf32> to vector<1x1x64x128xf32>
    tpu.vector_store %arg5[%c0_40, %c3, %c0_41, %c0_42], %108 {strides = array<i32>} : memref<1x4x64x128xf32, #tpu.memory_space<vmem>>, vector<1x1x64x128xf32>,
    return
  }
  func.func @transform_0(%arg0: i32) -> (i32, i32, i32, i32) {
    %c0_i32 = arith.constant 0 : i32
    %c0_i32_0 = arith.constant 0 : i32
    %c0_i32_1 = arith.constant 0 : i32
    %c0_i32_2 = arith.constant 0 : i32
    return %arg0, %c0_i32, %c0_i32_0, %c0_i32_1 : i32, i32, i32, i32
  }
  func.func @transform_1(%arg0: i32) -> (i32, i32, i32) {
    %c0_i32 = arith.constant 0 : i32
    %c0_i32_0 = arith.constant 0 : i32
    %c0_i32_1 = arith.constant 0 : i32
    %c0_i32_2 = arith.constant 0 : i32
    return %c0_i32, %c0_i32_0, %c0_i32_1 : i32, i32, i32
  }
  func.func @transform_2(%arg0: i32) -> (i32, i32) {
    %c0_i32 = arith.constant 0 : i32
    %c0_i32_0 = arith.constant 0 : i32
    %c0_i32_1 = arith.constant 0 : i32
    return %c0_i32, %c0_i32_0 : i32, i32
  }
  func.func @transform_3(%arg0: i32) -> (i32, i32) {
    %c0_i32 = arith.constant 0 : i32
    %c0_i32_0 = arith.constant 0 : i32
    %c0_i32_1 = arith.constant 0 : i32
    return %c0_i32, %c0_i32_0 : i32, i32
  }
  func.func @transform_4(%arg0: i32) -> (i32, i32, i32, i32) {
    %c0_i32 = arith.constant 0 : i32
    %c0_i32_0 = arith.constant 0 : i32
    %c0_i32_1 = arith.constant 0 : i32
    %c0_i32_2 = arith.constant 0 : i32
    return %arg0, %c0_i32, %c0_i32_0, %c0_i32_1 : i32, i32, i32, i32
  }
}

module attributes {stable_mosaic.version = 11 : i64} {
  func.func @_conv_tanh_kernel(%arg0: i32, %arg1: memref<1x256x784xbf16, #tpu.memory_space<vmem>>, %arg2: memref<784x128xbf16, #tpu.memory_space<vmem>>, %arg3: memref<1x256x128xf32, #tpu.memory_space<vmem>>) attributes {dimension_semantics = [#tpu.dimension_semantics<parallel>], iteration_bounds = array<i64: 2>, scalar_prefetch = 0 : i64, scratch_operands = 0 : i64, tpu.core_type = #tpu.core_type<tc>, window_params = [{transform_indices = @transform_0, window_bounds = array<i64: 1, 256, 784>}, {pipeline_mode = #tpu.pipeline_mode<synchronous>, transform_indices = @transform_1, window_bounds = array<i64: 784, 128>}, {transform_indices = @transform_2, window_bounds = array<i64: 1, 256, 128>}]} {
    %c0 = arith.constant 0 : index
    %c0_0 = arith.constant 0 : index
    %c0_1 = arith.constant 0 : index
    %0 = vector.load %arg1[%c0, %c0_0, %c0_1] : memref<1x256x784xbf16, #tpu.memory_space<vmem>>, vector<1x256x784xbf16>
    %1 = vector.shape_cast %0 : vector<1x256x784xbf16> to vector<256x784xbf16>
    %c0_2 = arith.constant 0 : index
    %c0_3 = arith.constant 0 : index
    %2 = vector.load %arg2[%c0_2, %c0_3] : memref<784x128xbf16, #tpu.memory_space<vmem>>, vector<784x128xbf16>
    %cst = arith.constant dense<0.000000e+00> : vector<256x128xf32>
    %3 = tpu.matmul %1, %2, %cst {dimension_numbers = #tpu.dot_dimension_numbers<[1], [0], [0], [1], [0, 0, 1, 1], [], []>} : vector<256x784xbf16>, vector<784x128xbf16>, vector<256x128xf32> -> vector<256x128xf32>
    %4 = math.tanh %3 : vector<256x128xf32>
    %c0_4 = arith.constant 0 : index
    %c0_5 = arith.constant 0 : index
    %c0_6 = arith.constant 0 : index
    %5 = vector.load %arg3[%c0_4, %c0_5, %c0_6] : memref<1x256x128xf32, #tpu.memory_space<vmem>>, vector<1x256x128xf32>
    %6 = vector.shape_cast %5 : vector<1x256x128xf32> to vector<256x128xf32>
    %7 = vector.shape_cast %4 : vector<256x128xf32> to vector<1x256x128xf32>
    tpu.vector_store %arg3[%c0_4, %c0_5, %c0_6], %7 {strides = array<i32>} : memref<1x256x128xf32, #tpu.memory_space<vmem>>, vector<1x256x128xf32>,
    return
  }
  func.func @transform_0(%arg0: i32) -> (i32, i32, i32) {
    %c0_i32 = arith.constant 0 : i32
    %c0_i32_0 = arith.constant 0 : i32
    %c0_i32_1 = arith.constant 0 : i32
    return %arg0, %c0_i32, %c0_i32_0 : i32, i32, i32
  }
  func.func @transform_1(%arg0: i32) -> (i32, i32) {
    %c0_i32 = arith.constant 0 : i32
    %c0_i32_0 = arith.constant 0 : i32
    %c0_i32_1 = arith.constant 0 : i32
    return %c0_i32, %c0_i32_0 : i32, i32
  }
  func.func @transform_2(%arg0: i32) -> (i32, i32, i32) {
    %c0_i32 = arith.constant 0 : i32
    %c0_i32_0 = arith.constant 0 : i32
    %c0_i32_1 = arith.constant 0 : i32
    return %arg0, %c0_i32, %c0_i32_0 : i32, i32, i32
  }
}

</mosaic_0001>

<bundles_post_ra>
// kernel: generator_forward.10
= control target key start
LH: loop header
LB: loop body
LE: loop exit
PB: predicated region body
PF: predicated region fallthrough
CT: control target
= control target key end

     0   :  { %s1875_s15 = smov 0   ;;  %s2337_s0 = inlined_call_operand.vmem [shape: bf16[2,256,392], index: 0, kind: input, shape index: {}]   ;;  %s2338_s1 = inlined_call_operand.vmem [shape: bf16[392,128], index: 1, kind: input, shape index: {}]   ;;  %s2339_s2 = inlined_call_operand.vmem [shape: f32[1,128], index: 2, kind: input, shape index: {}]   ;;  %s2340_s3 = inlined_call_operand.vmem [shape: f32[1,128], index: 3, kind: input, shape index: {}]   ;;  %s2341_s4 = inlined_call_operand.vmem [shape: f32[2,256,128], index: 4, kind: output, shape index: {}]  }
   0x1 LB: > { %s1479_s16 = sadd.s32 4294967295, %s1847_s15   ;;  %p1483_p0 = scmp.ge.s32.totalorder %s1847_s15, 1  ;;  %s1847_s15 = sphi %s1875_s15, %s14_s15  }
   0x2   : > { %p162_p1 = scmp.lt.s32.totalorder %s1847_s15, 3 }
   0x4   : > { %p163_p2 = pnand %p1483_p0, %p162_p1 }
   0x5   : > { %v1718_v0 = vld [vmem:[%s2338_s1 + $0x40] sm:$0xff] (!%p163_p2)   ;;  %v1849_v1 = vmov (!%p163_p2), 0   ;;  %v1721_v4 = vld [vmem:[%s2338_s1 + $0x48] sm:$0xff] (!%p163_p2)   ;;  %v1724_v7 = vld [vmem:[%s2338_s1 + $0x50] sm:$0xff] (!%p163_p2)   ;;  %p188_p3 = scmp.lt.s32.totalorder (!%p163_p2), %s1479_s16, 1  ;;  %vm763_vm0 = vcmask (!%p163_p2), 64512  }
   0x6   : > { %166 = sbr.rel (%p163_p2) target bundleno = 526 (0x20e), region = 36  ;;  %977 = vmatprep.subr.bf16.mxu1 (!%p163_p2), %v1849_v1  ;;  %v1719_v2 = vld [vmem:[%s2338_s1 + $0x80] sm:$0xff] (!%p163_p2)   ;;  %1597 = vmatprep.subr.bf16.mxu0 (!%p163_p2), %v1718_v0  ;;  %v1722_v5 = vld [vmem:[%s2338_s1 + $0x88] sm:$0xff] (!%p163_p2)   ;;  %v1725_v8 = vld [vmem:[%s2338_s1 + $0x90] sm:$0xff] (!%p163_p2)   ;;  %vm812_vm1 = vcmask (!%p163_p2), 1043456  }
   0x7   : > { %v1720_v3 = vld [vmem:[%s2338_s1] sm:$0xff] (!%p163_p2)   ;;  %978 = vmatpush1.bf16.msra.mxu1 (!%p163_p2), %v1719_v2  ;;  %v1723_v6 = vld [vmem:[%s2338_s1 + $0x8] sm:$0xff] (!%p163_p2)   ;;  %v1726_v9 = vld [vmem:[%s2338_s1 + $0x10] sm:$0xff] (!%p163_p2)  }
   0x8   : > { %1598 = vmatpush3.bf16.msra.mxu0 (!%p163_p2), %v1720_v3  ;;  %979 = vmatprep.subr.bf16.mxu1 (!%p163_p2), %v1849_v1  ;;  %v1727_v10 = vld [vmem:[%s2338_s1 + $0x58] sm:$0xff] (!%p163_p2)   ;;  %v1730_v13 = vld [vmem:[%s2338_s1 + $0x60] sm:$0xff] (!%p163_p2)   ;;  %v1733_v16 = vld [vmem:[%s2338_s1 + $0x68] sm:$0xff] (!%p163_p2)  }
   0x9   : > { %1599 = vmatprep.subr.bf16.mxu0 (!%p163_p2), %v1721_v4  ;;  %v1728_v11 = vld [vmem:[%s2338_s1 + $0x98] sm:$0xff] (!%p163_p2)   ;;  %v1731_v14 = vld [vmem:[%s2338_s1 + $0xa0] sm:$0xff] (!%p163_p2)   ;;  %v1734_v17 = vld [vmem:[%s2338_s1 + $0xa8] sm:$0xff] (!%p163_p2)  }
   0xa   : > { %v1729_v12 = vld [vmem:[%s2338_s1 + $0x18] sm:$0xff] (!%p163_p2)   ;;  %v1732_v15 = vld [vmem:[%s2338_s1 + $0x20] sm:$0xff] (!%p163_p2)   ;;  %v1735_v18 = vld [vmem:[%s2338_s1 + $0x28] sm:$0xff] (!%p163_p2)  }
   0xb   : > { %980 = vmatpush1.bf16.msra.mxu1 (!%p163_p2), %v1722_v5  ;;  %v1736_v19 = vld [vmem:[%s2338_s1 + $0x70] sm:$0xff] (!%p163_p2)   ;;  %v1739_v22 = vld [vmem:[%s2338_s1 + $0x78] sm:$0xff] (!%p163_p2)   ;;  %v1745_v27 = vld [vmem:[%s2338_s1 + $0xc0] ss:$0 sps:$4 sm:$0xff] (!%p163_p2)  }
   0xc   : > { %1600 = vmatpush3.bf16.msra.mxu0 (!%p163_p2), %v1723_v6  ;;  %981 = vmatprep.subr.bf16.mxu1 (!%p163_p2), %v1849_v1  ;;  %v1737_v20 = vld [vmem:[%s2338_s1 + $0xb0] sm:$0xff] (!%p163_p2)   ;;  %v1740_v24 = vld [vmem:[%s2338_s1 + $0xb8] sm:$0xff] (!%p163_p2)   ;;  %v814_v29 = vsel (!%p163_p2), %vm812_vm1, %v1745_v27, 0 }
   0xd   : > { %1601 = vmatprep.subr.bf16.mxu0 %v1724_v7  ;;  %s2343_s16 = smov (!%p188_p3, %s1479_s16), 1  ;;  %v1738_v21 = vld [vmem:[%s2338_s1 + $0x30] sm:$0xff]   ;;  %v1741_v26 = vld [vmem:[%s2338_s1 + $0x38] sm:$0xff]  }
   0xe   : > { %s1595_s27 = sshll.u32 %s2343_s16, 9 }
   0xf   : > { %982 = vmatpush1.bf16.msra.mxu1 %v1725_v8  ;;  %s1956_s8 = scalar_lea.vmem %s2337_s0, %s1595_s27  ;;  %s1596_s27 = sshll.u32 %s2343_s16, 8 }
  0x10   : > { %1602 = vmatpush3.bf16.msra.mxu0 %v1726_v9  ;;  %983 = vmatprep.subr.bf16.mxu1 %v1849_v1  ;;  %v1744_v23 = vld [vmem:[%s1956_s8 + $0x4] ss:$16 sps:$4 sm:$0xff]   ;;  %v1748_v25 = vld [vmem:[%s1956_s8 + $0xc] ss:$16 sps:$4 sm:$0xff]   ;;  %v1742_v28 = vld [vmem:[%s1956_s8] ss:$16 sps:$4 sm:$0xff]   ;;  %s2280_s29 = scalar_lea.vmem %s2341_s4, %s1596_s27 }
  0x11   : > { %1603 = vmatprep.subr.bf16.mxu0 %v1727_v10  ;;  %848 = vmatprep.mubr.bf16.mxu0 %v1744_v23  ;;  %v1749_v30 = vld [vmem:[%s1956_s8 + $0x24] ss:$16 sps:$4 sm:$0xff]   ;;  %v1746_v31 = vld [vmem:[%s1956_s8 + $0x8] ss:$16 sps:$4 sm:$0xff]   ;;  %v1752_v32 = vld [vmem:[%s1956_s8 + $0x2c] ss:$16 sps:$4 sm:$0xff]  }
  0x12   : > { %1577 = vmatprep.mubr.msk.bf16.mxu1 %vm763_vm0, %v1748_v25  ;;  %v1751_v33 = vld [vmem:[%s1956_s8 + $0x20] ss:$16 sps:$4 sm:$0xff]   ;;  %v1755_v34 = vld [vmem:[%s1956_s8 + $0x44] ss:$16 sps:$4 sm:$0xff]   ;;  %v1754_v35 = vld [vmem:[%s1956_s8 + $0x28] ss:$16 sps:$4 sm:$0xff]  }
  0x13   : > { %984 = vmatpush1.bf16.msra.mxu1 %v1728_v11  ;;  %v1758_v36 = vld [vmem:[%s1956_s8 + $0x4c] ss:$16 sps:$4 sm:$0xff]   ;;  %v1757_v37 = vld [vmem:[%s1956_s8 + $0x40] ss:$16 sps:$4 sm:$0xff]   ;;  %v1761_v38 = vld [vmem:[%s1956_s8 + $0x64] ss:$16 sps:$4 sm:$0xff]  }
  0x14   : > { %1604 = vmatpush3.bf16.msra.mxu0 %v1729_v12  ;;  %985 = vmatprep.subr.bf16.mxu1 %v1849_v1  ;;  %v1760_v39 = vld [vmem:[%s1956_s8 + $0x48] ss:$16 sps:$4 sm:$0xff]   ;;  %v1764_v40 = vld [vmem:[%s1956_s8 + $0x6c] ss:$16 sps:$4 sm:$0xff]   ;;  %v1763_v41 = vld [vmem:[%s1956_s8 + $0x60] ss:$16 sps:$4 sm:$0xff]  }
  0x15   : > { %1605 = vmatprep.subr.bf16.mxu0 %v1730_v13  ;;  %v1767_v42 = vld [vmem:[%s1956_s8 + $0x84] ss:$16 sps:$4 sm:$0xff]   ;;  %v1766_v43 = vld [vmem:[%s1956_s8 + $0x68] ss:$16 sps:$4 sm:$0xff]   ;;  %v1770_v44 = vld [vmem:[%s1956_s8 + $0x8c] ss:$16 sps:$4 sm:$0xff]  }
  0x16   : > { %v1769_v45 = vld [vmem:[%s1956_s8 + $0x80] ss:$16 sps:$4 sm:$0xff]   ;;  %v1773_v46 = vld [vmem:[%s1956_s8 + $0xa4] ss:$16 sps:$4 sm:$0xff]   ;;  %v1772_v47 = vld [vmem:[%s1956_s8 + $0x88] ss:$16 sps:$4 sm:$0xff]  }
  0x17   : > { %986 = vmatpush1.bf16.msra.mxu1 %v1731_v14  ;;  %v1776_v48 = vld [vmem:[%s1956_s8 + $0xac] ss:$16 sps:$4 sm:$0xff]   ;;  %v1775_v49 = vld [vmem:[%s1956_s8 + $0xa0] ss:$16 sps:$4 sm:$0xff]   ;;  %v1779_v50 = vld [vmem:[%s1956_s8 + $0xc4] ss:$16 sps:$4 sm:$0xff]  }
  0x18   : > { %1606 = vmatpush3.bf16.msra.mxu0 %v1732_v15  ;;  %987 = vmatprep.subr.bf16.mxu1 %v1849_v1  ;;  %v1778_v51 = vld [vmem:[%s1956_s8 + $0xa8] ss:$16 sps:$4 sm:$0xff]   ;;  %v1782_v52 = vld [vmem:[%s1956_s8 + $0xcc] ss:$16 sps:$4 sm:$0xff]   ;;  %v1781_v53 = vld [vmem:[%s1956_s8 + $0xc0] ss:$16 sps:$4 sm:$0xff]  }
  0x19   : > { %1607 = vmatprep.subr.bf16.mxu0 %v1733_v16  ;;  %v1785_v54 = vld [vmem:[%s1956_s8 + $0xe4] ss:$16 sps:$4 sm:$0xff]   ;;  %v1784_v55 = vld [vmem:[%s1956_s8 + $0xc8] ss:$16 sps:$4 sm:$0xff]   ;;  %v1788_v56 = vld [vmem:[%s1956_s8 + $0xec] ss:$16 sps:$4 sm:$0xff]  }
  0x1a   : > { %v1787_v57 = vld [vmem:[%s1956_s8 + $0xe0] ss:$16 sps:$4 sm:$0xff]   ;;  %v1791_v58 = vld [vmem:[%s1956_s8 + $0x104] ss:$16 sps:$4 sm:$0xff]   ;;  %v1790_v59 = vld [vmem:[%s1956_s8 + $0xe8] ss:$16 sps:$4 sm:$0xff]  }
  0x1b   : > { %988 = vmatpush1.bf16.msra.mxu1 %v1734_v17  ;;  %v1794_v60 = vld [vmem:[%s1956_s8 + $0x10c] ss:$16 sps:$4 sm:$0xff]   ;;  %v1793_v61 = vld [vmem:[%s1956_s8 + $0x100] ss:$16 sps:$4 sm:$0xff]   ;;  %v1797_v62 = vld [vmem:[%s1956_s8 + $0x124] ss:$16 sps:$4 sm:$0xff]  }
  0x1c   : > { %1608 = vmatpush3.bf16.msra.mxu0 %v1735_v18  ;;  %989 = vmatprep.subr.bf16.mxu1 %v1849_v1  ;;  %v1796_v63 = vld [vmem:[%s1956_s8 + $0x108] ss:$16 sps:$4 sm:$0xff]   ;;  %v1800_v0 = vld [vmem:[%s1956_s8 + $0x12c] ss:$16 sps:$4 sm:$0xff]   ;;  %v1803_v2 = vld [vmem:[%s1956_s8 + $0x144] ss:$16 sps:$4 sm:$0xff]  }
  0x1d   : > { %1609 = vmatprep.subr.bf16.mxu0 %v1736_v19  ;;  %v1802_v3 = vld [vmem:[%s1956_s8 + $0x128] ss:$16 sps:$4 sm:$0xff]   ;;  %v1806_v4 = vld [vmem:[%s1956_s8 + $0x14c] ss:$16 sps:$4 sm:$0xff]   ;;  %v1805_v5 = vld [vmem:[%s1956_s8 + $0x140] ss:$16 sps:$4 sm:$0xff]  }
  0x1e   : > { %v1809_v6 = vld [vmem:[%s1956_s8 + $0x164] ss:$16 sps:$4 sm:$0xff]   ;;  %v1808_v7 = vld [vmem:[%s1956_s8 + $0x148] ss:$16 sps:$4 sm:$0xff]   ;;  %v1812_v8 = vld [vmem:[%s1956_s8 + $0x16c] ss:$16 sps:$4 sm:$0xff]  }
  0x1f   : > { %990 = vmatpush1.bf16.msra.mxu1 %v1737_v20  ;;  %v1811_v9 = vld [vmem:[%s1956_s8 + $0x160] ss:$16 sps:$4 sm:$0xff]   ;;  %v1815_v10 = vld [vmem:[%s1956_s8 + $0x184] ss:$16 sps:$4 sm:$0xff]   ;;  %v1814_v11 = vld [vmem:[%s1956_s8 + $0x168] ss:$16 sps:$4 sm:$0xff]  }
  0x20   : > { %1610 = vmatpush3.bf16.msra.mxu0 %v1738_v21  ;;  %991 = vmatprep.subr.bf16.mxu1 %v1849_v1  ;;  %v1818_v12 = vld [vmem:[%s1956_s8 + $0x18c] ss:$16 sps:$4 sm:$0xff]   ;;  %v1817_v13 = vld [vmem:[%s1956_s8 + $0x180] ss:$16 sps:$4 sm:$0xff]   ;;  %v1821_v14 = vld [vmem:[%s1956_s8 + $0x1a4] ss:$16 sps:$4 sm:$0xff]  }
  0x21   : > { %1611 = vmatprep.subr.bf16.mxu0 %v1739_v22  ;;  %v1820_v15 = vld [vmem:[%s1956_s8 + $0x188] ss:$16 sps:$4 sm:$0xff]   ;;  %v1824_v16 = vld [vmem:[%s1956_s8 + $0x1ac] ss:$16 sps:$4 sm:$0xff]   ;;  %v1823_v17 = vld [vmem:[%s1956_s8 + $0x1a0] ss:$16 sps:$4 sm:$0xff]  }
  0x22   : > { %v1827_v18 = vld [vmem:[%s1956_s8 + $0x1c4] ss:$16 sps:$4 sm:$0xff]   ;;  %v1826_v19 = vld [vmem:[%s1956_s8 + $0x1a8] ss:$16 sps:$4 sm:$0xff]   ;;  %v1830_v20 = vld [vmem:[%s1956_s8 + $0x1cc] ss:$16 sps:$4 sm:$0xff]  }
  0x23   : > { %992 = vmatpush1.bf16.msra.mxu1 %v1740_v24  ;;  %v1829_v21 = vld [vmem:[%s1956_s8 + $0x1c0] ss:$16 sps:$4 sm:$0xff]   ;;  %v1833_v22 = vld [vmem:[%s1956_s8 + $0x1e4] ss:$16 sps:$4 sm:$0xff]   ;;  %v1832_v23 = vld [vmem:[%s1956_s8 + $0x1c8] ss:$16 sps:$4 sm:$0xff]  }
  0x24   : > { %1612 = vmatpush3.bf16.msra.mxu0 %v1741_v26  ;;  %993 = vmatprep.subr.bf16.mxu1 %v1849_v1  ;;  %v1799_v1 = vld [vmem:[%s1956_s8 + $0x120] ss:$16 sps:$4 sm:$0xff]   ;;  %v1836_v24 = vld [vmem:[%s1956_s8 + $0x1ec] ss:$16 sps:$4 sm:$0xff]   ;;  %v1838_v26 = vld [vmem:[%s1956_s8 + $0x1e8] ss:$16 sps:$4 sm:$0xff]  }
  0x25   : > { %v1835_v25 = vld [vmem:[%s1956_s8 + $0x1e0] ss:$16 sps:$4 sm:$0xff]  }
  0x27   : > { %849 = vmatmul.mubr.bf16.vlgmr.msra.gmra.mrb[0].mxu0 %v1742_v28  ;;  %994 = vmatpush1.bf16.msra.mxu1 %v814_v29 }
  0x28   : > { %856 = vmatprep.mubr.bf16.mxu0 %v1749_v30 }
  0x2a   : > { %1010 = vmatmul.mubr.bf16.vlgmr.msra.gmra.mrb[0].mxu1 %v1746_v31 }
  0x2b   : > { %1578 = vmatprep.mubr.msk.bf16.mxu1 %vm763_vm0, %v1752_v32 }
  0x2f   : > { %857 = vmatmul.mubr.bf16.gmra.mrb[4].mxu0 %v1751_v33 }
  0x30   : > { %864 = vmatprep.mubr.bf16.mxu0 %v1755_v34 }
  0x32   : > { %1018 = vmatmul.mubr.bf16.gmra.mrb[4].mxu1 %v1754_v35 }
  0x33   : > { %1579 = vmatprep.mubr.msk.bf16.mxu1 %vm763_vm0, %v1758_v36 }
  0x37   : > { %865 = vmatmul.mubr.bf16.gmra.mrb[8].mxu0 %v1757_v37 }
  0x38   : > { %872 = vmatprep.mubr.bf16.mxu0 %v1761_v38 }
  0x3a   : > { %1026 = vmatmul.mubr.bf16.gmra.mrb[8].mxu1 %v1760_v39 }
  0x3b   : > { %1580 = vmatprep.mubr.msk.bf16.mxu1 %vm763_vm0, %v1764_v40 }
  0x3f   : > { %873 = vmatmul.mubr.bf16.gmra.mrb[12].mxu0 %v1763_v41 }
  0x40   : > { %880 = vmatprep.mubr.bf16.mxu0 %v1767_v42 }
  0x42   : > { %1034 = vmatmul.mubr.bf16.gmra.mrb[12].mxu1 %v1766_v43 }
  0x43   : > { %1581 = vmatprep.mubr.msk.bf16.mxu1 %vm763_vm0, %v1770_v44 }
  0x47   : > { %881 = vmatmul.mubr.bf16.gmra.mrb[16].mxu0 %v1769_v45 }
  0x48   : > { %888 = vmatprep.mubr.bf16.mxu0 %v1773_v46 }
  0x4a   : > { %1042 = vmatmul.mubr.bf16.gmra.mrb[16].mxu1 %v1772_v47 }
  0x4b   : > { %1582 = vmatprep.mubr.msk.bf16.mxu1 %vm763_vm0, %v1776_v48 }
  0x4f   : > { %889 = vmatmul.mubr.bf16.gmra.mrb[20].mxu0 %v1775_v49 }
  0x50   : > { %896 = vmatprep.mubr.bf16.mxu0 %v1779_v50 }
  0x52   : > { %1050 = vmatmul.mubr.bf16.gmra.mrb[20].mxu1 %v1778_v51 }
  0x53   : > { %1583 = vmatprep.mubr.msk.bf16.mxu1 %vm763_vm0, %v1782_v52 }
  0x57   : > { %897 = vmatmul.mubr.bf16.gmra.mrb[24].mxu0 %v1781_v53 }
  0x58   : > { %904 = vmatprep.mubr.bf16.mxu0 %v1785_v54 }
  0x5a   : > { %1058 = vmatmul.mubr.bf16.gmra.mrb[24].mxu1 %v1784_v55 }
  0x5b   : > { %1584 = vmatprep.mubr.msk.bf16.mxu1 %vm763_vm0, %v1788_v56 }
  0x5f   : > { %905 = vmatmul.mubr.bf16.gmra.mrb[28].mxu0 %v1787_v57 }
  0x60   : > { %912 = vmatprep.mubr.bf16.mxu0 %v1791_v58 }
  0x62   : > { %1066 = vmatmul.mubr.bf16.gmra.mrb[28].mxu1 %v1790_v59 }
  0x63   : > { %1585 = vmatprep.mubr.msk.bf16.mxu1 %vm763_vm0, %v1794_v60 }
  0x67   : > { %913 = vmatmul.mubr.bf16.gmra.mrb[32].mxu0 %v1793_v61 }
  0x68   : > { %920 = vmatprep.mubr.bf16.mxu0 %v1797_v62 }
  0x6a   : > { %1074 = vmatmul.mubr.bf16.gmra.mrb[32].mxu1 %v1796_v63 }
  0x6b   : > { %1586 = vmatprep.mubr.msk.bf16.mxu1 %vm763_vm0, %v1800_v0 }
  0x6f   : > { %921 = vmatmul.mubr.bf16.gmra.mrb[36].mxu0 %v1799_v1 }
  0x70   : > { %928 = vmatprep.mubr.bf16.mxu0 %v1803_v2 }
  0x72   : > { %1082 = vmatmul.mubr.bf16.gmra.mrb[36].mxu1 %v1802_v3 }
  0x73   : > { %1587 = vmatprep.mubr.msk.bf16.mxu1 %vm763_vm0, %v1806_v4 }
  0x77   : > { %929 = vmatmul.mubr.bf16.gmra.mrb[40].mxu0 %v1805_v5 }
  0x78   : > { %936 = vmatprep.mubr.bf16.mxu0 %v1809_v6 }
  0x7a   : > { %1090 = vmatmul.mubr.bf16.gmra.mrb[40].mxu1 %v1808_v7 }
  0x7b   : > { %1588 = vmatprep.mubr.msk.bf16.mxu1 %vm763_vm0, %v1812_v8 }
  0x7f   : > { %937 = vmatmul.mubr.bf16.gmra.mrb[44].mxu0 %v1811_v9 }
  0x80   : > { %944 = vmatprep.mubr.bf16.mxu0 %v1815_v10 }
  0x82   : > { %1098 = vmatmul.mubr.bf16.gmra.mrb[44].mxu1 %v1814_v11 }
  0x83   : > { %1589 = vmatprep.mubr.msk.bf16.mxu1 %vm763_vm0, %v1818_v12 }
  0x87   : > { %945 = vmatmul.mubr.bf16.gmra.mrb[48].mxu0 %v1817_v13 }
  0x88   : > { %952 = vmatprep.mubr.bf16.mxu0 %v1821_v14 }
  0x8a   : > { %1106 = vmatmul.mubr.bf16.gmra.mrb[48].mxu1 %v1820_v15 }
  0x8b   : > { %1590 = vmatprep.mubr.msk.bf16.mxu1 %vm763_vm0, %v1824_v16 }
  0x8f   : > { %953 = vmatmul.mubr.bf16.gmra.mrb[52].mxu0 %v1823_v17 }
  0x90   : > { %960 = vmatprep.mubr.bf16.mxu0 %v1827_v18 }
  0x92   : > { %1114 = vmatmul.mubr.bf16.gmra.mrb[52].mxu1 %v1826_v19 }
  0x93   : > { %1591 = vmatprep.mubr.msk.bf16.mxu1 %vm763_vm0, %v1830_v20 }
  0x97   : > { %961 = vmatmul.mubr.bf16.gmra.mrb[56].mxu0 %v1829_v21 }
  0x98   : > { %968 = vmatprep.mubr.bf16.mxu0 %v1833_v22 }
  0x9a   : > { %1122 = vmatmul.mubr.bf16.gmra.mrb[56].mxu1 %v1832_v23 }
  0x9b   : > { %1592 = vmatprep.mubr.msk.bf16.mxu1 %vm763_vm0, %v1836_v24 }
  0x9f   : > { %969 = vmatmul.mubr.bf16.gmra.mrb[60].mxu0 %v1835_v25 }
  0xa2   : > { %1130 = vmatmul.mubr.bf16.gmra.mrb[60].mxu1 %v1838_v26 }
  0xfa   : > { %v1613_v27 = vpop.f32.mrb[0].mxu0 }
  0xfb   : > { %v1614_v28 = vpop.f32.mrb[1].mxu0 }
  0xfc   : > { %v1615_v29 = vadd.f32 %v1614_v28, %v1613_v27  ;;  %v1616_v30 = vpop.f32.mrb[2].mxu0 }
  0xfd   : > { %v1617_v31 = vpop.f32.mrb[3].mxu0  ;;  %v1011_v32 = vpop.f32.mrb[0].mxu1 }
  0xfe   : > { %v1618_v33 = vadd.f32 %v1617_v31, %v1616_v30  ;;  %v2059_v34 = vadd.f32 %v1615_v29, %v1011_v32  ;;  %v1013_v35 = vpop.f32.mrb[1].mxu1 }
  0xff   : > { %v1014_v36 = vpop.f32.mrb[2].mxu1 }
 0x100   : > { %v2061_v37 = vadd.f32 %v1618_v33, %v1014_v36  ;;  %v1016_v38 = vpop.f32.mrb[3].mxu1 }
 0x102   : > { %v1619_v39 = vpop.f32.mrb[4].mxu0  ;;  %v1140_v23 = vadd.f32 %v2061_v37, %v2059_v34 }
 0x103   : > { %v1620_v40 = vpop.f32.mrb[5].mxu0 }
 0x104   : > { %v1621_v41 = vadd.f32 %v1620_v40, %v1619_v39  ;;  %v1622_v42 = vpop.f32.mrb[6].mxu0 }
 0x105   : > { %v1623_v43 = vpop.f32.mrb[7].mxu0  ;;  %v1019_v44 = vpop.f32.mrb[4].mxu1 }
 0x106   : > { %v1624_v45 = vadd.f32 %v1623_v43, %v1622_v42  ;;  %v2063_v46 = vadd.f32 %v1621_v41, %v1019_v44  ;;  %v1021_v47 = vpop.f32.mrb[5].mxu1 }
 0x107   : > { %v1022_v48 = vpop.f32.mrb[6].mxu1 }
 0x108   : > { %v2065_v49 = vadd.f32 %v1624_v45, %v1022_v48  ;;  %v1024_v50 = vpop.f32.mrb[7].mxu1  ;;  %v1141_v26 = vadd.f32 %v1140_v23, %v2063_v46 }
 0x10a   : > { %v1625_v51 = vpop.f32.mrb[8].mxu0  ;;  %v1142_v36 = vadd.f32 %v1141_v26, %v2065_v49 }
 0x10b   : > { %v1626_v52 = vpop.f32.mrb[9].mxu0 }
 0x10c   : > { %v1627_v53 = vadd.f32 %v1626_v52, %v1625_v51  ;;  %v1628_v54 = vpop.f32.mrb[10].mxu0 }
 0x10d   : > { %v1629_v55 = vpop.f32.mrb[11].mxu0  ;;  %v1027_v56 = vpop.f32.mrb[8].mxu1 }
 0x10e   : > { %v1630_v57 = vadd.f32 %v1629_v55, %v1628_v54  ;;  %v2067_v58 = vadd.f32 %v1627_v53, %v1027_v56  ;;  %v1029_v59 = vpop.f32.mrb[9].mxu1 }
 0x10f   : > { %v1030_v60 = vpop.f32.mrb[10].mxu1 }
 0x110   : > { %v2069_v61 = vadd.f32 %v1630_v57, %v1030_v60  ;;  %v1032_v62 = vpop.f32.mrb[11].mxu1  ;;  %v1143_v40 = vadd.f32 %v1142_v36, %v2067_v58 }
 0x112   : > { %v1631_v63 = vpop.f32.mrb[12].mxu0  ;;  %v1144_v48 = vadd.f32 %v1143_v40, %v2069_v61 }
 0x113   : > { %v1632_v0 = vpop.f32.mrb[13].mxu0 }
 0x114   : > { %v1633_v1 = vadd.f32 %v1632_v0, %v1631_v63  ;;  %v1634_v2 = vpop.f32.mrb[14].mxu0 }
 0x115   : > { %v1635_v3 = vpop.f32.mrb[15].mxu0  ;;  %v1035_v4 = vpop.f32.mrb[12].mxu1 }
 0x116   : > { %v1636_v5 = vadd.f32 %v1635_v3, %v1634_v2  ;;  %v2071_v6 = vadd.f32 %v1633_v1, %v1035_v4  ;;  %v1037_v7 = vpop.f32.mrb[13].mxu1 }
 0x117   : > { %v1038_v8 = vpop.f32.mrb[14].mxu1 }
 0x118   : > { %v2073_v9 = vadd.f32 %v1636_v5, %v1038_v8  ;;  %v1040_v10 = vpop.f32.mrb[15].mxu1  ;;  %v1145_v54 = vadd.f32 %v1144_v48, %v2071_v6 }
 0x11a   : > { %v1637_v11 = vpop.f32.mrb[16].mxu0  ;;  %v1146_v60 = vadd.f32 %v1145_v54, %v2073_v9 }
 0x11b   : > { %v1638_v12 = vpop.f32.mrb[17].mxu0 }
 0x11c   : > { %v1639_v13 = vadd.f32 %v1638_v12, %v1637_v11  ;;  %v1640_v14 = vpop.f32.mrb[18].mxu0 }
 0x11d   : > { %v1641_v15 = vpop.f32.mrb[19].mxu0  ;;  %v1043_v16 = vpop.f32.mrb[16].mxu1 }
 0x11e   : > { %v1642_v17 = vadd.f32 %v1641_v15, %v1640_v14  ;;  %v2075_v18 = vadd.f32 %v1639_v13, %v1043_v16  ;;  %v1045_v19 = vpop.f32.mrb[17].mxu1 }
 0x11f   : > { %v1046_v20 = vpop.f32.mrb[18].mxu1 }
 0x120   : > { %v2077_v21 = vadd.f32 %v1642_v17, %v1046_v20  ;;  %v1048_v22 = vpop.f32.mrb[19].mxu1  ;;  %v1147_v2 = vadd.f32 %v1146_v60, %v2075_v18 }
 0x122   : > { %v1643_v24 = vpop.f32.mrb[20].mxu0  ;;  %v1148_v11 = vadd.f32 %v1147_v2, %v2077_v21 }
 0x123   : > { %v1644_v25 = vpop.f32.mrb[21].mxu0 }
 0x124   : > { %v1645_v27 = vadd.f32 %v1644_v25, %v1643_v24  ;;  %v1646_v28 = vpop.f32.mrb[22].mxu0 }
 0x125   : > { %v1647_v29 = vpop.f32.mrb[23].mxu0  ;;  %v1051_v30 = vpop.f32.mrb[20].mxu1 }
 0x126   : > { %v1648_v31 = vadd.f32 %v1647_v29, %v1646_v28  ;;  %v2082_v32 = vadd.f32 %v1645_v27, %v1051_v30  ;;  %v1053_v33 = vpop.f32.mrb[21].mxu1 }
 0x127   : > { %v1054_v35 = vpop.f32.mrb[22].mxu1 }
 0x128   : > { %v2085_v38 = vadd.f32 %v1648_v31, %v1054_v35  ;;  %v1056_v39 = vpop.f32.mrb[23].mxu1  ;;  %v1149_v14 = vadd.f32 %v1148_v11, %v2082_v32 }
 0x12a   : > { %v1649_v41 = vpop.f32.mrb[24].mxu0  ;;  %v1150_v25 = vadd.f32 %v1149_v14, %v2085_v38 }
 0x12b   : > { %v1650_v42 = vpop.f32.mrb[25].mxu0 }
 0x12c   : > { %v1651_v43 = vadd.f32 %v1650_v42, %v1649_v41  ;;  %v1652_v44 = vpop.f32.mrb[26].mxu0 }
 0x12d   : > { %v1653_v45 = vpop.f32.mrb[27].mxu0  ;;  %v1059_v47 = vpop.f32.mrb[24].mxu1 }
 0x12e   : > { %v1654_v50 = vadd.f32 %v1653_v45, %v1652_v44  ;;  %v2089_v51 = vadd.f32 %v1651_v43, %v1059_v47  ;;  %v1061_v52 = vpop.f32.mrb[25].mxu1 }
 0x12f   : > { %v1062_v53 = vpop.f32.mrb[26].mxu1 }
 0x130   : > { %v2092_v55 = vadd.f32 %v1654_v50, %v1062_v53  ;;  %v1064_v56 = vpop.f32.mrb[27].mxu1  ;;  %v1151_v28 = vadd.f32 %v1150_v25, %v2089_v51 }
 0x132   : > { %v1655_v57 = vpop.f32.mrb[28].mxu0  ;;  %v1152_v39 = vadd.f32 %v1151_v28, %v2092_v55 }
 0x133   : > { %v1656_v59 = vpop.f32.mrb[29].mxu0 }
 0x134   : > { %v1657_v62 = vadd.f32 %v1656_v59, %v1655_v57  ;;  %v1658_v63 = vpop.f32.mrb[30].mxu0 }
 0x135   : > { %v1659_v0 = vpop.f32.mrb[31].mxu0  ;;  %v1067_v1 = vpop.f32.mrb[28].mxu1 }
 0x136   : > { %v1660_v3 = vadd.f32 %v1659_v0, %v1658_v63  ;;  %v2096_v4 = vadd.f32 %v1657_v62, %v1067_v1  ;;  %v1069_v5 = vpop.f32.mrb[29].mxu1 }
 0x137   : > { %v1070_v7 = vpop.f32.mrb[30].mxu1 }
 0x138   : > { %v2098_v8 = vadd.f32 %v1660_v3, %v1070_v7  ;;  %v1072_v10 = vpop.f32.mrb[31].mxu1  ;;  %v1153_v44 = vadd.f32 %v1152_v39, %v2096_v4 }
 0x13a   : > { %v1661_v12 = vpop.f32.mrb[32].mxu0  ;;  %v1154_v52 = vadd.f32 %v1153_v44, %v2098_v8 }
 0x13b   : > { %v1662_v13 = vpop.f32.mrb[33].mxu0 }
 0x13c   : > { %v1663_v15 = vadd.f32 %v1662_v13, %v1661_v12  ;;  %v1664_v16 = vpop.f32.mrb[34].mxu0 }
 0x13d   : > { %v1665_v17 = vpop.f32.mrb[35].mxu0  ;;  %v1075_v19 = vpop.f32.mrb[32].mxu1 }
 0x13e   : > { %v1666_v20 = vadd.f32 %v1665_v17, %v1664_v16  ;;  %v2102_v22 = vadd.f32 %v1663_v15, %v1075_v19  ;;  %v1077_v23 = vpop.f32.mrb[33].mxu1 }
 0x13f   : > { %v1078_v24 = vpop.f32.mrb[34].mxu1 }
 0x140   : > { %v2105_v26 = vadd.f32 %v1666_v20, %v1078_v24  ;;  %v1080_v27 = vpop.f32.mrb[35].mxu1  ;;  %v1155_v59 = vadd.f32 %v1154_v52, %v2102_v22 }
 0x142   : > { %v1667_v29 = vpop.f32.mrb[36].mxu0  ;;  %v1156_v3 = vadd.f32 %v1155_v59, %v2105_v26 }
 0x143   : > { %v1668_v30 = vpop.f32.mrb[37].mxu0 }
 0x144   : > { %v1669_v31 = vadd.f32 %v1668_v30, %v1667_v29  ;;  %v1670_v33 = vpop.f32.mrb[38].mxu0 }
 0x145   : > { %v1671_v35 = vpop.f32.mrb[39].mxu0  ;;  %v1083_v36 = vpop.f32.mrb[36].mxu1 }
 0x146   : > { %v1672_v40 = vadd.f32 %v1671_v35, %v1670_v33  ;;  %v2109_v41 = vadd.f32 %v1669_v31, %v1083_v36  ;;  %v1085_v42 = vpop.f32.mrb[37].mxu1 }
 0x147   : > { %v1086_v43 = vpop.f32.mrb[38].mxu1 }
 0x148   : > { %v2112_v45 = vadd.f32 %v1672_v40, %v1086_v43  ;;  %v1088_v47 = vpop.f32.mrb[39].mxu1  ;;  %v1157_v10 = vadd.f32 %v1156_v3, %v2109_v41 }
 0x14a   : > { %v1673_v48 = vpop.f32.mrb[40].mxu0  ;;  %v1158_v20 = vadd.f32 %v1157_v10, %v2112_v45 }
 0x14b   : > { %v1674_v50 = vpop.f32.mrb[41].mxu0 }
 0x14c   : > { %v1675_v53 = vadd.f32 %v1674_v50, %v1673_v48  ;;  %v1676_v54 = vpop.f32.mrb[42].mxu0 }
 0x14d   : > { %v1677_v56 = vpop.f32.mrb[43].mxu0  ;;  %v1091_v57 = vpop.f32.mrb[40].mxu1 }
 0x14e   : > { %v1678_v60 = vadd.f32 %v1677_v56, %v1676_v54  ;;  %v2116_v62 = vadd.f32 %v1675_v53, %v1091_v57  ;;  %v1093_v63 = vpop.f32.mrb[41].mxu1 }
 0x14f   : > { %v1094_v0 = vpop.f32.mrb[42].mxu1 }
 0x150   : > { %v2118_v1 = vadd.f32 %v1678_v60, %v1094_v0  ;;  %v1096_v2 = vpop.f32.mrb[43].mxu1  ;;  %v1159_v25 = vadd.f32 %v1158_v20, %v2116_v62 }
 0x152   : > { %v1679_v5 = vpop.f32.mrb[44].mxu0  ;;  %v1160_v35 = vadd.f32 %v1159_v25, %v2118_v1 }
 0x153   : > { %v1680_v7 = vpop.f32.mrb[45].mxu0 }
 0x154   : > { %v1681_v11 = vadd.f32 %v1680_v7, %v1679_v5  ;;  %v1682_v12 = vpop.f32.mrb[46].mxu0 }
 0x155   : > { %v1683_v13 = vpop.f32.mrb[47].mxu0  ;;  %v1099_v14 = vpop.f32.mrb[44].mxu1 }
 0x156   : > { %v1684_v15 = vadd.f32 %v1683_v13, %v1682_v12  ;;  %v2122_v16 = vadd.f32 %v1681_v11, %v1099_v14  ;;  %v1101_v17 = vpop.f32.mrb[45].mxu1 }
 0x157   : > { %v1102_v19 = vpop.f32.mrb[46].mxu1 }
 0x158   : > { %v2125_v23 = vadd.f32 %v1684_v15, %v1102_v19  ;;  %v1104_v24 = vpop.f32.mrb[47].mxu1  ;;  %v1161_v43 = vadd.f32 %v1160_v35, %v2122_v16 }
 0x15a   : > { %v1685_v27 = vpop.f32.mrb[48].mxu0  ;;  %v1162_v52 = vadd.f32 %v1161_v43, %v2125_v23 }
 0x15b   : > { %v1686_v28 = vpop.f32.mrb[49].mxu0 }
 0x15c   : > { %v1687_v29 = vadd.f32 %v1686_v28, %v1685_v27  ;;  %v1688_v30 = vpop.f32.mrb[50].mxu0 }
 0x15d   : > { %v1689_v31 = vpop.f32.mrb[51].mxu0  ;;  %v1107_v33 = vpop.f32.mrb[48].mxu1 }
 0x15e   : > { %v1690_v36 = vadd.f32 %v1689_v31, %v1688_v30  ;;  %v2129_v39 = vadd.f32 %v1687_v29, %v1107_v33  ;;  %v1109_v40 = vpop.f32.mrb[49].mxu1 }
 0x15f   : > { %v1110_v42 = vpop.f32.mrb[50].mxu1 }
 0x160   : > { %v2132_v44 = vadd.f32 %v1690_v36, %v1110_v42  ;;  %v1112_v47 = vpop.f32.mrb[51].mxu1  ;;  %v1163_v59 = vadd.f32 %v1162_v52, %v2129_v39 }
 0x162   : > { %v1691_v48 = vpop.f32.mrb[52].mxu0  ;;  %v1164_v7 = vadd.f32 %v1163_v59, %v2132_v44 }
 0x163   : > { %v1692_v50 = vpop.f32.mrb[53].mxu0 }
 0x164   : > { %v1693_v53 = vadd.f32 %v1692_v50, %v1691_v48  ;;  %v1694_v54 = vpop.f32.mrb[54].mxu0 }
 0x165   : > { %v1695_v56 = vpop.f32.mrb[55].mxu0  ;;  %v1115_v57 = vpop.f32.mrb[52].mxu1 }
 0x166   : > { %v1696_v60 = vadd.f32 %v1695_v56, %v1694_v54  ;;  %v2136_v63 = vadd.f32 %v1693_v53, %v1115_v57  ;;  %v1117_v0 = vpop.f32.mrb[53].mxu1 }
 0x167   : > { %v1118_v2 = vpop.f32.mrb[54].mxu1 }
 0x168   : > { %v2138_v3 = vadd.f32 %v1696_v60, %v1118_v2  ;;  %v1120_v5 = vpop.f32.mrb[55].mxu1  ;;  %v1165_v12 = vadd.f32 %v1164_v7, %v2136_v63 }
 0x16a   : > { %v1697_v10 = vpop.f32.mrb[56].mxu0  ;;  %v1166_v27 = vadd.f32 %v1165_v12, %v2138_v3 }
 0x16b   : > { %v1698_v11 = vpop.f32.mrb[57].mxu0 }
 0x16c   : > { %v1699_v13 = vadd.f32 %v1698_v11, %v1697_v10  ;;  %v1700_v14 = vpop.f32.mrb[58].mxu0 }
 0x16d   : > { %v1701_v15 = vpop.f32.mrb[59].mxu0  ;;  %v1123_v17 = vpop.f32.mrb[56].mxu1 }
 0x16e   : > { %v1702_v19 = vadd.f32 %v1701_v15, %v1700_v14  ;;  %v2142_v20 = vadd.f32 %v1699_v13, %v1123_v17  ;;  %v1125_v24 = vpop.f32.mrb[57].mxu1 }
 0x16f   : > { %v1126_v25 = vpop.f32.mrb[58].mxu1 }
 0x170   : > { %v2145_v28 = vadd.f32 %v1702_v19, %v1126_v25  ;;  %v1128_v29 = vpop.f32.mrb[59].mxu1  ;;  %v1167_v30 = vadd.f32 %v1166_v27, %v2142_v20 }
 0x172   : > { %v1703_v31 = vpop.f32.mrb[60].mxu0  ;;  %v1168_v43 = vadd.f32 %v1167_v30, %v2145_v28 }
 0x173   : > { %v1704_v33 = vpop.f32.mrb[61].mxu0 }
 0x174   : > { %v1705_v35 = vadd.f32 %v1704_v33, %v1703_v31  ;;  %v1706_v36 = vpop.f32.mrb[62].mxu0 }
 0x175   : > { %v1707_v40 = vpop.f32.mrb[63].mxu0  ;;  %v1131_v42 = vpop.f32.mrb[60].mxu1 }
 0x176   : > { %v1708_v47 = vadd.f32 %v1707_v40, %v1706_v36  ;;  %v2149_v48 = vadd.f32 %v1705_v35, %v1131_v42  ;;  %v1133_v50 = vpop.f32.mrb[61].mxu1 }
 0x177   : > { %v1134_v52 = vpop.f32.mrb[62].mxu1 }
 0x178   : > { %v1169_v53 = vadd.f32 %v1168_v43, %v2149_v48  ;;  %v2152_v54 = vadd.f32 %v1708_v47, %v1134_v52  ;;  %v1136_v56 = vpop.f32.mrb[63].mxu1 }
 0x17a   : > { %v1170_v57 = vadd.f32 %v1169_v53, %v2152_v54 }
 0x17c   : > { %v1171_v59 = vrot.slane %v1170_v57, 4 }
 0x17e   : > { %v1172_v60 = vadd.f32 %v1171_v59, %v1170_v57 }
 0x180   : > { %v1173_v0 = vrot.slane %v1172_v60, 2 }
 0x182   : > { %v1174_v2 = vadd.f32 %v1173_v0, %v1172_v60 }
 0x184   : > { %v1175_v5 = vrot.slane %v1174_v2, 1 }
 0x186   : > { %v1176_v7 = vadd.f32 %v1175_v5, %v1174_v2 }
 0x188   : > { %v2155_v10 = vmul.f32 0.00390625, %v1176_v7 }
 0x18a   : > { %v1179_v11 = vsub.f32 %v2059_v34, %v2155_v10  ;;  %v1180_v12 = vsub.f32 %v2061_v37, %v2155_v10  ;;  %v1181_v13 = vsub.f32 %v2063_v46, %v2155_v10  ;;  %v1182_v17 = vsub.f32 %v2065_v49, %v2155_v10 }
 0x18b   : > { %v1183_v19 = vsub.f32 %v2067_v58, %v2155_v10  ;;  %v1184_v27 = vsub.f32 %v2069_v61, %v2155_v10  ;;  %v1185_v31 = vsub.f32 %v2071_v6, %v2155_v10  ;;  %v1186_v36 = vsub.f32 %v2073_v9, %v2155_v10 }
 0x18c   : > { %v1211_v14 = vmul.f32 %v1179_v11, %v1179_v11  ;;  %v1212_v15 = vmul.f32 %v1180_v12, %v1180_v12  ;;  %v1213_v24 = vmul.f32 %v1181_v13, %v1181_v13  ;;  %v1214_v29 = vmul.f32 %v1182_v17, %v1182_v17 }
 0x18d   : > { %v1215_v33 = vmul.f32 %v1183_v19, %v1183_v19  ;;  %v1216_v40 = vmul.f32 %v1184_v27, %v1184_v27  ;;  %v1187_v43 = vsub.f32 %v2075_v18, %v2155_v10  ;;  %v1217_v47 = vmul.f32 %v1185_v31, %v1185_v31 }
 0x18e   : > { %v1243_v25 = vadd.f32 %v1212_v15, %v1211_v14  ;;  %v1188_v52 = vsub.f32 %v2077_v21, %v2155_v10  ;;  %v1218_v53 = vmul.f32 %v1186_v36, %v1186_v36  ;;  %v1189_v57 = vsub.f32 %v2082_v32, %v2155_v10 }
 0x18f   : > { %v1219_v59 = vmul.f32 %v1187_v43, %v1187_v43  ;;  %v1190_v0 = vsub.f32 %v2085_v38, %v2155_v10  ;;  %v1191_v7 = vsub.f32 %v2089_v51, %v2155_v10  ;;  %v1192_v13 = vsub.f32 %v2092_v55, %v2155_v10 }
 0x190   : > { %v1244_v30 = vadd.f32 %v1243_v25, %v1213_v24  ;;  %v1220_v2 = vmul.f32 %v1188_v52, %v1188_v52  ;;  %v1221_v11 = vmul.f32 %v1189_v57, %v1189_v57  ;;  %v1193_v17 = vsub.f32 %v2096_v4, %v2155_v10 }
 0x191   : > { %v1222_v14 = vmul.f32 %v1190_v0, %v1190_v0  ;;  %v1223_v19 = vmul.f32 %v1191_v7, %v1191_v7  ;;  %v1194_v25 = vsub.f32 %v2098_v8, %v2155_v10  ;;  %v1224_v27 = vmul.f32 %v1192_v13, %v1192_v13 }
 0x192   : > { %v1245_v35 = vadd.f32 %v1244_v30, %v1214_v29  ;;  %v1195_v30 = vsub.f32 %v2102_v22, %v2155_v10  ;;  %v1225_v31 = vmul.f32 %v1193_v17, %v1193_v17 }
 0x193   : > { %v1226_v36 = vmul.f32 %v1194_v25, %v1194_v25 }
 0x194   : > { %v1246_v42 = vadd.f32 %v1245_v35, %v1215_v33  ;;  %v1196_v35 = vsub.f32 %v2105_v26, %v2155_v10  ;;  %v1227_v43 = vmul.f32 %v1195_v30, %v1195_v30 }
 0x196   : > { %v1247_v50 = vadd.f32 %v1246_v42, %v1216_v40  ;;  %v1197_v42 = vsub.f32 %v2109_v41, %v2155_v10  ;;  %v1228_v52 = vmul.f32 %v1196_v35, %v1196_v35 }
 0x198   : > { %v1248_v56 = vadd.f32 %v1247_v50, %v1217_v47  ;;  %v1198_v50 = vsub.f32 %v2112_v45, %v2155_v10  ;;  %v1229_v57 = vmul.f32 %v1197_v42, %v1197_v42 }
 0x19a   : > { %v1249_v60 = vadd.f32 %v1248_v56, %v1218_v53  ;;  %v1199_v56 = vsub.f32 %v2116_v62, %v2155_v10  ;;  %v1230_v0 = vmul.f32 %v1198_v50, %v1198_v50 }
 0x19c   : > { %v1250_v5 = vadd.f32 %v1249_v60, %v1219_v59  ;;  %v1200_v60 = vsub.f32 %v2118_v1, %v2155_v10  ;;  %v1231_v7 = vmul.f32 %v1199_v56, %v1199_v56 }
 0x19e   : > { %v1251_v12 = vadd.f32 %v1250_v5, %v1220_v2  ;;  %v1201_v5 = vsub.f32 %v2122_v16, %v2155_v10  ;;  %v1232_v13 = vmul.f32 %v1200_v60, %v1200_v60 }
 0x1a0   : > { %v1252_v15 = vadd.f32 %v1251_v12, %v1221_v11  ;;  %v1202_v12 = vsub.f32 %v2125_v23, %v2155_v10  ;;  %v1233_v17 = vmul.f32 %v1201_v5, %v1201_v5 }
 0x1a2   : > { %v1253_v24 = vadd.f32 %v1252_v15, %v1222_v14  ;;  %v1203_v15 = vsub.f32 %v2129_v39, %v2155_v10  ;;  %v1234_v25 = vmul.f32 %v1202_v12, %v1202_v12 }
 0x1a4   : > { %v1254_v29 = vadd.f32 %v1253_v24, %v1223_v19  ;;  %v1204_v24 = vsub.f32 %v2132_v44, %v2155_v10  ;;  %v1235_v30 = vmul.f32 %v1203_v15, %v1203_v15 }
 0x1a6   : > { %v1255_v33 = vadd.f32 %v1254_v29, %v1224_v27  ;;  %v1205_v29 = vsub.f32 %v2136_v63, %v2155_v10  ;;  %v1236_v35 = vmul.f32 %v1204_v24, %v1204_v24 }
 0x1a8   : > { %v1256_v40 = vadd.f32 %v1255_v33, %v1225_v31  ;;  %v1206_v33 = vsub.f32 %v2138_v3, %v2155_v10  ;;  %v1237_v42 = vmul.f32 %v1205_v29, %v1205_v29  ;;  %v1286_v29 = vlaneseq }
 0x1aa   : > { %v1257_v47 = vadd.f32 %v1256_v40, %v1226_v36  ;;  %v1207_v40 = vsub.f32 %v2142_v20, %v2155_v10  ;;  %v1238_v50 = vmul.f32 %v1206_v33, %v1206_v33 }
 0x1ac   : > { %v1258_v53 = vadd.f32 %v1257_v47, %v1227_v43  ;;  %v1208_v47 = vsub.f32 %v2145_v28, %v2155_v10  ;;  %v1239_v56 = vmul.f32 %v1207_v40, %v1207_v40  ;;  %v1139_v40 = vld [vmem:[%s2340_s3] sm:$0x1] }
 0x1ae   : > { %v1259_v59 = vadd.f32 %v1258_v53, %v1228_v52  ;;  %v1209_v53 = vsub.f32 %v2149_v48, %v2155_v10  ;;  %v1240_v60 = vmul.f32 %v1208_v47, %v1208_v47 }
 0x1b0   : > { %v1260_v2 = vadd.f32 %v1259_v59, %v1229_v57  ;;  %v1210_v59 = vsub.f32 %v2152_v54, %v2155_v10 }
 0x1b2   : > { %v1261_v11 = vadd.f32 %v1260_v2, %v1230_v0  ;;  %v1241_v2 = vmul.f32 %v1209_v53, %v1209_v53 }
 0x1b4   : > { %v1262_v14 = vadd.f32 %v1261_v11, %v1231_v7  ;;  %v1242_v7 = vmul.f32 %v1210_v59, %v1210_v59 }
 0x1b6   : > { %v1263_v19 = vadd.f32 %v1262_v14, %v1232_v13 }
 0x1b8   : > { %v1264_v27 = vadd.f32 %v1263_v19, %v1233_v17 }
 0x1ba   : > { %v1265_v31 = vadd.f32 %v1264_v27, %v1234_v25 }
 0x1bc   : > { %v1266_v36 = vadd.f32 %v1265_v31, %v1235_v30  ;;  %v1287_v30 = vshrl.u32 %v1286_v29, 7  ;;  %v1138_v31 = vld [vmem:[%s2339_s2] sm:$0x1] }
 0x1be   : > { %v1267_v43 = vadd.f32 %v1266_v36, %v1236_v35  ;;  %v1288_v33 = vsub.s32 0, %v1287_v30 }
 0x1c0   : > { %v1268_v52 = vadd.f32 %v1267_v43, %v1237_v42 }
 0x1c2   : > { %v1269_v57 = vadd.f32 %v1268_v52, %v1238_v50 }
 0x1c4   : > { %v1270_v0 = vadd.f32 %v1269_v57, %v1239_v56 }
 0x1c6   : > { %v1271_v5 = vadd.f32 %v1270_v0, %v1240_v60 }
 0x1c8   : > { %v1272_v11 = vadd.f32 %v1271_v5, %v1241_v2 }
 0x1ca   : > { %v1273_v12 = vadd.f32 %v1272_v11, %v1242_v7 }
 0x1cc   : > { %v1274_v13 = vrot.slane %v1273_v12, 4 }
 0x1ce   : > { %v1275_v14 = vadd.f32 %v1274_v13, %v1273_v12 }
 0x1d0   : > { %v1276_v15 = vrot.slane %v1275_v14, 2 }
 0x1d2   : > { %v1277_v17 = vadd.f32 %v1276_v15, %v1275_v14 }
 0x1d4   : > { %v1278_v19 = vrot.slane %v1277_v17, 1 }
 0x1d6   : > { %v1279_v24 = vadd.f32 %v1278_v19, %v1277_v17 }
 0x1d8   : > { %v1280_v25 = vmul.f32 0.00390625, %v1279_v24 }
 0x1da   : > { %v1281_v27 = vadd.f32 1e-05, %v1280_v25 }
 0x1dc   : > { %1839 = vrsqrt.f32 %v1281_v27 }
 0x1e6   : > { %v1840_v35 = vpop.eup %1839 }
 0x1e7   : > { %v1283_v36 = vmul.f32 %v1840_v35, %v1138_v31 }
 0x1e9   : > { %v1284_v42 = vmul.f32 %v1283_v36, %v2155_v10  ;;  %v1289_v43 = vrot.slane %v1283_v36, %v1288_v33 }
 0x1eb   : > { %v1285_v47 = vsub.f32 %v1139_v40, %v1284_v42  ;;  %v1290_v50 = vmul.f32 %v1289_v43, %v2059_v34  ;;  %v1291_v52 = vmul.f32 %v1289_v43, %v2061_v37  ;;  %v1292_v53 = vmul.f32 %v1289_v43, %v2063_v46 }
 0x1ec   : > { %v1293_v56 = vmul.f32 %v1289_v43, %v2065_v49  ;;  %v1294_v57 = vmul.f32 %v1289_v43, %v2067_v58  ;;  %v1295_v59 = vmul.f32 %v1289_v43, %v2069_v61  ;;  %v1296_v60 = vmul.f32 %v1289_v43, %v2071_v6 }
 0x1ed   : > { %v1297_v0 = vmul.f32 %v1289_v43, %v2073_v9  ;;  %v1298_v10 = vmul.f32 %v1289_v43, %v2075_v18  ;;  %v1299_v2 = vmul.f32 %v1289_v43, %v2077_v21  ;;  %v1300_v34 = vmul.f32 %v1289_v43, %v2082_v32 }
 0x1ee   : > { %v1301_v37 = vmul.f32 %v1289_v43, %v2085_v38  ;;  %v1302_v46 = vmul.f32 %v1289_v43, %v2089_v51  ;;  %v1303_v49 = vmul.f32 %v1289_v43, %v2092_v55  ;;  %v1304_v58 = vmul.f32 %v1289_v43, %v2096_v4 }
 0x1ef   : > { %v1305_v61 = vmul.f32 %v1289_v43, %v2098_v8  ;;  %v1306_v6 = vmul.f32 %v1289_v43, %v2102_v22  ;;  %v1307_v9 = vmul.f32 %v1289_v43, %v2105_v26  ;;  %v1308_v18 = vmul.f32 %v1289_v43, %v2109_v41 }
 0x1f0   : > { %v1309_v21 = vmul.f32 %v1289_v43, %v2112_v45  ;;  %v1310_v32 = vmul.f32 %v1289_v43, %v2116_v62  ;;  %v1311_v38 = vmul.f32 %v1289_v43, %v2118_v1  ;;  %v1312_v51 = vmul.f32 %v1289_v43, %v2122_v16 }
 0x1f1   : > { %v1313_v55 = vmul.f32 %v1289_v43, %v2125_v23  ;;  %v1314_v4 = vmul.f32 %v1289_v43, %v2129_v39  ;;  %v1315_v8 = vmul.f32 %v1289_v43, %v2132_v44  ;;  %v1316_v22 = vmul.f32 %v1289_v43, %v2136_v63 }
 0x1f2   : > { %v1317_v26 = vmul.f32 %v1289_v43, %v2138_v3  ;;  %v1326_v5 = vrot.slane %v1285_v47, %v1288_v33  ;;  %v1318_v41 = vmul.f32 %v1289_v43, %v2142_v20  ;;  %v1319_v45 = vmul.f32 %v1289_v43, %v2145_v28 }
 0x1f3   : > { %v1320_v62 = vmul.f32 %v1289_v43, %v2149_v48  ;;  %v1321_v1 = vmul.f32 %v1289_v43, %v2152_v54 }
 0x1f4   : > { %v1328_v16 = vadd.f32 %v1326_v5, %v1290_v50  ;;  %v1329_v23 = vadd.f32 %v1326_v5, %v1291_v52  ;;  %v1330_v7 = vadd.f32 %v1326_v5, %v1292_v53  ;;  %v1331_v39 = vadd.f32 %v1326_v5, %v1293_v56 }
 0x1f5   : > { %v1332_v11 = vadd.f32 %v1326_v5, %v1294_v57  ;;  %v1333_v44 = vadd.f32 %v1326_v5, %v1295_v59  ;;  %v1334_v12 = vadd.f32 %v1326_v5, %v1296_v60  ;;  %v1335_v63 = vadd.f32 %v1326_v5, %v1297_v0 }
 0x1f6   : > { %v1336_v13 = vadd.f32 %v1326_v5, %v1298_v10  ;;  %v1337_v3 = vadd.f32 %v1326_v5, %v1299_v2  ;;  %v1338_v14 = vadd.f32 %v1326_v5, %v1300_v34  ;;  %v1339_v15 = vadd.f32 %v1326_v5, %v1301_v37 }
 0x1f7   : > { %v1340_v20 = vadd.f32 %v1326_v5, %v1302_v46  ;;  %v1341_v17 = vadd.f32 %v1326_v5, %v1303_v49  ;;  %v1342_v28 = vadd.f32 %v1326_v5, %v1304_v58  ;;  %v1343_v19 = vadd.f32 %v1326_v5, %v1305_v61 }
 0x1f8   : > { %v1344_v48 = vadd.f32 %v1326_v5, %v1306_v6  ;;  %v1345_v54 = vadd.f32 %v1326_v5, %v1307_v9  ;;  %v1346_v24 = vadd.f32 %v1326_v5, %v1308_v18  ;;  %v1347_v25 = vadd.f32 %v1326_v5, %v1309_v21 }
 0x1f9   : > { %v2261_v27 = vadd.f32 %v1326_v5, %v1310_v32  ;;  %v2263_v29 = vadd.f32 %v1326_v5, %v1311_v38  ;;  %v2265_v30 = vadd.f32 %v1326_v5, %v1312_v51  ;;  %v2267_v31 = vadd.f32 %v1326_v5, %v1313_v55 }
 0x1fa   : > { %v2269_v33 = vadd.f32 %v1326_v5, %v1314_v4  ;;  %v2271_v35 = vadd.f32 %v1326_v5, %v1315_v8  ;;  %v2273_v36 = vadd.f32 %v1326_v5, %v1316_v22  ;;  %v2275_v40 = vadd.f32 %v1326_v5, %v1317_v26 }
 0x1fb   : > { %v2282_v42 = vadd.f32 %v1326_v5, %v1318_v41  ;;  %v2284_v43 = vadd.f32 %v1326_v5, %v1319_v45  ;;  %v2286_v47 = vadd.f32 %v1326_v5, %v1320_v62  ;;  %v2288_v50 = vadd.f32 %v1326_v5, %v1321_v1 }
 0x1fc   : > { %v1360_v52 = vmax.f32 %v1328_v16, 0.0  ;;  %v1361_v53 = vmax.f32 %v1329_v23, 0.0  ;;  %v1362_v56 = vmax.f32 %v1330_v7, 0.0  ;;  %v1363_v57 = vmax.f32 %v1331_v39, 0.0 }
 0x1fd   : > { %v1364_v59 = vmax.f32 %v1332_v11, 0.0  ;;  %v1365_v60 = vmax.f32 %v1333_v44, 0.0  ;;  %v1366_v0 = vmax.f32 %v1334_v12, 0.0  ;;  %v1367_v10 = vmax.f32 %v1335_v63, 0.0 }
 0x1fe   : > { %v1368_v2 = vmax.f32 %v1336_v13, 0.0  ;;  %v1369_v34 = vmax.f32 %v1337_v3, 0.0  ;;  %v1370_v37 = vmax.f32 %v1338_v14, 0.0  ;;  %v1371_v46 = vmax.f32 %v1339_v15, 0.0  ;;  %1392 = vst [vmem:[%s2280_s29] sm:$0xff] %v1360_v52  ;;  %1393 = vst [vmem:[%s2280_s29 + $0x8] sm:$0xff] %v1361_v53 }
 0x1ff   : > { %1394 = vst [vmem:[%s2280_s29 + $0x10] sm:$0xff] %v1362_v56  ;;  %1395 = vst [vmem:[%s2280_s29 + $0x18] sm:$0xff] %v1363_v57  ;;  %v1372_v49 = vmax.f32 %v1340_v20, 0.0  ;;  %v1373_v58 = vmax.f32 %v1341_v17, 0.0  ;;  %v1374_v61 = vmax.f32 %v1342_v28, 0.0  ;;  %v1375_v6 = vmax.f32 %v1343_v19, 0.0 }
 0x200   : > { %1396 = vst [vmem:[%s2280_s29 + $0x20] sm:$0xff] %v1364_v59  ;;  %1397 = vst [vmem:[%s2280_s29 + $0x28] sm:$0xff] %v1365_v60  ;;  %v1376_v9 = vmax.f32 %v1344_v48, 0.0  ;;  %v1377_v18 = vmax.f32 %v1345_v54, 0.0  ;;  %v1378_v21 = vmax.f32 %v1346_v24, 0.0  ;;  %v1379_v32 = vmax.f32 %v1347_v25, 0.0 }
 0x201   : > { %1398 = vst [vmem:[%s2280_s29 + $0x30] sm:$0xff] %v1366_v0  ;;  %1399 = vst [vmem:[%s2280_s29 + $0x38] sm:$0xff] %v1367_v10  ;;  %v1380_v38 = vmax.f32 %v2261_v27, 0.0  ;;  %v1381_v51 = vmax.f32 %v2263_v29, 0.0  ;;  %v1382_v55 = vmax.f32 %v2265_v30, 0.0  ;;  %v1383_v4 = vmax.f32 %v2267_v31, 0.0 }
 0x202   : > { %1400 = vst [vmem:[%s2280_s29 + $0x40] sm:$0xff] %v1368_v2  ;;  %1401 = vst [vmem:[%s2280_s29 + $0x48] sm:$0xff] %v1369_v34  ;;  %v1384_v8 = vmax.f32 %v2269_v33, 0.0  ;;  %v1385_v22 = vmax.f32 %v2271_v35, 0.0  ;;  %v1386_v26 = vmax.f32 %v2273_v36, 0.0  ;;  %v1387_v5 = vmax.f32 %v2275_v40, 0.0 }
 0x203   : > { %1402 = vst [vmem:[%s2280_s29 + $0x50] sm:$0xff] %v1370_v37  ;;  %1403 = vst [vmem:[%s2280_s29 + $0x58] sm:$0xff] %v1371_v46  ;;  %v1388_v41 = vmax.f32 %v2282_v42, 0.0  ;;  %v1389_v45 = vmax.f32 %v2284_v43, 0.0  ;;  %v1390_v62 = vmax.f32 %v2286_v47, 0.0  ;;  %v1391_v1 = vmax.f32 %v2288_v50, 0.0 }
 0x204   : > { %1404 = vst [vmem:[%s2280_s29 + $0x60] sm:$0xff] %v1372_v49  ;;  %1405 = vst [vmem:[%s2280_s29 + $0x68] sm:$0xff] %v1373_v58 }
 0x205   : > { %1406 = vst [vmem:[%s2280_s29 + $0x70] sm:$0xff] %v1374_v61  ;;  %1407 = vst [vmem:[%s2280_s29 + $0x78] sm:$0xff] %v1375_v6 }
 0x206   : > { %1408 = vst [vmem:[%s2280_s29 + $0x80] sm:$0xff] %v1376_v9  ;;  %1409 = vst [vmem:[%s2280_s29 + $0x88] sm:$0xff] %v1377_v18 }
 0x207   : > { %1410 = vst [vmem:[%s2280_s29 + $0x90] sm:$0xff] %v1378_v21  ;;  %1411 = vst [vmem:[%s2280_s29 + $0x98] sm:$0xff] %v1379_v32 }
 0x208   : > { %1412 = vst [vmem:[%s2280_s29 + $0xa0] sm:$0xff] %v1380_v38  ;;  %1413 = vst [vmem:[%s2280_s29 + $0xa8] sm:$0xff] %v1381_v51 }
 0x209   : > { %1414 = vst [vmem:[%s2280_s29 + $0xb0] sm:$0xff] %v1382_v55  ;;  %1415 = vst [vmem:[%s2280_s29 + $0xb8] sm:$0xff] %v1383_v4 }
 0x20a   : > { %1416 = vst [vmem:[%s2280_s29 + $0xc0] sm:$0xff] %v1384_v8  ;;  %1417 = vst [vmem:[%s2280_s29 + $0xc8] sm:$0xff] %v1385_v22 }
 0x20b   : > { %1418 = vst [vmem:[%s2280_s29 + $0xd0] sm:$0xff] %v1386_v26  ;;  %1419 = vst [vmem:[%s2280_s29 + $0xd8] sm:$0xff] %v1387_v5 }
 0x20c   : > { %1420 = vst [vmem:[%s2280_s29 + $0xe0] sm:$0xff] %v1388_v41  ;;  %1421 = vst [vmem:[%s2280_s29 + $0xe8] sm:$0xff] %v1389_v45 }
 0x20d   : > { %1422 = vst [vmem:[%s2280_s29 + $0xf0] sm:$0xff] %v1390_v62  ;;  %1423 = vst [vmem:[%s2280_s29 + $0xf8] sm:$0xff] %v1391_v1 }
 0x20e PF: > { %s14_s15 = sadd.s32 1, %s1847_s15  }
 0x20f   : > { %p11_p4 = scmp.ge.s32.totalorder %s14_s15, 4  }
 0x211   :  { %13 = sbr.rel (!%p11_p4) target bundleno = 1 (0x1), region = 66 }

// kernel: generator_forward.11
= control target key start
LH: loop header
LB: loop body
LE: loop exit
PB: predicated region body
PF: predicated region fallthrough
CT: control target
= control target key end

     0   :  { %s753_s15 = smov 0   ;;  %s876_s0 = inlined_call_operand.vmem [shape: bf16[2,64,256], index: 0, kind: input, shape index: {}]   ;;  %s877_s1 = inlined_call_operand.vmem [shape: bf16[256,128], index: 1, kind: input, shape index: {}]   ;;  %s878_s2 = inlined_call_operand.vmem [shape: f32[1,128], index: 2, kind: input, shape index: {}]   ;;  %s879_s3 = inlined_call_operand.vmem [shape: f32[1,128], index: 3, kind: input, shape index: {}]   ;;  %s880_s4 = inlined_call_operand.vmem [shape: f32[2,64,128], index: 4, kind: output, shape index: {}]  }
   0x1 LB: > { %s589_s16 = sadd.s32 4294967295, %s726_s15   ;;  %p593_p0 = scmp.ge.s32.totalorder %s726_s15, 1  ;;  %s726_s15 = sphi %s753_s15, %s14_s15  }
   0x2   : > { %p162_p1 = scmp.lt.s32.totalorder %s726_s15, 3 }
   0x4   : > { %p163_p2 = pnand %p593_p0, %p162_p1 }
   0x5   : > { %v690_v0 = vld [vmem:[%s877_s1 + $0x40] sm:$0xff] (!%p163_p2)   ;;  %v692_v2 = vld [vmem:[%s877_s1 + $0x48] sm:$0xff] (!%p163_p2)   ;;  %p188_p3 = scmp.lt.s32.totalorder (!%p163_p2), %s589_s16, 1  ;;  %v694_v4 = vld [vmem:[%s877_s1 + $0x50] sm:$0xff] (!%p163_p2)  }
   0x6   : > { %166 = sbr.rel (%p163_p2) target bundleno = 348 (0x15c), region = 36  ;;  %v691_v1 = vld [vmem:[%s877_s1] sm:$0xff] (!%p163_p2)   ;;  %626 = vmatprep.subr.bf16.mxu0 (!%p163_p2), %v690_v0  ;;  %666 = vmatprep.subr.bf16.mxu1 (!%p163_p2), %v690_v0  ;;  %v693_v3 = vld [vmem:[%s877_s1 + $0x8] sm:$0xff] (!%p163_p2)   ;;  %v695_v5 = vld [vmem:[%s877_s1 + $0x10] sm:$0xff] (!%p163_p2)  }
   0x7   : > { %627 = vmatpush3.bf16.msra.mxu0 (!%p163_p2), %v691_v1  ;;  %674 = vmatpush3.bf16.msra.mxu1 (!%p163_p2), %v691_v1  ;;  %v696_v6 = vld [vmem:[%s877_s1 + $0x58] sm:$0xff] (!%p163_p2)   ;;  %v698_v8 = vld [vmem:[%s877_s1 + $0x60] sm:$0xff] (!%p163_p2)   ;;  %v700_v10 = vld [vmem:[%s877_s1 + $0x68] sm:$0xff] (!%p163_p2)  }
   0x8   : > { %628 = vmatprep.subr.bf16.mxu0 (!%p163_p2), %v692_v2  ;;  %667 = vmatprep.subr.bf16.mxu1 (!%p163_p2), %v692_v2  ;;  %v697_v7 = vld [vmem:[%s877_s1 + $0x18] sm:$0xff] (!%p163_p2)   ;;  %v699_v9 = vld [vmem:[%s877_s1 + $0x20] sm:$0xff] (!%p163_p2)   ;;  %v701_v13 = vld [vmem:[%s877_s1 + $0x28] sm:$0xff] (!%p163_p2)  }
   0x9   : > { %v702_v14 = vld [vmem:[%s877_s1 + $0x70] sm:$0xff] (!%p163_p2)   ;;  %v704_v16 = vld [vmem:[%s877_s1 + $0x78] sm:$0xff] (!%p163_p2)  }
   0xa   : > { %v703_v15 = vld [vmem:[%s877_s1 + $0x30] sm:$0xff] (!%p163_p2)   ;;  %v705_v17 = vld [vmem:[%s877_s1 + $0x38] sm:$0xff] (!%p163_p2)  }
   0xb   : > { %629 = vmatpush3.bf16.msra.mxu0 (!%p163_p2), %v693_v3  ;;  %675 = vmatpush3.bf16.msra.mxu1 (!%p163_p2), %v693_v3 }
   0xc   : > { %630 = vmatprep.subr.bf16.mxu0 (!%p163_p2), %v694_v4  ;;  %668 = vmatprep.subr.bf16.mxu1 (!%p163_p2), %v694_v4 }
   0xd   : > { %s882_s16 = smov (!%p188_p3, %s589_s16), 1 }
   0xe   : > { %s624_s7 = sshll.u32 %s882_s16, 6 }
   0xf   : > { %631 = vmatpush3.bf16.msra.mxu0 %v695_v5  ;;  %676 = vmatpush3.bf16.msra.mxu1 %v695_v5  ;;  %s796_s12 = scalar_lea.vmem %s876_s0, %s624_s7  ;;  %s197_s10 = scalar_lea.vmem %s880_s4, %s624_s7 }
  0x10   : > { %632 = vmatprep.subr.bf16.mxu0 %v696_v6  ;;  %669 = vmatprep.subr.bf16.mxu1 %v696_v6  ;;  %v708_v11 = vld [vmem:[%s796_s12 + $0x4] ss:$8 sps:$4 sm:$0xff]   ;;  %v706_v18 = vld [vmem:[%s796_s12] ss:$8 sps:$4 sm:$0xff]   ;;  %v712_v20 = vld [vmem:[%s796_s12 + $0x14] ss:$8 sps:$4 sm:$0xff]  }
  0x11   : > { %v711_v12 = vld [vmem:[%s796_s12 + $0x24] ss:$8 sps:$4 sm:$0xff]   ;;  %407 = vmatprep.mubr.bf16.mxu0 %v708_v11  ;;  %v709_v19 = vld [vmem:[%s796_s12 + $0x20] ss:$8 sps:$4 sm:$0xff]   ;;  %v715_v21 = vld [vmem:[%s796_s12 + $0x34] ss:$8 sps:$4 sm:$0xff]  }
  0x12   : > { %423 = vmatprep.mubr.bf16.mxu1 %v711_v12  ;;  %v714_v22 = vld [vmem:[%s796_s12 + $0x10] ss:$8 sps:$4 sm:$0xff]  }
  0x13   : > { %633 = vmatpush3.bf16.msra.mxu0 %v697_v7  ;;  %677 = vmatpush3.bf16.msra.mxu1 %v697_v7  ;;  %v717_v23 = vld [vmem:[%s796_s12 + $0x30] ss:$8 sps:$4 sm:$0xff]  }
  0x14   : > { %634 = vmatprep.subr.bf16.mxu0 %v698_v8  ;;  %670 = vmatprep.subr.bf16.mxu1 %v698_v8 }
  0x17   : > { %635 = vmatpush3.bf16.msra.mxu0 %v699_v9  ;;  %678 = vmatpush3.bf16.msra.mxu1 %v699_v9 }
  0x18   : > { %636 = vmatprep.subr.bf16.mxu0 %v700_v10  ;;  %671 = vmatprep.subr.bf16.mxu1 %v700_v10 }
  0x1b   : > { %637 = vmatpush3.bf16.msra.mxu0 %v701_v13  ;;  %679 = vmatpush3.bf16.msra.mxu1 %v701_v13 }
  0x1c   : > { %638 = vmatprep.subr.bf16.mxu0 %v702_v14  ;;  %672 = vmatprep.subr.bf16.mxu1 %v702_v14 }
  0x1f   : > { %639 = vmatpush3.bf16.msra.mxu0 %v703_v15  ;;  %680 = vmatpush3.bf16.msra.mxu1 %v703_v15 }
  0x20   : > { %640 = vmatprep.subr.bf16.mxu0 %v704_v16  ;;  %673 = vmatprep.subr.bf16.mxu1 %v704_v16 }
  0x23   : > { %641 = vmatpush3.bf16.msra.mxu0 %v705_v17  ;;  %681 = vmatpush3.bf16.msra.mxu1 %v705_v17 }
  0x26   : > { %408 = vmatmul.mubr.bf16.vlgmr.msra.gmra.mrb[0].mxu0 %v706_v18  ;;  %424 = vmatmul.mubr.bf16.vlgmr.msra.gmra.mrb[0].mxu1 %v709_v19 }
  0x27   : > { %415 = vmatprep.mubr.bf16.mxu0 %v712_v20  ;;  %431 = vmatprep.mubr.bf16.mxu1 %v715_v21 }
  0x2e   : > { %416 = vmatmul.mubr.bf16.gmra.mrb[4].mxu0 %v714_v22  ;;  %432 = vmatmul.mubr.bf16.gmra.mrb[4].mxu1 %v717_v23 }
  0xf9   : > { %v642_v24 = vpop.f32.mrb[0].mxu0  ;;  %v654_v25 = vpop.f32.mrb[0].mxu1 }
  0xfa   : > { %v643_v26 = vpop.f32.mrb[1].mxu0  ;;  %v655_v27 = vpop.f32.mrb[1].mxu1 }
  0xfb   : > { %v827_v28 = vadd.f32 %v643_v26, %v642_v24  ;;  %v645_v29 = vpop.f32.mrb[2].mxu0  ;;  %v829_v30 = vadd.f32 %v655_v27, %v654_v25  ;;  %v657_v31 = vpop.f32.mrb[2].mxu1 }
  0xfc   : > { %v646_v32 = vpop.f32.mrb[3].mxu0  ;;  %v658_v33 = vpop.f32.mrb[3].mxu1 }
  0xfd   : > { %v831_v34 = vadd.f32 %v646_v32, %v645_v29  ;;  %v833_v35 = vadd.f32 %v658_v33, %v657_v31  ;;  %v492_v31 = vlaneseq  ;;  %v440_v33 = vld [vmem:[%s878_s2] sm:$0x1] }
  0xff   : > { %v442_v40 = vadd.f32 %v831_v34, %v827_v28  ;;  %v493_v32 = vshrl.u32 %v492_v31, 7 }
 0x101   : > { %v648_v36 = vpop.f32.mrb[4].mxu0  ;;  %v660_v37 = vpop.f32.mrb[4].mxu1 }
 0x102   : > { %v649_v38 = vpop.f32.mrb[5].mxu0  ;;  %v661_v39 = vpop.f32.mrb[5].mxu1 }
 0x103   : > { %v837_v41 = vadd.f32 %v649_v38, %v648_v36  ;;  %v651_v42 = vpop.f32.mrb[6].mxu0  ;;  %v839_v43 = vadd.f32 %v661_v39, %v660_v37  ;;  %v663_v44 = vpop.f32.mrb[6].mxu1  ;;  %v494_v36 = vsub.s32 0, %v493_v32  ;;  %v441_v39 = vld [vmem:[%s879_s3] sm:$0x1] }
 0x104   : > { %v652_v45 = vpop.f32.mrb[7].mxu0  ;;  %v664_v46 = vpop.f32.mrb[7].mxu1 }
 0x105   : > { %v443_v47 = vadd.f32 %v837_v41, %v442_v40  ;;  %v653_v48 = vadd.f32 %v652_v45, %v651_v42  ;;  %v842_v49 = vadd.f32 %v664_v46, %v663_v44 }
 0x107   : > { %v444_v50 = vadd.f32 %v653_v48, %v443_v47 }
 0x109   : > { %v445_v51 = vadd.f32 %v829_v30, %v444_v50 }
 0x10b   : > { %v446_v52 = vadd.f32 %v833_v35, %v445_v51 }
 0x10d   : > { %v447_v53 = vadd.f32 %v839_v43, %v446_v52 }
 0x10f   : > { %v448_v54 = vadd.f32 %v842_v49, %v447_v53 }
 0x111   : > { %v449_v55 = vrot.slane %v448_v54, 4 }
 0x113   : > { %v450_v56 = vadd.f32 %v449_v55, %v448_v54 }
 0x115   : > { %v451_v57 = vrot.slane %v450_v56, 2 }
 0x117   : > { %v452_v58 = vadd.f32 %v451_v57, %v450_v56 }
 0x119   : > { %v453_v59 = vrot.slane %v452_v58, 1 }
 0x11b   : > { %v454_v60 = vadd.f32 %v453_v59, %v452_v58 }
 0x11d   : > { %v456_v61 = vmul.f32 0.015625, %v454_v60 }
 0x11f   : > { %v457_v62 = vsub.f32 %v827_v28, %v456_v61  ;;  %v458_v63 = vsub.f32 %v831_v34, %v456_v61  ;;  %v459_v0 = vsub.f32 %v837_v41, %v456_v61  ;;  %v460_v1 = vsub.f32 %v653_v48, %v456_v61 }
 0x120   : > { %v461_v4 = vsub.f32 %v829_v30, %v456_v61  ;;  %v462_v7 = vsub.f32 %v833_v35, %v456_v61  ;;  %v463_v10 = vsub.f32 %v839_v43, %v456_v61  ;;  %v464_v13 = vsub.f32 %v842_v49, %v456_v61 }
 0x121   : > { %v465_v2 = vmul.f32 %v457_v62, %v457_v62  ;;  %v466_v3 = vmul.f32 %v458_v63, %v458_v63  ;;  %v467_v5 = vmul.f32 %v459_v0, %v459_v0  ;;  %v468_v8 = vmul.f32 %v460_v1, %v460_v1 }
 0x122   : > { %v469_v11 = vmul.f32 %v461_v4, %v461_v4  ;;  %v470_v14 = vmul.f32 %v462_v7, %v462_v7  ;;  %v471_v16 = vmul.f32 %v463_v10, %v463_v10  ;;  %v472_v18 = vmul.f32 %v464_v13, %v464_v13 }
 0x123   : > { %v473_v6 = vadd.f32 %v466_v3, %v465_v2 }
 0x125   : > { %v474_v9 = vadd.f32 %v473_v6, %v467_v5 }
 0x127   : > { %v475_v12 = vadd.f32 %v474_v9, %v468_v8 }
 0x129   : > { %v476_v15 = vadd.f32 %v475_v12, %v469_v11 }
 0x12b   : > { %v477_v17 = vadd.f32 %v476_v15, %v470_v14 }
 0x12d   : > { %v478_v19 = vadd.f32 %v477_v17, %v471_v16 }
 0x12f   : > { %v479_v20 = vadd.f32 %v478_v19, %v472_v18 }
 0x131   : > { %v480_v21 = vrot.slane %v479_v20, 4 }
 0x133   : > { %v481_v22 = vadd.f32 %v480_v21, %v479_v20 }
 0x135   : > { %v482_v23 = vrot.slane %v481_v22, 2 }
 0x137   : > { %v483_v24 = vadd.f32 %v482_v23, %v481_v22 }
 0x139   : > { %v484_v25 = vrot.slane %v483_v24, 1 }
 0x13b   : > { %v485_v26 = vadd.f32 %v484_v25, %v483_v24 }
 0x13d   : > { %v486_v27 = vmul.f32 0.015625, %v485_v26 }
 0x13f   : > { %v487_v29 = vadd.f32 1e-05, %v486_v27 }
 0x141   : > { %718 = vrsqrt.f32 %v487_v29 }
 0x14b   : > { %v719_v37 = vpop.eup %718 }
 0x14c   : > { %v489_v38 = vmul.f32 %v719_v37, %v440_v33 }
 0x14e   : > { %v490_v40 = vmul.f32 %v489_v38, %v456_v61  ;;  %v495_v42 = vrot.slane %v489_v38, %v494_v36 }
 0x150   : > { %v491_v44 = vsub.f32 %v441_v39, %v490_v40  ;;  %v496_v45 = vmul.f32 %v827_v28, %v495_v42  ;;  %v497_v46 = vmul.f32 %v831_v34, %v495_v42  ;;  %v498_v47 = vmul.f32 %v837_v41, %v495_v42 }
 0x151   : > { %v499_v50 = vmul.f32 %v653_v48, %v495_v42  ;;  %v500_v52 = vmul.f32 %v829_v30, %v495_v42  ;;  %v501_v53 = vmul.f32 %v833_v35, %v495_v42  ;;  %v502_v54 = vmul.f32 %v839_v43, %v495_v42 }
 0x152   : > { %v508_v51 = vrot.slane %v491_v44, %v494_v36  ;;  %v503_v55 = vmul.f32 %v842_v49, %v495_v42 }
 0x154   : > { %v510_v56 = vadd.f32 %v508_v51, %v496_v45  ;;  %v511_v57 = vadd.f32 %v508_v51, %v497_v46  ;;  %v512_v58 = vadd.f32 %v508_v51, %v498_v47  ;;  %v513_v59 = vadd.f32 %v508_v51, %v499_v50 }
 0x155   : > { %v514_v28 = vadd.f32 %v508_v51, %v500_v52  ;;  %v515_v34 = vadd.f32 %v508_v51, %v501_v53  ;;  %v516_v41 = vadd.f32 %v508_v51, %v502_v54  ;;  %v517_v48 = vadd.f32 %v508_v51, %v503_v55 }
 0x156   : > { %v518_v30 = vmax.f32 %v510_v56, 0.0  ;;  %v519_v60 = vmax.f32 %v511_v57, 0.0  ;;  %v520_v35 = vmax.f32 %v512_v58, 0.0  ;;  %v521_v61 = vmax.f32 %v513_v59, 0.0 }
 0x157   : > { %v522_v43 = vmax.f32 %v514_v28, 0.0  ;;  %v523_v62 = vmax.f32 %v515_v34, 0.0  ;;  %v524_v49 = vmax.f32 %v516_v41, 0.0  ;;  %v525_v63 = vmax.f32 %v517_v48, 0.0 }
 0x158   : > { %526 = vst [vmem:[%s197_s10] sm:$0xff] %v518_v30  ;;  %527 = vst [vmem:[%s197_s10 + $0x8] sm:$0xff] %v519_v60 }
 0x159   : > { %528 = vst [vmem:[%s197_s10 + $0x10] sm:$0xff] %v520_v35  ;;  %529 = vst [vmem:[%s197_s10 + $0x18] sm:$0xff] %v521_v61 }
 0x15a   : > { %530 = vst [vmem:[%s197_s10 + $0x20] sm:$0xff] %v522_v43  ;;  %531 = vst [vmem:[%s197_s10 + $0x28] sm:$0xff] %v523_v62 }
 0x15b   : > { %532 = vst [vmem:[%s197_s10 + $0x30] sm:$0xff] %v524_v49  ;;  %533 = vst [vmem:[%s197_s10 + $0x38] sm:$0xff] %v525_v63 }
 0x15c PF: > { %s14_s15 = sadd.s32 1, %s726_s15  }
 0x15d   : > { %p11_p4 = scmp.ge.s32.totalorder %s14_s15, 4  }
 0x15f   :  { %13 = sbr.rel (!%p11_p4) target bundleno = 1 (0x1), region = 66 }

// kernel: generator_forward.12
= control target key start
LH: loop header
LB: loop body
LE: loop exit
PB: predicated region body
PF: predicated region fallthrough
CT: control target
= control target key end

     0   :  { %s836_s15 = smov 0   ;;  %s963_s0 = inlined_call_operand.vmem [shape: bf16[2,16,512], index: 0, kind: input, shape index: {}]   ;;  %s964_s1 = inlined_call_operand.vmem [shape: bf16[512,128], index: 1, kind: input, shape index: {}]   ;;  %s965_s2 = inlined_call_operand.vmem [shape: f32[1,128], index: 2, kind: input, shape index: {}]   ;;  %s966_s3 = inlined_call_operand.vmem [shape: f32[1,128], index: 3, kind: input, shape index: {}]   ;;  %s967_s4 = inlined_call_operand.vmem [shape: f32[2,16,128], index: 4, kind: output, shape index: {}]  }
   0x1 LB: > { %s662_s16 = sadd.s32 4294967295, %s809_s15   ;;  %p666_p0 = scmp.ge.s32.totalorder %s809_s15, 1  ;;  %s809_s15 = sphi %s836_s15, %s14_s15  }
   0x2   : > { %p162_p1 = scmp.lt.s32.totalorder %s809_s15, 3 }
   0x4   : > { %p163_p2 = pnand %p666_p0, %p162_p1 }
   0x5   : > { %v763_v0 = vld [vmem:[%s964_s1 + $0x40] sm:$0xff] (!%p163_p2)   ;;  %v767_v4 = vld [vmem:[%s964_s1 + $0x48] sm:$0xff] (!%p163_p2)   ;;  %v771_v8 = vld [vmem:[%s964_s1 + $0x50] sm:$0xff] (!%p163_p2)   ;;  %p188_p3 = scmp.lt.s32.totalorder (!%p163_p2), %s662_s16, 1 }
   0x6   : > { %166 = sbr.rel (%p163_p2) target bundleno = 321 (0x141), region = 36  ;;  %v764_v1 = vld [vmem:[%s964_s1 + $0xc0] sm:$0xff] (!%p163_p2)   ;;  %711 = vmatprep.subr.bf16.mxu0 (!%p163_p2), %v763_v0  ;;  %v768_v5 = vld [vmem:[%s964_s1 + $0xc8] sm:$0xff] (!%p163_p2)   ;;  %v772_v9 = vld [vmem:[%s964_s1 + $0xd0] sm:$0xff] (!%p163_p2)  }
   0x7   : > { %v765_v2 = vld [vmem:[%s964_s1] sm:$0xff] (!%p163_p2)   ;;  %733 = vmatprep.subr.bf16.mxu1 (!%p163_p2), %v764_v1  ;;  %v769_v6 = vld [vmem:[%s964_s1 + $0x8] sm:$0xff] (!%p163_p2)   ;;  %v773_v10 = vld [vmem:[%s964_s1 + $0x10] sm:$0xff] (!%p163_p2)  }
   0x8   : > { %v766_v3 = vld [vmem:[%s964_s1 + $0x80] sm:$0xff] (!%p163_p2)   ;;  %712 = vmatpush3.bf16.msra.mxu0 (!%p163_p2), %v765_v2  ;;  %v770_v7 = vld [vmem:[%s964_s1 + $0x88] sm:$0xff] (!%p163_p2)   ;;  %v774_v11 = vld [vmem:[%s964_s1 + $0x90] sm:$0xff] (!%p163_p2)  }
   0x9   : > { %734 = vmatpush3.bf16.msra.mxu1 (!%p163_p2), %v766_v3  ;;  %713 = vmatprep.subr.bf16.mxu0 (!%p163_p2), %v767_v4  ;;  %v775_v12 = vld [vmem:[%s964_s1 + $0x58] sm:$0xff] (!%p163_p2)   ;;  %v779_v16 = vld [vmem:[%s964_s1 + $0x60] sm:$0xff] (!%p163_p2)   ;;  %v783_v20 = vld [vmem:[%s964_s1 + $0x68] sm:$0xff] (!%p163_p2)  }
   0xa   : > { %735 = vmatprep.subr.bf16.mxu1 (!%p163_p2), %v768_v5  ;;  %v776_v13 = vld [vmem:[%s964_s1 + $0xd8] sm:$0xff] (!%p163_p2)   ;;  %v780_v17 = vld [vmem:[%s964_s1 + $0xe0] sm:$0xff] (!%p163_p2)   ;;  %v784_v21 = vld [vmem:[%s964_s1 + $0xe8] sm:$0xff] (!%p163_p2)  }
   0xb   : > { %v777_v14 = vld [vmem:[%s964_s1 + $0x18] sm:$0xff] (!%p163_p2)   ;;  %v781_v18 = vld [vmem:[%s964_s1 + $0x20] sm:$0xff] (!%p163_p2)   ;;  %v785_v22 = vld [vmem:[%s964_s1 + $0x28] sm:$0xff] (!%p163_p2)  }
   0xc   : > { %714 = vmatpush3.bf16.msra.mxu0 (!%p163_p2), %v769_v6  ;;  %v778_v15 = vld [vmem:[%s964_s1 + $0x98] sm:$0xff] (!%p163_p2)   ;;  %v782_v19 = vld [vmem:[%s964_s1 + $0xa0] sm:$0xff] (!%p163_p2)   ;;  %v786_v23 = vld [vmem:[%s964_s1 + $0xa8] sm:$0xff] (!%p163_p2)  }
   0xd   : > { %736 = vmatpush3.bf16.msra.mxu1 %v770_v7  ;;  %715 = vmatprep.subr.bf16.mxu0 %v771_v8  ;;  %s969_s16 = smov (!%p188_p3, %s662_s16), 1  ;;  %v787_v24 = vld [vmem:[%s964_s1 + $0x70] sm:$0xff]   ;;  %v791_v28 = vld [vmem:[%s964_s1 + $0x78] sm:$0xff]   ;;  %v589_v7 = vlaneseq }
   0xe   : > { %737 = vmatprep.subr.bf16.mxu1 %v772_v9  ;;  %v788_v25 = vld [vmem:[%s964_s1 + $0xf0] sm:$0xff]   ;;  %s709_s23 = sshll.u32 %s969_s16, 5  ;;  %v792_v29 = vld [vmem:[%s964_s1 + $0xf8] sm:$0xff]   ;;  %v561_v9 = vld [vmem:[%s965_s2] sm:$0x1]  ;;  %s710_s17 = sshll.u32 %s969_s16, 4 }
   0xf   : > { %v789_v26 = vld [vmem:[%s964_s1 + $0x30] sm:$0xff]   ;;  %s192_s6 = scalar_lea.vmem %s963_s0, %s709_s23  ;;  %v793_v30 = vld [vmem:[%s964_s1 + $0x38] sm:$0xff]   ;;  %v590_v8 = vshrl.u32 %v589_v7, 7  ;;  %s197_s20 = scalar_lea.vmem %s967_s4, %s710_s17 }
  0x10   : > { %716 = vmatpush3.bf16.msra.mxu0 %v773_v10  ;;  %v790_v27 = vld [vmem:[%s964_s1 + $0xb0] sm:$0xff]   ;;  %v794_v31 = vld [vmem:[%s964_s1 + $0xb8] sm:$0xff]  }
  0x11   : > { %738 = vmatpush3.bf16.msra.mxu1 %v774_v11  ;;  %717 = vmatprep.subr.bf16.mxu0 %v775_v12  ;;  %v795_v32 = vld [vmem:[%s192_s6] ss:$16 sps:$4 sm:$0xff]   ;;  %v797_v33 = vld [vmem:[%s192_s6 + $0x4] ss:$16 sps:$4 sm:$0xff]   ;;  %v798_v34 = vld [vmem:[%s192_s6 + $0x8] ss:$16 sps:$4 sm:$0xff]  }
  0x12   : > { %739 = vmatprep.subr.bf16.mxu1 %v776_v13  ;;  %v800_v35 = vld [vmem:[%s192_s6 + $0xc] ss:$16 sps:$4 sm:$0xff]   ;;  %511 = vmatprep.mubr.bf16.mxu0 %v797_v33  ;;  %v591_v10 = vsub.s32 0, %v590_v8  ;;  %v562_v13 = vld [vmem:[%s966_s3] sm:$0x1] }
  0x13   : > { %552 = vmatprep.mubr.bf16.mxu1 %v800_v35 }
  0x14   : > { %718 = vmatpush3.bf16.msra.mxu0 %v777_v14 }
  0x15   : > { %740 = vmatpush3.bf16.msra.mxu1 %v778_v15  ;;  %719 = vmatprep.subr.bf16.mxu0 %v779_v16 }
  0x16   : > { %741 = vmatprep.subr.bf16.mxu1 %v780_v17 }
  0x18   : > { %720 = vmatpush3.bf16.msra.mxu0 %v781_v18 }
  0x19   : > { %742 = vmatpush3.bf16.msra.mxu1 %v782_v19  ;;  %721 = vmatprep.subr.bf16.mxu0 %v783_v20 }
  0x1a   : > { %743 = vmatprep.subr.bf16.mxu1 %v784_v21 }
  0x1c   : > { %722 = vmatpush3.bf16.msra.mxu0 %v785_v22 }
  0x1d   : > { %744 = vmatpush3.bf16.msra.mxu1 %v786_v23  ;;  %723 = vmatprep.subr.bf16.mxu0 %v787_v24 }
  0x1e   : > { %745 = vmatprep.subr.bf16.mxu1 %v788_v25 }
  0x20   : > { %724 = vmatpush3.bf16.msra.mxu0 %v789_v26 }
  0x21   : > { %746 = vmatpush3.bf16.msra.mxu1 %v790_v27  ;;  %725 = vmatprep.subr.bf16.mxu0 %v791_v28 }
  0x22   : > { %747 = vmatprep.subr.bf16.mxu1 %v792_v29 }
  0x24   : > { %726 = vmatpush3.bf16.msra.mxu0 %v793_v30 }
  0x25   : > { %748 = vmatpush3.bf16.msra.mxu1 %v794_v31 }
  0x27   : > { %512 = vmatmul.mubr.bf16.vlgmr.msra.gmra.mrb[0].mxu0 %v795_v32 }
  0x28   : > { %553 = vmatmul.mubr.bf16.vlgmr.msra.gmra.mrb[0].mxu1 %v798_v34 }
  0xfa   : > { %v727_v36 = vpop.f32.mrb[0].mxu0 }
  0xfb   : > { %v749_v37 = vpop.f32.mrb[0].mxu1  ;;  %v728_v38 = vpop.f32.mrb[1].mxu0 }
  0xfc   : > { %v729_v39 = vadd.f32 %v728_v38, %v727_v36  ;;  %v750_v40 = vpop.f32.mrb[1].mxu1  ;;  %v730_v41 = vpop.f32.mrb[2].mxu0 }
  0xfd   : > { %v751_v42 = vadd.f32 %v750_v40, %v749_v37  ;;  %v752_v43 = vpop.f32.mrb[2].mxu1  ;;  %v731_v44 = vpop.f32.mrb[3].mxu0 }
  0xfe   : > { %v732_v45 = vadd.f32 %v731_v44, %v730_v41  ;;  %v753_v46 = vpop.f32.mrb[3].mxu1 }
  0xff   : > { %v555_v47 = vadd.f32 %v751_v42, %v729_v39  ;;  %v754_v48 = vadd.f32 %v753_v46, %v752_v43 }
 0x101   : > { %v558_v49 = vadd.f32 %v754_v48, %v732_v45 }
 0x103   : > { %v563_v50 = vadd.f32 %v558_v49, %v555_v47 }
 0x105   : > { %v564_v51 = vrot.slane %v563_v50, 4 }
 0x107   : > { %v565_v52 = vadd.f32 %v564_v51, %v563_v50 }
 0x109   : > { %v566_v53 = vrot.slane %v565_v52, 2 }
 0x10b   : > { %v567_v54 = vadd.f32 %v566_v53, %v565_v52 }
 0x10d   : > { %v568_v55 = vrot.slane %v567_v54, 1 }
 0x10f   : > { %v569_v56 = vadd.f32 %v568_v55, %v567_v54 }
 0x111   : > { %v571_v57 = vmul.f32 0.0625, %v569_v56 }
 0x113   : > { %v572_v58 = vsub.f32 %v555_v47, %v571_v57  ;;  %v573_v59 = vsub.f32 %v558_v49, %v571_v57 }
 0x115   : > { %v574_v60 = vmul.f32 %v572_v58, %v572_v58  ;;  %v575_v61 = vmul.f32 %v573_v59, %v573_v59 }
 0x117   : > { %v576_v62 = vadd.f32 %v575_v61, %v574_v60 }
 0x119   : > { %v577_v63 = vrot.slane %v576_v62, 4 }
 0x11b   : > { %v578_v0 = vadd.f32 %v577_v63, %v576_v62 }
 0x11d   : > { %v579_v1 = vrot.slane %v578_v0, 2 }
 0x11f   : > { %v580_v2 = vadd.f32 %v579_v1, %v578_v0 }
 0x121   : > { %v581_v3 = vrot.slane %v580_v2, 1 }
 0x123   : > { %v582_v4 = vadd.f32 %v581_v3, %v580_v2 }
 0x125   : > { %v583_v5 = vmul.f32 0.0625, %v582_v4 }
 0x127   : > { %v584_v6 = vadd.f32 1e-05, %v583_v5 }
 0x129   : > { %801 = vrsqrt.f32 %v584_v6 }
 0x133   : > { %v802_v11 = vpop.eup %801 }
 0x134   : > { %v586_v12 = vmul.f32 %v802_v11, %v561_v9 }
 0x136   : > { %v587_v14 = vmul.f32 %v586_v12, %v571_v57  ;;  %v592_v15 = vrot.slane %v586_v12, %v591_v10 }
 0x138   : > { %v588_v16 = vsub.f32 %v562_v13, %v587_v14  ;;  %v593_v17 = vmul.f32 %v592_v15, %v555_v47  ;;  %v594_v18 = vmul.f32 %v592_v15, %v558_v49 }
 0x13a   : > { %v599_v19 = vrot.slane %v588_v16, %v591_v10 }
 0x13c   : > { %v601_v20 = vadd.f32 %v599_v19, %v593_v17  ;;  %v602_v21 = vadd.f32 %v599_v19, %v594_v18 }
 0x13e   : > { %v603_v22 = vmax.f32 %v601_v20, 0.0  ;;  %v604_v23 = vmax.f32 %v602_v21, 0.0 }
 0x140   : > { %605 = vst [vmem:[%s197_s20] sm:$0xff] %v603_v22  ;;  %606 = vst [vmem:[%s197_s20 + $0x8] sm:$0xff] %v604_v23 }
 0x141 PF: > { %s14_s15 = sadd.s32 1, %s809_s15  }
 0x142   : > { %p11_p4 = scmp.ge.s32.totalorder %s14_s15, 4  }
 0x144   :  { %13 = sbr.rel (!%p11_p4) target bundleno = 1 (0x1), region = 66 }

// kernel: generator_forward.14
= control target key start
LH: loop header
LB: loop body
LE: loop exit
PB: predicated region body
PF: predicated region fallthrough
CT: control target
= control target key end

     0   :  { %s1020_s18 = smov 0   ;;  %s1162_s0 = inlined_call_operand.vmem [shape: bf16[2,16,576], index: 0, kind: input, shape index: {}]   ;;  %s1163_s1 = inlined_call_operand.vmem [shape: bf16[576,128], index: 1, kind: input, shape index: {}]   ;;  %s1164_s2 = inlined_call_operand.vmem [shape: f32[1,128], index: 2, kind: input, shape index: {}]   ;;  %s1165_s3 = inlined_call_operand.vmem [shape: f32[1,128], index: 3, kind: input, shape index: {}]   ;;  %s1166_s4 = inlined_call_operand.vmem [shape: f32[2,16,128], index: 4, kind: input, shape index: {}, may-alias: {4,5}]   ;;  %s1167_s5 = inlined_call_operand.vmem [shape: f32[2,16,128], index: 5, kind: output, shape index: {}, may-alias: {4,5}]  }
   0x1 LB: > { %s807_s19 = sadd.s32 4294967295, %s986_s18   ;;  %p811_p0 = scmp.ge.s32.totalorder %s986_s18, 1  ;;  %s986_s18 = sphi %s1020_s18, %s15_s18  }
   0x2   : > { %p197_p1 = scmp.lt.s32.totalorder %s986_s18, 3 }
   0x4   : > { %p198_p2 = pnand %p811_p0, %p197_p1 }
   0x5   : > { %v935_v0 = vld [vmem:[%s1163_s1 + $0x40] sm:$0xff] (!%p198_p2)   ;;  %v939_v4 = vld [vmem:[%s1163_s1 + $0x48] sm:$0xff] (!%p198_p2)   ;;  %v943_v8 = vld [vmem:[%s1163_s1 + $0x50] sm:$0xff] (!%p198_p2)   ;;  %p230_p3 = scmp.lt.s32.totalorder (!%p198_p2), %s807_s19, 1  ;;  %v988_v34 = vmov (!%p198_p2), 0.0   ;;  %vm989_vm0 = vmmov (!%p198_p2), 0  }
   0x6   : > { %201 = sbr.rel (%p198_p2) target bundleno = 331 (0x14b), region = 40  ;;  %v936_v1 = vld [vmem:[%s1163_s1 + $0xc0] sm:$0xff] (!%p198_p2)   ;;  %863 = vmatprep.subr.bf16.mxu0 (!%p198_p2), %v935_v0  ;;  %v940_v5 = vld [vmem:[%s1163_s1 + $0xc8] sm:$0xff] (!%p198_p2)   ;;  %v944_v9 = vld [vmem:[%s1163_s1 + $0xd0] sm:$0xff] (!%p198_p2)   ;;  %vm565_vm1 = vcmask (!%p198_p2), 523264  }
   0x7   : > { %v937_v2 = vld [vmem:[%s1163_s1] sm:$0xff] (!%p198_p2)   ;;  %885 = vmatprep.subr.bf16.mxu1 (!%p198_p2), %v936_v1  ;;  %v941_v6 = vld [vmem:[%s1163_s1 + $0x8] sm:$0xff] (!%p198_p2)   ;;  %v945_v10 = vld [vmem:[%s1163_s1 + $0x10] sm:$0xff] (!%p198_p2)  }
   0x8   : > { %v938_v3 = vld [vmem:[%s1163_s1 + $0x80] sm:$0xff] (!%p198_p2)   ;;  %864 = vmatpush3.bf16.msra.mxu0 (!%p198_p2), %v937_v2  ;;  %v942_v7 = vld [vmem:[%s1163_s1 + $0x88] sm:$0xff] (!%p198_p2)   ;;  %v946_v11 = vld [vmem:[%s1163_s1 + $0x90] sm:$0xff] (!%p198_p2)  }
   0x9   : > { %886 = vmatpush3.bf16.msra.mxu1 (!%p198_p2), %v938_v3  ;;  %865 = vmatprep.subr.bf16.mxu0 (!%p198_p2), %v939_v4  ;;  %v947_v12 = vld [vmem:[%s1163_s1 + $0x58] sm:$0xff] (!%p198_p2)   ;;  %v951_v16 = vld [vmem:[%s1163_s1 + $0x60] sm:$0xff] (!%p198_p2)   ;;  %v955_v20 = vld [vmem:[%s1163_s1 + $0x68] sm:$0xff] (!%p198_p2)  }
   0xa   : > { %887 = vmatprep.subr.bf16.mxu1 (!%p198_p2), %v940_v5  ;;  %v948_v13 = vld [vmem:[%s1163_s1 + $0xd8] sm:$0xff] (!%p198_p2)   ;;  %v952_v17 = vld [vmem:[%s1163_s1 + $0xe0] sm:$0xff] (!%p198_p2)   ;;  %v956_v21 = vld [vmem:[%s1163_s1 + $0xe8] sm:$0xff] (!%p198_p2)  }
   0xb   : > { %v949_v14 = vld [vmem:[%s1163_s1 + $0x18] sm:$0xff] (!%p198_p2)   ;;  %v953_v18 = vld [vmem:[%s1163_s1 + $0x20] sm:$0xff] (!%p198_p2)   ;;  %v957_v22 = vld [vmem:[%s1163_s1 + $0x28] sm:$0xff] (!%p198_p2)  }
   0xc   : > { %866 = vmatpush3.bf16.msra.mxu0 (!%p198_p2), %v941_v6  ;;  %v950_v15 = vld [vmem:[%s1163_s1 + $0x98] sm:$0xff] (!%p198_p2)   ;;  %v954_v19 = vld [vmem:[%s1163_s1 + $0xa0] sm:$0xff] (!%p198_p2)   ;;  %v958_v23 = vld [vmem:[%s1163_s1 + $0xa8] sm:$0xff] (!%p198_p2)  }
   0xd   : > { %888 = vmatpush3.bf16.msra.mxu1 %v942_v7  ;;  %867 = vmatprep.subr.bf16.mxu0 %v943_v8  ;;  %s1169_s19 = smov (!%p230_p3, %s807_s19), 1  ;;  %v959_v24 = vld [vmem:[%s1163_s1 + $0x70] sm:$0xff]   ;;  %v963_v28 = vld [vmem:[%s1163_s1 + $0x78] sm:$0xff]   ;;  %v973_v37 = vld [vmem:[%s1163_s1 + $0x100] sm:$0xff]  }
   0xe   : > { %889 = vmatprep.subr.bf16.mxu1 %v944_v9  ;;  %v960_v25 = vld [vmem:[%s1163_s1 + $0xf0] sm:$0xff]   ;;  %s924_s26 = smul.u32 40, %s1169_s19  ;;  %v964_v29 = vld [vmem:[%s1163_s1 + $0xf8] sm:$0xff]   ;;  %v974_v38 = vld [vmem:[%s1163_s1 + $0x108] sm:$0xff]   ;;  %s861_s27 = sshll.u32 %s1169_s19, 4 }
   0xf   : > { %v961_v26 = vld [vmem:[%s1163_s1 + $0x30] sm:$0xff]   ;;  %v965_v30 = vld [vmem:[%s1163_s1 + $0x38] sm:$0xff]   ;;  %s239_s7 = scalar_lea.vmem %s1166_s4, %s861_s27  ;;  %s244_s11 = scalar_lea.vmem %s1167_s5, %s861_s27 }
  0x10   : > { %868 = vmatpush3.bf16.msra.mxu0 %v945_v10  ;;  %v962_v27 = vld [vmem:[%s1163_s1 + $0xb0] sm:$0xff]   ;;  %s234_s12 = scalar_lea.vmem %s1162_s0, %s924_s26  ;;  %v966_v31 = vld [vmem:[%s1163_s1 + $0xb8] sm:$0xff]  }
  0x11   : > { %890 = vmatpush3.bf16.msra.mxu1 %v946_v11  ;;  %869 = vmatprep.subr.bf16.mxu0 %v947_v12  ;;  %v967_v32 = vld [vmem:[%s234_s12] ss:$20 sps:$4 sm:$0xff]   ;;  %v969_v33 = vld [vmem:[%s234_s12 + $0x4] ss:$20 sps:$4 sm:$0xff]   ;;  %v970_v35 = vld [vmem:[%s234_s12 + $0x8] ss:$20 sps:$4 sm:$0xff]  }
  0x12   : > { %891 = vmatprep.subr.bf16.mxu1 %v948_v13  ;;  %v972_v36 = vld [vmem:[%s234_s12 + $0xc] ss:$20 sps:$4 sm:$0xff]   ;;  %601 = vmatprep.mubr.bf16.mxu0 %v969_v33  ;;  %v975_v39 = vld [vmem:[%s1163_s1 + $0x110] sm:$0xff]   ;;  %v976_v40 = vld [vmem:[%s1163_s1 + $0x118] sm:$0xff]  }
  0x13   : > { %642 = vmatprep.mubr.bf16.mxu1 %v972_v36  ;;  %v977_v41 = vld [vmem:[%s234_s12 + $0x10] ss:$20 sps:$4 sm:$0xff]  }
  0x14   : > { %870 = vmatpush3.bf16.msra.mxu0 %v949_v14 }
  0x15   : > { %892 = vmatpush3.bf16.msra.mxu1 %v950_v15  ;;  %871 = vmatprep.subr.bf16.mxu0 %v951_v16 }
  0x16   : > { %893 = vmatprep.subr.bf16.mxu1 %v952_v17 }
  0x18   : > { %872 = vmatpush3.bf16.msra.mxu0 %v953_v18 }
  0x19   : > { %894 = vmatpush3.bf16.msra.mxu1 %v954_v19  ;;  %873 = vmatprep.subr.bf16.mxu0 %v955_v20  ;;  %v722_v19 = vlaneseq }
  0x1a   : > { %895 = vmatprep.subr.bf16.mxu1 %v956_v21  ;;  %v692_v21 = vld [vmem:[%s1164_s2] sm:$0x1] }
  0x1b   : > { %v723_v20 = vshrl.u32 %v722_v19, 7 }
  0x1c   : > { %874 = vmatpush3.bf16.msra.mxu0 %v957_v22 }
  0x1d   : > { %896 = vmatpush3.bf16.msra.mxu1 %v958_v23  ;;  %875 = vmatprep.subr.bf16.mxu0 %v959_v24  ;;  %v724_v22 = vsub.s32 0, %v723_v20 }
  0x1e   : > { %897 = vmatprep.subr.bf16.mxu1 %v960_v25  ;;  %v693_v25 = vld [vmem:[%s1165_s3] sm:$0x1] }
  0x20   : > { %876 = vmatpush3.bf16.msra.mxu0 %v961_v26 }
  0x21   : > { %898 = vmatpush3.bf16.msra.mxu1 %v962_v27  ;;  %877 = vmatprep.subr.bf16.mxu0 %v963_v28  ;;  %v720_v28 = vld [vmem:[%s239_s7] sm:$0xff] }
  0x22   : > { %899 = vmatprep.subr.bf16.mxu1 %v964_v29  ;;  %v721_v29 = vld [vmem:[%s239_s7 + $0x8] sm:$0xff] }
  0x24   : > { %878 = vmatpush3.bf16.msra.mxu0 %v965_v30 }
  0x25   : > { %900 = vmatpush3.bf16.msra.mxu1 %v966_v31  ;;  %912 = vmatprep.subr.bf16.mxu0 %v988_v34 }
  0x27   : > { %602 = vmatmul.mubr.bf16.vlgmr.msra.gmra.mrb[0].mxu0 %v967_v32 }
  0x28   : > { %643 = vmatmul.mubr.bf16.vlgmr.msra.gmra.mrb[0].mxu1 %v970_v35  ;;  %913 = vmatpush3.bf16.msra.mxu0 %v973_v37 }
  0x29   : > { %914 = vmatprep.subr.bf16.mxu0 %v988_v34  ;;  %920 = vmatprep.mubr.msk.bf16.mxu0 %vm989_vm0, %v988_v34 }
  0x2c   : > { %915 = vmatpush3.bf16.msra.mxu0 %v974_v38 }
  0x2d   : > { %916 = vmatprep.subr.bf16.mxu0 %v988_v34 }
  0x30   : > { %917 = vmatpush3.bf16.msra.mxu0 %v975_v39 }
  0x31   : > { %918 = vmatprep.subr.bf16.mxu0 %v988_v34 }
  0x34   : > { %919 = vmatpush3.bf16.msra.mxu0 %v976_v40 }
  0x37   : > { %921 = vmatmul.mubr.msk.bf16.vlgmr.msra.gmra.mrb[4].mxu0 %vm565_vm1, %v977_v41 }
  0xfa   : > { %v879_v42 = vpop.f32.mrb[0].mxu0 }
  0xfb   : > { %v901_v43 = vpop.f32.mrb[0].mxu1  ;;  %v880_v44 = vpop.f32.mrb[1].mxu0 }
  0xfc   : > { %v881_v45 = vadd.f32 %v880_v44, %v879_v42  ;;  %v902_v46 = vpop.f32.mrb[1].mxu1  ;;  %v882_v47 = vpop.f32.mrb[2].mxu0 }
  0xfd   : > { %v903_v48 = vadd.f32 %v902_v46, %v901_v43  ;;  %v904_v49 = vpop.f32.mrb[2].mxu1  ;;  %v883_v50 = vpop.f32.mrb[3].mxu0 }
  0xfe   : > { %v884_v51 = vadd.f32 %v883_v50, %v882_v47  ;;  %v905_v52 = vpop.f32.mrb[3].mxu1 }
  0xff   : > { %v906_v53 = vadd.f32 %v905_v52, %v904_v49  ;;  %v645_v54 = vadd.f32 %v903_v48, %v881_v45 }
 0x101   : > { %v648_v55 = vadd.f32 %v906_v53, %v884_v51 }
 0x10a   : > { %v685_v56 = vpop.f32.mrb[4].mxu0 }
 0x10b   : > { %v686_v57 = vadd.f32 %v685_v56, %v645_v54  ;;  %v922_v58 = vpop.f32.mrb[5].mxu0 }
 0x10c   : > { %v688_v59 = vpop.f32.mrb[6].mxu0 }
 0x10d   : > { %v689_v60 = vadd.f32 %v688_v59, %v648_v55  ;;  %v923_v61 = vpop.f32.mrb[7].mxu0 }
 0x10f   : > { %v694_v62 = vadd.f32 %v689_v60, %v686_v57 }
 0x111   : > { %v695_v63 = vrot.slane %v694_v62, 4 }
 0x113   : > { %v696_v0 = vadd.f32 %v695_v63, %v694_v62 }
 0x115   : > { %v697_v1 = vrot.slane %v696_v0, 2 }
 0x117   : > { %v698_v2 = vadd.f32 %v697_v1, %v696_v0 }
 0x119   : > { %v699_v3 = vrot.slane %v698_v2, 1 }
 0x11b   : > { %v700_v4 = vadd.f32 %v699_v3, %v698_v2 }
 0x11d   : > { %v702_v5 = vmul.f32 0.0625, %v700_v4 }
 0x11f   : > { %v703_v6 = vsub.f32 %v686_v57, %v702_v5  ;;  %v704_v7 = vsub.f32 %v689_v60, %v702_v5 }
 0x121   : > { %v705_v8 = vmul.f32 %v703_v6, %v703_v6  ;;  %v706_v9 = vmul.f32 %v704_v7, %v704_v7 }
 0x123   : > { %v707_v10 = vadd.f32 %v706_v9, %v705_v8 }
 0x125   : > { %v708_v11 = vrot.slane %v707_v10, 4 }
 0x127   : > { %v709_v12 = vadd.f32 %v708_v11, %v707_v10 }
 0x129   : > { %v710_v13 = vrot.slane %v709_v12, 2 }
 0x12b   : > { %v711_v14 = vadd.f32 %v710_v13, %v709_v12 }
 0x12d   : > { %v712_v15 = vrot.slane %v711_v14, 1 }
 0x12f   : > { %v713_v16 = vadd.f32 %v712_v15, %v711_v14 }
 0x131   : > { %v714_v17 = vmul.f32 0.0625, %v713_v16 }
 0x133   : > { %v715_v18 = vadd.f32 1e-05, %v714_v17 }
 0x135   : > { %978 = vrsqrt.f32 %v715_v18 }
 0x13f   : > { %v979_v23 = vpop.eup %978 }
 0x140   : > { %v717_v24 = vmul.f32 %v979_v23, %v692_v21 }
 0x142   : > { %v718_v26 = vmul.f32 %v717_v24, %v702_v5  ;;  %v725_v27 = vrot.slane %v717_v24, %v724_v22 }
 0x144   : > { %v719_v30 = vsub.f32 %v693_v25, %v718_v26  ;;  %v726_v31 = vmul.f32 %v725_v27, %v686_v57  ;;  %v727_v32 = vmul.f32 %v725_v27, %v689_v60 }
 0x146   : > { %v728_v33 = vadd.f32 %v726_v31, %v720_v28  ;;  %v729_v34 = vadd.f32 %v727_v32, %v721_v29  ;;  %v734_v35 = vrot.slane %v719_v30, %v724_v22 }
 0x148   : > { %v736_v36 = vadd.f32 %v734_v35, %v728_v33  ;;  %v737_v37 = vadd.f32 %v734_v35, %v729_v34 }
 0x14a   : > { %738 = vst [vmem:[%s244_s11] sm:$0xff] %v736_v36  ;;  %739 = vst [vmem:[%s244_s11 + $0x8] sm:$0xff] %v737_v37 }
 0x14b PF: > { %s15_s18 = sadd.s32 1, %s986_s18  }
 0x14c   : > { %p12_p4 = scmp.ge.s32.totalorder %s15_s18, 4  }
 0x14e   :  { %14 = sbr.rel (!%p12_p4) target bundleno = 1 (0x1), region = 73 }

// kernel: generator_forward.13
= control target key start
LH: loop header
LB: loop body
LE: loop exit
PB: predicated region body
PF: predicated region fallthrough
CT: control target
= control target key end

     0   :  { %s951_s15 = smov 0   ;;  %s1090_s0 = inlined_call_operand.vmem [shape: bf16[2,16,576], index: 0, kind: input, shape index: {}]   ;;  %s1091_s1 = inlined_call_operand.vmem [shape: bf16[576,128], index: 1, kind: input, shape index: {}]   ;;  %s1092_s2 = inlined_call_operand.vmem [shape: f32[1,128], index: 2, kind: input, shape index: {}]   ;;  %s1093_s3 = inlined_call_operand.vmem [shape: f32[1,128], index: 3, kind: input, shape index: {}]   ;;  %s1094_s4 = inlined_call_operand.vmem [shape: f32[2,16,128], index: 4, kind: output, shape index: {}]  }
   0x1 LB: > { %s746_s16 = sadd.s32 4294967295, %s922_s15   ;;  %p750_p0 = scmp.ge.s32.totalorder %s922_s15, 1  ;;  %s922_s15 = sphi %s951_s15, %s14_s15  }
   0x2   : > { %p162_p1 = scmp.lt.s32.totalorder %s922_s15, 3 }
   0x4   : > { %p163_p2 = pnand %p750_p0, %p162_p1 }
   0x5   : > { %v871_v0 = vld [vmem:[%s1091_s1 + $0x40] sm:$0xff] (!%p163_p2)   ;;  %v875_v4 = vld [vmem:[%s1091_s1 + $0x48] sm:$0xff] (!%p163_p2)   ;;  %v879_v8 = vld [vmem:[%s1091_s1 + $0x50] sm:$0xff] (!%p163_p2)   ;;  %p188_p3 = scmp.lt.s32.totalorder (!%p163_p2), %s746_s16, 1  ;;  %v924_v34 = vmov (!%p163_p2), 0.0   ;;  %vm925_vm0 = vmmov (!%p163_p2), 0  }
   0x6   : > { %166 = sbr.rel (%p163_p2) target bundleno = 333 (0x14d), region = 36  ;;  %v872_v1 = vld [vmem:[%s1091_s1 + $0xc0] sm:$0xff] (!%p163_p2)   ;;  %799 = vmatprep.subr.bf16.mxu0 (!%p163_p2), %v871_v0  ;;  %v876_v5 = vld [vmem:[%s1091_s1 + $0xc8] sm:$0xff] (!%p163_p2)   ;;  %v880_v9 = vld [vmem:[%s1091_s1 + $0xd0] sm:$0xff] (!%p163_p2)   ;;  %vm518_vm1 = vcmask (!%p163_p2), 523264  }
   0x7   : > { %v873_v2 = vld [vmem:[%s1091_s1] sm:$0xff] (!%p163_p2)   ;;  %821 = vmatprep.subr.bf16.mxu1 (!%p163_p2), %v872_v1  ;;  %v877_v6 = vld [vmem:[%s1091_s1 + $0x8] sm:$0xff] (!%p163_p2)   ;;  %v881_v10 = vld [vmem:[%s1091_s1 + $0x10] sm:$0xff] (!%p163_p2)  }
   0x8   : > { %v874_v3 = vld [vmem:[%s1091_s1 + $0x80] sm:$0xff] (!%p163_p2)   ;;  %800 = vmatpush3.bf16.msra.mxu0 (!%p163_p2), %v873_v2  ;;  %v878_v7 = vld [vmem:[%s1091_s1 + $0x88] sm:$0xff] (!%p163_p2)   ;;  %v882_v11 = vld [vmem:[%s1091_s1 + $0x90] sm:$0xff] (!%p163_p2)  }
   0x9   : > { %822 = vmatpush3.bf16.msra.mxu1 (!%p163_p2), %v874_v3  ;;  %801 = vmatprep.subr.bf16.mxu0 (!%p163_p2), %v875_v4  ;;  %v883_v12 = vld [vmem:[%s1091_s1 + $0x58] sm:$0xff] (!%p163_p2)   ;;  %v887_v16 = vld [vmem:[%s1091_s1 + $0x60] sm:$0xff] (!%p163_p2)   ;;  %v891_v20 = vld [vmem:[%s1091_s1 + $0x68] sm:$0xff] (!%p163_p2)  }
   0xa   : > { %823 = vmatprep.subr.bf16.mxu1 (!%p163_p2), %v876_v5  ;;  %v884_v13 = vld [vmem:[%s1091_s1 + $0xd8] sm:$0xff] (!%p163_p2)   ;;  %v888_v17 = vld [vmem:[%s1091_s1 + $0xe0] sm:$0xff] (!%p163_p2)   ;;  %v892_v21 = vld [vmem:[%s1091_s1 + $0xe8] sm:$0xff] (!%p163_p2)  }
   0xb   : > { %v885_v14 = vld [vmem:[%s1091_s1 + $0x18] sm:$0xff] (!%p163_p2)   ;;  %v889_v18 = vld [vmem:[%s1091_s1 + $0x20] sm:$0xff] (!%p163_p2)   ;;  %v893_v22 = vld [vmem:[%s1091_s1 + $0x28] sm:$0xff] (!%p163_p2)  }
   0xc   : > { %802 = vmatpush3.bf16.msra.mxu0 (!%p163_p2), %v877_v6  ;;  %v886_v15 = vld [vmem:[%s1091_s1 + $0x98] sm:$0xff] (!%p163_p2)   ;;  %v890_v19 = vld [vmem:[%s1091_s1 + $0xa0] sm:$0xff] (!%p163_p2)   ;;  %v894_v23 = vld [vmem:[%s1091_s1 + $0xa8] sm:$0xff] (!%p163_p2)  }
   0xd   : > { %824 = vmatpush3.bf16.msra.mxu1 %v878_v7  ;;  %803 = vmatprep.subr.bf16.mxu0 %v879_v8  ;;  %s1096_s16 = smov (!%p188_p3, %s746_s16), 1  ;;  %v895_v24 = vld [vmem:[%s1091_s1 + $0x70] sm:$0xff]   ;;  %v899_v28 = vld [vmem:[%s1091_s1 + $0x78] sm:$0xff]   ;;  %v909_v37 = vld [vmem:[%s1091_s1 + $0x100] sm:$0xff]  }
   0xe   : > { %825 = vmatprep.subr.bf16.mxu1 %v880_v9  ;;  %v896_v25 = vld [vmem:[%s1091_s1 + $0xf0] sm:$0xff]   ;;  %s860_s21 = smul.u32 40, %s1096_s16  ;;  %v900_v29 = vld [vmem:[%s1091_s1 + $0xf8] sm:$0xff]   ;;  %v910_v38 = vld [vmem:[%s1091_s1 + $0x108] sm:$0xff]   ;;  %s798_s25 = sshll.u32 %s1096_s16, 4 }
   0xf   : > { %v897_v26 = vld [vmem:[%s1091_s1 + $0x30] sm:$0xff]   ;;  %v901_v30 = vld [vmem:[%s1091_s1 + $0x38] sm:$0xff]   ;;  %s197_s28 = scalar_lea.vmem %s1094_s4, %s798_s25 }
  0x10   : > { %804 = vmatpush3.bf16.msra.mxu0 %v881_v10  ;;  %v898_v27 = vld [vmem:[%s1091_s1 + $0xb0] sm:$0xff]   ;;  %s192_s6 = scalar_lea.vmem %s1090_s0, %s860_s21  ;;  %v902_v31 = vld [vmem:[%s1091_s1 + $0xb8] sm:$0xff]  }
  0x11   : > { %826 = vmatpush3.bf16.msra.mxu1 %v882_v11  ;;  %805 = vmatprep.subr.bf16.mxu0 %v883_v12  ;;  %v903_v32 = vld [vmem:[%s192_s6] ss:$20 sps:$4 sm:$0xff]   ;;  %v905_v33 = vld [vmem:[%s192_s6 + $0x4] ss:$20 sps:$4 sm:$0xff]   ;;  %v906_v35 = vld [vmem:[%s192_s6 + $0x8] ss:$20 sps:$4 sm:$0xff]  }
  0x12   : > { %827 = vmatprep.subr.bf16.mxu1 %v884_v13  ;;  %v908_v36 = vld [vmem:[%s192_s6 + $0xc] ss:$20 sps:$4 sm:$0xff]   ;;  %554 = vmatprep.mubr.bf16.mxu0 %v905_v33  ;;  %v911_v39 = vld [vmem:[%s1091_s1 + $0x110] sm:$0xff]   ;;  %v912_v40 = vld [vmem:[%s1091_s1 + $0x118] sm:$0xff]  }
  0x13   : > { %595 = vmatprep.mubr.bf16.mxu1 %v908_v36  ;;  %v913_v41 = vld [vmem:[%s192_s6 + $0x10] ss:$20 sps:$4 sm:$0xff]  }
  0x14   : > { %806 = vmatpush3.bf16.msra.mxu0 %v885_v14 }
  0x15   : > { %828 = vmatpush3.bf16.msra.mxu1 %v886_v15  ;;  %807 = vmatprep.subr.bf16.mxu0 %v887_v16 }
  0x16   : > { %829 = vmatprep.subr.bf16.mxu1 %v888_v17 }
  0x18   : > { %808 = vmatpush3.bf16.msra.mxu0 %v889_v18 }
  0x19   : > { %830 = vmatpush3.bf16.msra.mxu1 %v890_v19  ;;  %809 = vmatprep.subr.bf16.mxu0 %v891_v20  ;;  %v673_v19 = vlaneseq }
  0x1a   : > { %831 = vmatprep.subr.bf16.mxu1 %v892_v21  ;;  %v645_v21 = vld [vmem:[%s1092_s2] sm:$0x1] }
  0x1b   : > { %v674_v20 = vshrl.u32 %v673_v19, 7 }
  0x1c   : > { %810 = vmatpush3.bf16.msra.mxu0 %v893_v22 }
  0x1d   : > { %832 = vmatpush3.bf16.msra.mxu1 %v894_v23  ;;  %811 = vmatprep.subr.bf16.mxu0 %v895_v24  ;;  %v675_v22 = vsub.s32 0, %v674_v20 }
  0x1e   : > { %833 = vmatprep.subr.bf16.mxu1 %v896_v25  ;;  %v646_v25 = vld [vmem:[%s1093_s3] sm:$0x1] }
  0x20   : > { %812 = vmatpush3.bf16.msra.mxu0 %v897_v26 }
  0x21   : > { %834 = vmatpush3.bf16.msra.mxu1 %v898_v27  ;;  %813 = vmatprep.subr.bf16.mxu0 %v899_v28 }
  0x22   : > { %835 = vmatprep.subr.bf16.mxu1 %v900_v29 }
  0x24   : > { %814 = vmatpush3.bf16.msra.mxu0 %v901_v30 }
  0x25   : > { %836 = vmatpush3.bf16.msra.mxu1 %v902_v31  ;;  %848 = vmatprep.subr.bf16.mxu0 %v924_v34 }
  0x27   : > { %555 = vmatmul.mubr.bf16.vlgmr.msra.gmra.mrb[0].mxu0 %v903_v32 }
  0x28   : > { %596 = vmatmul.mubr.bf16.vlgmr.msra.gmra.mrb[0].mxu1 %v906_v35  ;;  %849 = vmatpush3.bf16.msra.mxu0 %v909_v37 }
  0x29   : > { %850 = vmatprep.subr.bf16.mxu0 %v924_v34  ;;  %856 = vmatprep.mubr.msk.bf16.mxu0 %vm925_vm0, %v924_v34 }
  0x2c   : > { %851 = vmatpush3.bf16.msra.mxu0 %v910_v38 }
  0x2d   : > { %852 = vmatprep.subr.bf16.mxu0 %v924_v34 }
  0x30   : > { %853 = vmatpush3.bf16.msra.mxu0 %v911_v39 }
  0x31   : > { %854 = vmatprep.subr.bf16.mxu0 %v924_v34 }
  0x34   : > { %855 = vmatpush3.bf16.msra.mxu0 %v912_v40 }
  0x37   : > { %857 = vmatmul.mubr.msk.bf16.vlgmr.msra.gmra.mrb[4].mxu0 %vm518_vm1, %v913_v41 }
  0xfa   : > { %v815_v42 = vpop.f32.mrb[0].mxu0 }
  0xfb   : > { %v837_v43 = vpop.f32.mrb[0].mxu1  ;;  %v816_v44 = vpop.f32.mrb[1].mxu0 }
  0xfc   : > { %v817_v45 = vadd.f32 %v816_v44, %v815_v42  ;;  %v838_v46 = vpop.f32.mrb[1].mxu1  ;;  %v818_v47 = vpop.f32.mrb[2].mxu0 }
  0xfd   : > { %v839_v48 = vadd.f32 %v838_v46, %v837_v43  ;;  %v840_v49 = vpop.f32.mrb[2].mxu1  ;;  %v819_v50 = vpop.f32.mrb[3].mxu0 }
  0xfe   : > { %v820_v51 = vadd.f32 %v819_v50, %v818_v47  ;;  %v841_v52 = vpop.f32.mrb[3].mxu1 }
  0xff   : > { %v842_v53 = vadd.f32 %v841_v52, %v840_v49  ;;  %v598_v54 = vadd.f32 %v839_v48, %v817_v45 }
 0x101   : > { %v601_v55 = vadd.f32 %v842_v53, %v820_v51 }
 0x10a   : > { %v638_v56 = vpop.f32.mrb[4].mxu0 }
 0x10b   : > { %v639_v57 = vadd.f32 %v638_v56, %v598_v54  ;;  %v858_v58 = vpop.f32.mrb[5].mxu0 }
 0x10c   : > { %v641_v59 = vpop.f32.mrb[6].mxu0 }
 0x10d   : > { %v642_v60 = vadd.f32 %v641_v59, %v601_v55  ;;  %v859_v61 = vpop.f32.mrb[7].mxu0 }
 0x10f   : > { %v647_v62 = vadd.f32 %v642_v60, %v639_v57 }
 0x111   : > { %v648_v63 = vrot.slane %v647_v62, 4 }
 0x113   : > { %v649_v0 = vadd.f32 %v648_v63, %v647_v62 }
 0x115   : > { %v650_v1 = vrot.slane %v649_v0, 2 }
 0x117   : > { %v651_v2 = vadd.f32 %v650_v1, %v649_v0 }
 0x119   : > { %v652_v3 = vrot.slane %v651_v2, 1 }
 0x11b   : > { %v653_v4 = vadd.f32 %v652_v3, %v651_v2 }
 0x11d   : > { %v655_v5 = vmul.f32 0.0625, %v653_v4 }
 0x11f   : > { %v656_v6 = vsub.f32 %v639_v57, %v655_v5  ;;  %v657_v7 = vsub.f32 %v642_v60, %v655_v5 }
 0x121   : > { %v658_v8 = vmul.f32 %v656_v6, %v656_v6  ;;  %v659_v9 = vmul.f32 %v657_v7, %v657_v7 }
 0x123   : > { %v660_v10 = vadd.f32 %v659_v9, %v658_v8 }
 0x125   : > { %v661_v11 = vrot.slane %v660_v10, 4 }
 0x127   : > { %v662_v12 = vadd.f32 %v661_v11, %v660_v10 }
 0x129   : > { %v663_v13 = vrot.slane %v662_v12, 2 }
 0x12b   : > { %v664_v14 = vadd.f32 %v663_v13, %v662_v12 }
 0x12d   : > { %v665_v15 = vrot.slane %v664_v14, 1 }
 0x12f   : > { %v666_v16 = vadd.f32 %v665_v15, %v664_v14 }
 0x131   : > { %v667_v17 = vmul.f32 0.0625, %v666_v16 }
 0x133   : > { %v668_v18 = vadd.f32 1e-05, %v667_v17 }
 0x135   : > { %914 = vrsqrt.f32 %v668_v18 }
 0x13f   : > { %v915_v23 = vpop.eup %914 }
 0x140   : > { %v670_v24 = vmul.f32 %v915_v23, %v645_v21 }
 0x142   : > { %v671_v26 = vmul.f32 %v670_v24, %v655_v5  ;;  %v676_v27 = vrot.slane %v670_v24, %v675_v22 }
 0x144   : > { %v672_v28 = vsub.f32 %v646_v25, %v671_v26  ;;  %v677_v29 = vmul.f32 %v676_v27, %v639_v57  ;;  %v678_v30 = vmul.f32 %v676_v27, %v642_v60 }
 0x146   : > { %v683_v31 = vrot.slane %v672_v28, %v675_v22 }
 0x148   : > { %v685_v32 = vadd.f32 %v683_v31, %v677_v29  ;;  %v686_v33 = vadd.f32 %v683_v31, %v678_v30 }
 0x14a   : > { %v687_v34 = vmax.f32 %v685_v32, 0.0  ;;  %v688_v35 = vmax.f32 %v686_v33, 0.0 }
 0x14c   : > { %689 = vst [vmem:[%s197_s28] sm:$0xff] %v687_v34  ;;  %690 = vst [vmem:[%s197_s28 + $0x8] sm:$0xff] %v688_v35 }
 0x14d PF: > { %s14_s15 = sadd.s32 1, %s922_s15  }
 0x14e   : > { %p11_p4 = scmp.ge.s32.totalorder %s14_s15, 4  }
 0x150   :  { %13 = sbr.rel (!%p11_p4) target bundleno = 1 (0x1), region = 66 }

// kernel: generator_forward.17
= control target key start
LH: loop header
LB: loop body
LE: loop exit
PB: predicated region body
PF: predicated region fallthrough
CT: control target
= control target key end

     0   :  { %s1411_s15 = smov 0   ;;  %s1687_s0 = inlined_call_operand.vmem [shape: bf16[2,4,16,256], index: 0, kind: input, shape index: {}]   ;;  %s1688_s1 = inlined_call_operand.vmem [shape: bf16[4,256,128], index: 1, kind: input, shape index: {}]   ;;  %s1689_s2 = inlined_call_operand.vmem [shape: f32[1,128], index: 2, kind: input, shape index: {}]   ;;  %s1690_s3 = inlined_call_operand.vmem [shape: f32[1,128], index: 3, kind: input, shape index: {}]   ;;  %s1691_s4 = inlined_call_operand.vmem [shape: f32[2,4,16,128], index: 4, kind: output, shape index: {}]  }
   0x1 LB: > { %s1113_s16 = sadd.s32 4294967295, %s1384_s15   ;;  %p1117_p0 = scmp.ge.s32.totalorder %s1384_s15, 1  ;;  %s1384_s15 = sphi %s1411_s15, %s14_s15  }
   0x2   : > { %p162_p1 = scmp.lt.s32.totalorder %s1384_s15, 3 }
   0x4   : > { %p163_p2 = pnand %p1117_p0, %p162_p1 }
   0x5   : > { %v1300_v0 = vld [vmem:[%s1688_s1 + $0x40] sm:$0xff] (!%p163_p2)   ;;  %v1304_v4 = vld [vmem:[%s1688_s1 + $0x48] sm:$0xff] (!%p163_p2)   ;;  %v1308_v8 = vld [vmem:[%s1688_s1 + $0x50] sm:$0xff] (!%p163_p2)   ;;  %p188_p3 = scmp.lt.s32.totalorder (!%p163_p2), %s1113_s16, 1 }
   0x6   : > { %166 = sbr.rel (%p163_p2) target bundleno = 363 (0x16b), region = 36  ;;  %v1301_v1 = vld [vmem:[%s1688_s1 + $0xc0] sm:$0xff] (!%p163_p2)   ;;  %1204 = vmatprep.subr.bf16.mxu0 (!%p163_p2), %v1300_v0  ;;  %v1305_v5 = vld [vmem:[%s1688_s1 + $0xc8] sm:$0xff] (!%p163_p2)   ;;  %v1309_v9 = vld [vmem:[%s1688_s1 + $0xd0] sm:$0xff] (!%p163_p2)  }
   0x7   : > { %v1302_v2 = vld [vmem:[%s1688_s1] sm:$0xff] (!%p163_p2)   ;;  %1226 = vmatprep.subr.bf16.mxu1 (!%p163_p2), %v1301_v1  ;;  %v1306_v6 = vld [vmem:[%s1688_s1 + $0x8] sm:$0xff] (!%p163_p2)   ;;  %v1310_v10 = vld [vmem:[%s1688_s1 + $0x10] sm:$0xff] (!%p163_p2)  }
   0x8   : > { %v1303_v3 = vld [vmem:[%s1688_s1 + $0x80] sm:$0xff] (!%p163_p2)   ;;  %1205 = vmatpush3.bf16.msra.mxu0 (!%p163_p2), %v1302_v2  ;;  %v1307_v7 = vld [vmem:[%s1688_s1 + $0x88] sm:$0xff] (!%p163_p2)   ;;  %v1311_v11 = vld [vmem:[%s1688_s1 + $0x90] sm:$0xff] (!%p163_p2)  }
   0x9   : > { %1227 = vmatpush3.bf16.msra.mxu1 (!%p163_p2), %v1303_v3  ;;  %1206 = vmatprep.subr.bf16.mxu0 (!%p163_p2), %v1304_v4  ;;  %v1312_v12 = vld [vmem:[%s1688_s1 + $0x58] sm:$0xff] (!%p163_p2)   ;;  %v1316_v16 = vld [vmem:[%s1688_s1 + $0x60] sm:$0xff] (!%p163_p2)   ;;  %v1320_v20 = vld [vmem:[%s1688_s1 + $0x68] sm:$0xff] (!%p163_p2)  }
   0xa   : > { %1228 = vmatprep.subr.bf16.mxu1 (!%p163_p2), %v1305_v5  ;;  %v1313_v13 = vld [vmem:[%s1688_s1 + $0xd8] sm:$0xff] (!%p163_p2)   ;;  %v1317_v17 = vld [vmem:[%s1688_s1 + $0xe0] sm:$0xff] (!%p163_p2)   ;;  %v1321_v21 = vld [vmem:[%s1688_s1 + $0xe8] sm:$0xff] (!%p163_p2)  }
   0xb   : > { %v1314_v14 = vld [vmem:[%s1688_s1 + $0x18] sm:$0xff] (!%p163_p2)   ;;  %v1318_v18 = vld [vmem:[%s1688_s1 + $0x20] sm:$0xff] (!%p163_p2)   ;;  %v1322_v22 = vld [vmem:[%s1688_s1 + $0x28] sm:$0xff] (!%p163_p2)  }
   0xc   : > { %1207 = vmatpush3.bf16.msra.mxu0 (!%p163_p2), %v1306_v6  ;;  %v1315_v15 = vld [vmem:[%s1688_s1 + $0x98] sm:$0xff] (!%p163_p2)   ;;  %v1319_v19 = vld [vmem:[%s1688_s1 + $0xa0] sm:$0xff] (!%p163_p2)   ;;  %v1323_v23 = vld [vmem:[%s1688_s1 + $0xa8] sm:$0xff] (!%p163_p2)  }
   0xd   : > { %1229 = vmatpush3.bf16.msra.mxu1 %v1307_v7  ;;  %1208 = vmatprep.subr.bf16.mxu0 %v1308_v8  ;;  %s1693_s16 = smov (!%p188_p3, %s1113_s16), 1  ;;  %v1324_v24 = vld [vmem:[%s1688_s1 + $0x70] sm:$0xff]   ;;  %v1328_v28 = vld [vmem:[%s1688_s1 + $0x78] sm:$0xff]   ;;  %v1338_v36 = vld [vmem:[%s1688_s1 + $0x140] sm:$0xff]  }
   0xe   : > { %1230 = vmatprep.subr.bf16.mxu1 %v1309_v9  ;;  %v1325_v25 = vld [vmem:[%s1688_s1 + $0xf0] sm:$0xff]   ;;  %s1202_s23 = sshll.u32 %s1693_s16, 6  ;;  %v1329_v29 = vld [vmem:[%s1688_s1 + $0xf8] sm:$0xff]   ;;  %v1339_v37 = vld [vmem:[%s1688_s1 + $0x1c0] sm:$0xff]  }
   0xf   : > { %v1326_v26 = vld [vmem:[%s1688_s1 + $0x30] sm:$0xff]   ;;  %s1521_s6 = scalar_lea.vmem %s1687_s0, %s1202_s23  ;;  %v1330_v30 = vld [vmem:[%s1688_s1 + $0x38] sm:$0xff]   ;;  %v1340_v38 = vld [vmem:[%s1688_s1 + $0x100] sm:$0xff]   ;;  %s197_s14 = scalar_lea.vmem %s1691_s4, %s1202_s23 }
  0x10   : > { %1209 = vmatpush3.bf16.msra.mxu0 %v1310_v10  ;;  %v1327_v27 = vld [vmem:[%s1688_s1 + $0xb0] sm:$0xff]   ;;  %v1331_v31 = vld [vmem:[%s1688_s1 + $0xb8] sm:$0xff]   ;;  %v1332_v32 = vld [vmem:[%s1521_s6] ss:$8 sps:$4 sm:$0xff]  }
  0x11   : > { %1231 = vmatpush3.bf16.msra.mxu1 %v1311_v11  ;;  %1210 = vmatprep.subr.bf16.mxu0 %v1312_v12  ;;  %v1334_v33 = vld [vmem:[%s1521_s6 + $0x4] ss:$8 sps:$4 sm:$0xff]   ;;  %v1335_v34 = vld [vmem:[%s1521_s6 + $0x10] ss:$8 sps:$4 sm:$0xff]   ;;  %v1337_v35 = vld [vmem:[%s1521_s6 + $0x14] ss:$8 sps:$4 sm:$0xff]  }
  0x12   : > { %1232 = vmatprep.subr.bf16.mxu1 %v1313_v13  ;;  %473 = vmatprep.mubr.bf16.mxu0 %v1334_v33  ;;  %v1341_v39 = vld [vmem:[%s1688_s1 + $0x180] sm:$0xff]   ;;  %v1342_v40 = vld [vmem:[%s1688_s1 + $0x148] sm:$0xff]   ;;  %v1346_v44 = vld [vmem:[%s1688_s1 + $0x150] sm:$0xff]  }
  0x13   : > { %620 = vmatprep.mubr.bf16.mxu1 %v1337_v35  ;;  %v1343_v41 = vld [vmem:[%s1688_s1 + $0x1c8] sm:$0xff]   ;;  %v1347_v45 = vld [vmem:[%s1688_s1 + $0x1d0] sm:$0xff]   ;;  %v1350_v48 = vld [vmem:[%s1688_s1 + $0x158] sm:$0xff]  }
  0x14   : > { %1211 = vmatpush3.bf16.msra.mxu0 %v1314_v14  ;;  %v1344_v42 = vld [vmem:[%s1688_s1 + $0x108] sm:$0xff]   ;;  %v1348_v46 = vld [vmem:[%s1688_s1 + $0x110] sm:$0xff]   ;;  %v1351_v49 = vld [vmem:[%s1688_s1 + $0x1d8] sm:$0xff]  }
  0x15   : > { %1233 = vmatpush3.bf16.msra.mxu1 %v1315_v15  ;;  %1212 = vmatprep.subr.bf16.mxu0 %v1316_v16  ;;  %v1345_v43 = vld [vmem:[%s1688_s1 + $0x188] sm:$0xff]   ;;  %v1349_v47 = vld [vmem:[%s1688_s1 + $0x190] sm:$0xff]   ;;  %v1352_v50 = vld [vmem:[%s1688_s1 + $0x118] sm:$0xff]  }
  0x16   : > { %1234 = vmatprep.subr.bf16.mxu1 %v1317_v17  ;;  %v1353_v51 = vld [vmem:[%s1688_s1 + $0x198] sm:$0xff]   ;;  %v1354_v52 = vld [vmem:[%s1688_s1 + $0x160] sm:$0xff]   ;;  %v1358_v56 = vld [vmem:[%s1688_s1 + $0x168] sm:$0xff]  }
  0x17   : > { %v1355_v53 = vld [vmem:[%s1688_s1 + $0x1e0] sm:$0xff]   ;;  %v1359_v57 = vld [vmem:[%s1688_s1 + $0x1e8] sm:$0xff]   ;;  %v1362_v60 = vld [vmem:[%s1688_s1 + $0x170] sm:$0xff]  }
  0x18   : > { %1213 = vmatpush3.bf16.msra.mxu0 %v1318_v18  ;;  %v1356_v54 = vld [vmem:[%s1688_s1 + $0x120] sm:$0xff]   ;;  %v1360_v58 = vld [vmem:[%s1688_s1 + $0x128] sm:$0xff]   ;;  %v1363_v61 = vld [vmem:[%s1688_s1 + $0x1f0] sm:$0xff]  }
  0x19   : > { %1235 = vmatpush3.bf16.msra.mxu1 %v1319_v19  ;;  %1214 = vmatprep.subr.bf16.mxu0 %v1320_v20  ;;  %v1357_v55 = vld [vmem:[%s1688_s1 + $0x1a0] sm:$0xff]   ;;  %v1361_v59 = vld [vmem:[%s1688_s1 + $0x1a8] sm:$0xff]   ;;  %v1364_v62 = vld [vmem:[%s1688_s1 + $0x130] sm:$0xff]  }
  0x1a   : > { %1236 = vmatprep.subr.bf16.mxu1 %v1321_v21  ;;  %v1365_v63 = vld [vmem:[%s1688_s1 + $0x1b0] sm:$0xff]   ;;  %v1366_v0 = vld [vmem:[%s1688_s1 + $0x178] sm:$0xff]   ;;  %v1370_v4 = vld [vmem:[%s1521_s6 + $0x20] ss:$8 sps:$4 sm:$0xff]  }
  0x1b   : > { %v1367_v1 = vld [vmem:[%s1688_s1 + $0x1f8] sm:$0xff]   ;;  %v1372_v5 = vld [vmem:[%s1521_s6 + $0x24] ss:$8 sps:$4 sm:$0xff]  }
  0x1c   : > { %1215 = vmatpush3.bf16.msra.mxu0 %v1322_v22  ;;  %v1368_v2 = vld [vmem:[%s1688_s1 + $0x138] sm:$0xff]  }
  0x1d   : > { %1237 = vmatpush3.bf16.msra.mxu1 %v1323_v23  ;;  %1216 = vmatprep.subr.bf16.mxu0 %v1324_v24  ;;  %v1369_v3 = vld [vmem:[%s1688_s1 + $0x1b8] sm:$0xff]  }
  0x1e   : > { %1238 = vmatprep.subr.bf16.mxu1 %v1325_v25  ;;  %v1373_v6 = vld [vmem:[%s1521_s6 + $0x30] ss:$8 sps:$4 sm:$0xff]   ;;  %v1375_v7 = vld [vmem:[%s1521_s6 + $0x34] ss:$8 sps:$4 sm:$0xff]  }
  0x20   : > { %1217 = vmatpush3.bf16.msra.mxu0 %v1326_v26 }
  0x21   : > { %1239 = vmatpush3.bf16.msra.mxu1 %v1327_v27  ;;  %1218 = vmatprep.subr.bf16.mxu0 %v1328_v28 }
  0x22   : > { %1240 = vmatprep.subr.bf16.mxu1 %v1329_v29 }
  0x24   : > { %1219 = vmatpush3.bf16.msra.mxu0 %v1330_v30 }
  0x25   : > { %1241 = vmatpush3.bf16.msra.mxu1 %v1331_v31  ;;  %1248 = vmatprep.subr.bf16.mxu0 %v1338_v36 }
  0x26   : > { %1270 = vmatprep.subr.bf16.mxu1 %v1339_v37 }
  0x27   : > { %474 = vmatmul.mubr.bf16.vlgmr.msra.gmra.mrb[0].mxu0 %v1332_v32 }
  0x28   : > { %621 = vmatmul.mubr.bf16.vlgmr.msra.gmra.mrb[0].mxu1 %v1335_v34  ;;  %1249 = vmatpush3.bf16.msra.mxu0 %v1340_v38 }
  0x29   : > { %1271 = vmatpush3.bf16.msra.mxu1 %v1341_v39  ;;  %1250 = vmatprep.subr.bf16.mxu0 %v1342_v40 }
  0x2a   : > { %1272 = vmatprep.subr.bf16.mxu1 %v1343_v41  ;;  %767 = vmatprep.mubr.bf16.mxu0 %v1372_v5 }
  0x2b   : > { %914 = vmatprep.mubr.bf16.mxu1 %v1375_v7 }
  0x2c   : > { %1251 = vmatpush3.bf16.msra.mxu0 %v1344_v42 }
  0x2d   : > { %1273 = vmatpush3.bf16.msra.mxu1 %v1345_v43  ;;  %1252 = vmatprep.subr.bf16.mxu0 %v1346_v44 }
  0x2e   : > { %1274 = vmatprep.subr.bf16.mxu1 %v1347_v45 }
  0x30   : > { %1253 = vmatpush3.bf16.msra.mxu0 %v1348_v46 }
  0x31   : > { %1275 = vmatpush3.bf16.msra.mxu1 %v1349_v47  ;;  %1254 = vmatprep.subr.bf16.mxu0 %v1350_v48 }
  0x32   : > { %1276 = vmatprep.subr.bf16.mxu1 %v1351_v49 }
  0x34   : > { %1255 = vmatpush3.bf16.msra.mxu0 %v1352_v50 }
  0x35   : > { %1277 = vmatpush3.bf16.msra.mxu1 %v1353_v51  ;;  %1256 = vmatprep.subr.bf16.mxu0 %v1354_v52 }
  0x36   : > { %1278 = vmatprep.subr.bf16.mxu1 %v1355_v53 }
  0x38   : > { %1257 = vmatpush3.bf16.msra.mxu0 %v1356_v54 }
  0x39   : > { %1279 = vmatpush3.bf16.msra.mxu1 %v1357_v55  ;;  %1258 = vmatprep.subr.bf16.mxu0 %v1358_v56 }
  0x3a   : > { %1280 = vmatprep.subr.bf16.mxu1 %v1359_v57 }
  0x3c   : > { %1259 = vmatpush3.bf16.msra.mxu0 %v1360_v58 }
  0x3d   : > { %1281 = vmatpush3.bf16.msra.mxu1 %v1361_v59  ;;  %1260 = vmatprep.subr.bf16.mxu0 %v1362_v60 }
  0x3e   : > { %1282 = vmatprep.subr.bf16.mxu1 %v1363_v61 }
  0x40   : > { %1261 = vmatpush3.bf16.msra.mxu0 %v1364_v62 }
  0x41   : > { %1283 = vmatpush3.bf16.msra.mxu1 %v1365_v63  ;;  %1262 = vmatprep.subr.bf16.mxu0 %v1366_v0 }
  0x42   : > { %1284 = vmatprep.subr.bf16.mxu1 %v1367_v1 }
  0x44   : > { %1263 = vmatpush3.bf16.msra.mxu0 %v1368_v2 }
  0x45   : > { %1285 = vmatpush3.bf16.msra.mxu1 %v1369_v3 }
  0x47   : > { %768 = vmatmul.mubr.bf16.vlgmr.msra.gmra.mrb[4].mxu0 %v1370_v4 }
  0x48   : > { %915 = vmatmul.mubr.bf16.vlgmr.msra.gmra.mrb[4].mxu1 %v1373_v6 }
  0xfa   : > { %v1220_v8 = vpop.f32.mrb[0].mxu0 }
  0xfb   : > { %v1242_v9 = vpop.f32.mrb[0].mxu1  ;;  %v1221_v10 = vpop.f32.mrb[1].mxu0 }
  0xfc   : > { %v1633_v11 = vadd.f32 %v1221_v10, %v1220_v8  ;;  %v1243_v12 = vpop.f32.mrb[1].mxu1  ;;  %v1223_v13 = vpop.f32.mrb[2].mxu0 }
  0xfd   : > { %v1635_v14 = vadd.f32 %v1243_v12, %v1242_v9  ;;  %v1245_v15 = vpop.f32.mrb[2].mxu1  ;;  %v1224_v16 = vpop.f32.mrb[3].mxu0 }
  0xfe   : > { %v1637_v17 = vadd.f32 %v1224_v16, %v1223_v13  ;;  %v1246_v18 = vpop.f32.mrb[3].mxu1 }
  0xff   : > { %v1639_v19 = vadd.f32 %v1246_v18, %v1245_v15 }
 0x100   : > { %v923_v20 = vadd.f32 %v1637_v17, %v1633_v11 }
 0x101   : > { %v931_v21 = vadd.f32 %v1639_v19, %v1635_v14 }
 0x102   : > { %v924_v22 = vrot.slane %v923_v20, 4 }
 0x103   : > { %v932_v23 = vrot.slane %v931_v21, 4 }
 0x104   : > { %v925_v24 = vadd.f32 %v924_v22, %v923_v20 }
 0x105   : > { %v933_v25 = vadd.f32 %v932_v23, %v931_v21 }
 0x106   : > { %v926_v28 = vrot.slane %v925_v24, 2 }
 0x107   : > { %v934_v29 = vrot.slane %v933_v25, 2 }
 0x108   : > { %v927_v39 = vadd.f32 %v926_v28, %v925_v24 }
 0x109   : > { %v935_v40 = vadd.f32 %v934_v29, %v933_v25 }
 0x10a   : > { %v928_v45 = vrot.slane %v927_v39, 1 }
 0x10b   : > { %v936_v46 = vrot.slane %v935_v40, 1 }
 0x10c   : > { %v929_v51 = vadd.f32 %v928_v45, %v927_v39 }
 0x10d   : > { %v937_v52 = vadd.f32 %v936_v46, %v935_v40 }
 0x10f   : > { %v938_v57 = vadd.f32 %v937_v52, %v929_v51 }
 0x11a   : > { %v1264_v26 = vpop.f32.mrb[4].mxu0 }
 0x11b   : > { %v1265_v27 = vpop.f32.mrb[5].mxu0  ;;  %v1286_v30 = vpop.f32.mrb[4].mxu1 }
 0x11c   : > { %v1645_v31 = vadd.f32 %v1265_v27, %v1264_v26  ;;  %v1267_v32 = vpop.f32.mrb[6].mxu0  ;;  %v1287_v33 = vpop.f32.mrb[5].mxu1 }
 0x11d   : > { %v1268_v34 = vpop.f32.mrb[7].mxu0  ;;  %v1647_v35 = vadd.f32 %v1287_v33, %v1286_v30  ;;  %v1289_v36 = vpop.f32.mrb[6].mxu1 }
 0x11e   : > { %v1649_v37 = vadd.f32 %v1268_v34, %v1267_v32  ;;  %v1290_v38 = vpop.f32.mrb[7].mxu1 }
 0x11f   : > { %v1653_v42 = vadd.f32 %v1290_v38, %v1289_v36 }
 0x120   : > { %v939_v41 = vadd.f32 %v1649_v37, %v1645_v31 }
 0x121   : > { %v947_v44 = vadd.f32 %v1653_v42, %v1647_v35 }
 0x122   : > { %v940_v43 = vrot.slane %v939_v41, 4 }
 0x123   : > { %v948_v48 = vrot.slane %v947_v44, 4 }
 0x124   : > { %v941_v47 = vadd.f32 %v940_v43, %v939_v41 }
 0x125   : > { %v949_v50 = vadd.f32 %v948_v48, %v947_v44 }
 0x126   : > { %v942_v49 = vrot.slane %v941_v47, 2 }
 0x127   : > { %v950_v54 = vrot.slane %v949_v50, 2 }
 0x128   : > { %v943_v53 = vadd.f32 %v942_v49, %v941_v47 }
 0x129   : > { %v951_v56 = vadd.f32 %v950_v54, %v949_v50 }
 0x12a   : > { %v944_v55 = vrot.slane %v943_v53, 1 }
 0x12b   : > { %v952_v59 = vrot.slane %v951_v56, 1 }
 0x12c   : > { %v945_v58 = vadd.f32 %v944_v55, %v943_v53 }
 0x12d   : > { %v953_v61 = vadd.f32 %v952_v59, %v951_v56  ;;  %v1008_v59 = vld [vmem:[%s1689_s2] sm:$0x1] }
 0x12e   : > { %v946_v60 = vadd.f32 %v945_v58, %v938_v57  ;;  %v1013_v57 = vlaneseq }
 0x130   : > { %v954_v62 = vadd.f32 %v953_v61, %v946_v60  ;;  %v1014_v58 = vshrl.u32 %v1013_v57, 7 }
 0x132   : > { %v956_v63 = vmul.f32 0.015625, %v954_v62  ;;  %v1015_v60 = vsub.s32 0, %v1014_v58 }
 0x134   : > { %v957_v0 = vsub.f32 %v1633_v11, %v956_v63  ;;  %v958_v1 = vsub.f32 %v1637_v17, %v956_v63  ;;  %v969_v2 = vsub.f32 %v1635_v14, %v956_v63  ;;  %v970_v3 = vsub.f32 %v1639_v19, %v956_v63 }
 0x135   : > { %v981_v4 = vsub.f32 %v1645_v31, %v956_v63  ;;  %v982_v5 = vsub.f32 %v1649_v37, %v956_v63  ;;  %v993_v6 = vsub.f32 %v1647_v35, %v956_v63  ;;  %v994_v7 = vsub.f32 %v1653_v42, %v956_v63 }
 0x136   : > { %v959_v8 = vmul.f32 %v957_v0, %v957_v0  ;;  %v960_v9 = vmul.f32 %v958_v1, %v958_v1  ;;  %v971_v10 = vmul.f32 %v969_v2, %v969_v2  ;;  %v972_v12 = vmul.f32 %v970_v3, %v970_v3  ;;  %v1010_v0 = vld [vmem:[%s1690_s3] sm:$0x1] }
 0x137   : > { %v983_v13 = vmul.f32 %v981_v4, %v981_v4  ;;  %v984_v15 = vmul.f32 %v982_v5, %v982_v5  ;;  %v995_v16 = vmul.f32 %v993_v6, %v993_v6  ;;  %v996_v18 = vmul.f32 %v994_v7, %v994_v7 }
 0x138   : > { %v961_v20 = vadd.f32 %v960_v9, %v959_v8  ;;  %v973_v21 = vadd.f32 %v972_v12, %v971_v10 }
 0x139   : > { %v985_v22 = vadd.f32 %v984_v15, %v983_v13  ;;  %v997_v23 = vadd.f32 %v996_v18, %v995_v16 }
 0x13a   : > { %v962_v24 = vrot.slane %v961_v20, 4  ;;  %v974_v25 = vrot.slane %v973_v21, 4 }
 0x13b   : > { %v986_v26 = vrot.slane %v985_v22, 4  ;;  %v998_v27 = vrot.slane %v997_v23, 4 }
 0x13c   : > { %v963_v28 = vadd.f32 %v962_v24, %v961_v20  ;;  %v975_v29 = vadd.f32 %v974_v25, %v973_v21 }
 0x13d   : > { %v987_v30 = vadd.f32 %v986_v26, %v985_v22  ;;  %v999_v32 = vadd.f32 %v998_v27, %v997_v23 }
 0x13e   : > { %v964_v33 = vrot.slane %v963_v28, 2  ;;  %v976_v34 = vrot.slane %v975_v29, 2 }
 0x13f   : > { %v988_v36 = vrot.slane %v987_v30, 2  ;;  %v1000_v38 = vrot.slane %v999_v32, 2 }
 0x140   : > { %v965_v39 = vadd.f32 %v964_v33, %v963_v28  ;;  %v977_v40 = vadd.f32 %v976_v34, %v975_v29 }
 0x141   : > { %v989_v41 = vadd.f32 %v988_v36, %v987_v30  ;;  %v1001_v43 = vadd.f32 %v1000_v38, %v999_v32 }
 0x142   : > { %v966_v44 = vrot.slane %v965_v39, 1  ;;  %v978_v45 = vrot.slane %v977_v40, 1 }
 0x143   : > { %v990_v46 = vrot.slane %v989_v41, 1  ;;  %v1002_v49 = vrot.slane %v1001_v43, 1 }
 0x144   : > { %v967_v47 = vadd.f32 %v966_v44, %v965_v39  ;;  %v979_v48 = vadd.f32 %v978_v45, %v977_v40 }
 0x145   : > { %v991_v51 = vadd.f32 %v990_v46, %v989_v41  ;;  %v1003_v53 = vadd.f32 %v1002_v49, %v1001_v43 }
 0x146   : > { %v980_v50 = vadd.f32 %v979_v48, %v967_v47 }
 0x148   : > { %v992_v52 = vadd.f32 %v991_v51, %v980_v50 }
 0x14a   : > { %v1004_v54 = vadd.f32 %v1003_v53, %v992_v52 }
 0x14c   : > { %v1005_v55 = vmul.f32 0.015625, %v1004_v54 }
 0x14e   : > { %v1006_v56 = vadd.f32 1e-05, %v1005_v55 }
 0x150   : > { %1376 = vrsqrt.f32 %v1006_v56 }
 0x15a   : > { %v1377_v61 = vpop.eup %1376 }
 0x15b   : > { %v1009_v62 = vmul.f32 %v1377_v61, %v1008_v59 }
 0x15d   : > { %v1011_v1 = vmul.f32 %v1009_v62, %v956_v63  ;;  %v1016_v2 = vrot.slane %v1009_v62, %v1015_v60 }
 0x15f   : > { %v1012_v3 = vsub.f32 %v1010_v0, %v1011_v1  ;;  %v1017_v4 = vmul.f32 %v1633_v11, %v1016_v2  ;;  %v1018_v5 = vmul.f32 %v1637_v17, %v1016_v2  ;;  %v1040_v6 = vmul.f32 %v1645_v31, %v1016_v2 }
 0x160   : > { %v1041_v7 = vmul.f32 %v1649_v37, %v1016_v2  ;;  %v1049_v8 = vmul.f32 %v1647_v35, %v1016_v2  ;;  %v1031_v10 = vmul.f32 %v1635_v14, %v1016_v2  ;;  %v1032_v12 = vmul.f32 %v1639_v19, %v1016_v2 }
 0x161   : > { %v1023_v9 = vrot.slane %v1012_v3, %v1015_v60  ;;  %v1050_v63 = vmul.f32 %v1653_v42, %v1016_v2 }
 0x163   : > { %v1025_v13 = vadd.f32 %v1023_v9, %v1017_v4  ;;  %v1026_v15 = vadd.f32 %v1023_v9, %v1018_v5  ;;  %v1033_v16 = vadd.f32 %v1031_v10, %v1023_v9  ;;  %v1034_v18 = vadd.f32 %v1032_v12, %v1023_v9 }
 0x164   : > { %v1042_v11 = vadd.f32 %v1040_v6, %v1023_v9  ;;  %v1043_v17 = vadd.f32 %v1041_v7, %v1023_v9  ;;  %v1051_v31 = vadd.f32 %v1049_v8, %v1023_v9  ;;  %v1052_v35 = vadd.f32 %v1050_v63, %v1023_v9 }
 0x165   : > { %v1027_v37 = vmax.f32 %v1025_v13, 0.0  ;;  %v1028_v20 = vmax.f32 %v1026_v15, 0.0  ;;  %v1035_v14 = vmax.f32 %v1033_v16, 0.0  ;;  %v1036_v21 = vmax.f32 %v1034_v18, 0.0 }
 0x166   : > { %v1044_v19 = vmax.f32 %v1042_v11, 0.0  ;;  %v1045_v22 = vmax.f32 %v1043_v17, 0.0  ;;  %v1053_v42 = vmax.f32 %v1051_v31, 0.0  ;;  %v1054_v23 = vmax.f32 %v1052_v35, 0.0 }
 0x167   : > { %1029 = vst [vmem:[%s197_s14] sm:$0xff] %v1027_v37  ;;  %1030 = vst [vmem:[%s197_s14 + $0x8] sm:$0xff] %v1028_v20 }
 0x168   : > { %1194 = vst [vmem:[%s197_s14 + $0x10] sm:$0xff] %v1035_v14  ;;  %1195 = vst [vmem:[%s197_s14 + $0x18] sm:$0xff] %v1036_v21 }
 0x169   : > { %1196 = vst [vmem:[%s197_s14 + $0x20] sm:$0xff] %v1044_v19  ;;  %1197 = vst [vmem:[%s197_s14 + $0x28] sm:$0xff] %v1045_v22 }
 0x16a   : > { %1198 = vst [vmem:[%s197_s14 + $0x30] sm:$0xff] %v1053_v42  ;;  %1199 = vst [vmem:[%s197_s14 + $0x38] sm:$0xff] %v1054_v23 }
 0x16b PF: > { %s14_s15 = sadd.s32 1, %s1384_s15  }
 0x16c   : > { %p11_p4 = scmp.ge.s32.totalorder %s14_s15, 4  }
 0x16e   :  { %13 = sbr.rel (!%p11_p4) target bundleno = 1 (0x1), region = 69 }

// kernel: generator_forward.18
= control target key start
LH: loop header
LB: loop body
LE: loop exit
PB: predicated region body
PF: predicated region fallthrough
CT: control target
= control target key end

     0   :  { %s1545_s15 = smov 0   ;;  %s1983_s0 = inlined_call_operand.vmem [shape: bf16[2,4,64,128], index: 0, kind: input, shape index: {}]   ;;  %s1984_s1 = inlined_call_operand.vmem [shape: bf16[4,128,128], index: 1, kind: input, shape index: {}]   ;;  %s1985_s2 = inlined_call_operand.vmem [shape: f32[1,128], index: 2, kind: input, shape index: {}]   ;;  %s1986_s3 = inlined_call_operand.vmem [shape: f32[1,128], index: 3, kind: input, shape index: {}]   ;;  %s1987_s4 = inlined_call_operand.vmem [shape: f32[2,4,64,128], index: 4, kind: output, shape index: {}]  }
   0x1 LB: > { %s1225_s16 = sadd.s32 4294967295, %s1518_s15   ;;  %p1229_p0 = scmp.ge.s32.totalorder %s1518_s15, 1  ;;  %s1518_s15 = sphi %s1545_s15, %s14_s15  }
   0x2   : > { %p162_p1 = scmp.lt.s32.totalorder %s1518_s15, 3 }
   0x4   : > { %p163_p2 = pnand %p1229_p0, %p162_p1 }
   0x6   : > { %166 = sbr.rel (%p163_p2) target bundleno = 420 (0x1a4), region = 36 }
   0xd   : > { %v1462_v0 = vld [vmem:[%s1984_s1] sm:$0xff]   ;;  %v1464_v2 = vld [vmem:[%s1984_s1 + $0x8] sm:$0xff]   ;;  %p188_p3 = scmp.lt.s32.totalorder %s1225_s16, 1  ;;  %v1466_v4 = vld [vmem:[%s1984_s1 + $0x10] sm:$0xff]  }
   0xe   : > { %v1463_v1 = vld [vmem:[%s1984_s1 + $0x40] sm:$0xff]   ;;  %1358 = vmatprep.subr.bf16.mxu0 %v1462_v0  ;;  %v1465_v3 = vld [vmem:[%s1984_s1 + $0x48] sm:$0xff]   ;;  %v1467_v5 = vld [vmem:[%s1984_s1 + $0x50] sm:$0xff]  }
   0xf   : > { %1382 = vmatprep.subr.bf16.mxu1 %v1463_v1  ;;  %1359 = vmatpush3.bf16.msra.mxu0 %v1462_v0  ;;  %s2013_s16 = smov (!%p188_p3, %s1225_s16), 1  ;;  %v1468_v6 = vld [vmem:[%s1984_s1 + $0x18] sm:$0xff]   ;;  %v1470_v8 = vld [vmem:[%s1984_s1 + $0x20] sm:$0xff]   ;;  %v1472_v10 = vld [vmem:[%s1984_s1 + $0x28] sm:$0xff]  }
  0x10   : > { %1383 = vmatpush3.bf16.msra.mxu1 %v1463_v1  ;;  %1360 = vmatprep.subr.bf16.mxu0 %v1464_v2  ;;  %v1469_v7 = vld [vmem:[%s1984_s1 + $0x58] sm:$0xff]   ;;  %s1308_s7 = sshll.u32 %s2013_s16, 7  ;;  %v1471_v9 = vld [vmem:[%s1984_s1 + $0x60] sm:$0xff]   ;;  %v1473_v11 = vld [vmem:[%s1984_s1 + $0x68] sm:$0xff]   ;;  %s1309_s18 = sshll.u32 %s2013_s16, 8 }
  0x11   : > { %1384 = vmatprep.subr.bf16.mxu1 %v1465_v3  ;;  %s1589_s14 = scalar_lea.vmem %s1983_s0, %s1308_s7  ;;  %v1474_v14 = vld [vmem:[%s1984_s1 + $0x30] sm:$0xff]   ;;  %v1476_v16 = vld [vmem:[%s1984_s1 + $0x38] sm:$0xff]   ;;  %v1482_v19 = vld [vmem:[%s1984_s1 + $0x80] sm:$0xff]   ;;  %s1882_s20 = scalar_lea.vmem %s1987_s4, %s1309_s18 }
  0x12   : > { %v1478_v12 = vld [vmem:[%s1589_s14] sm:$0xff]   ;;  %v1475_v15 = vld [vmem:[%s1984_s1 + $0x70] sm:$0xff]   ;;  %v1477_v17 = vld [vmem:[%s1984_s1 + $0x78] sm:$0xff]  }
  0x13   : > { %1361 = vmatpush3.bf16.msra.mxu0 %v1464_v2  ;;  %v1479_v13 = vld [vmem:[%s1589_s14 + $0x20] sm:$0xff]   ;;  %1374 = vmatprep.mubr.bf16.mxu0 %v1478_v12  ;;  %v1480_v18 = vld [vmem:[%s1589_s14 + $0x8] sm:$0xff]   ;;  %v1486_v24 = vld [vmem:[%s1589_s14 + $0x10] sm:$0xff]  }
  0x14   : > { %1385 = vmatpush3.bf16.msra.mxu1 %v1465_v3  ;;  %1362 = vmatprep.subr.bf16.mxu0 %v1466_v4  ;;  %v1483_v20 = vld [vmem:[%s1984_s1 + $0xc0] sm:$0xff]   ;;  %v1481_v21 = vld [vmem:[%s1589_s14 + $0x28] sm:$0xff]   ;;  %v1487_v25 = vld [vmem:[%s1589_s14 + $0x30] sm:$0xff]  }
  0x15   : > { %1386 = vmatprep.subr.bf16.mxu1 %v1467_v5  ;;  %1398 = vmatprep.mubr.bf16.mxu1 %v1479_v13  ;;  %v1484_v22 = vld [vmem:[%s1984_s1 + $0x88] sm:$0xff]   ;;  %v1488_v26 = vld [vmem:[%s1589_s14 + $0x18] sm:$0xff]   ;;  %v1490_v27 = vld [vmem:[%s1984_s1 + $0x90] sm:$0xff]  }
  0x16   : > { %v1485_v23 = vld [vmem:[%s1984_s1 + $0xc8] sm:$0xff]   ;;  %v1491_v28 = vld [vmem:[%s1984_s1 + $0xd0] sm:$0xff]   ;;  %v1489_v29 = vld [vmem:[%s1589_s14 + $0x38] sm:$0xff]  }
  0x17   : > { %1363 = vmatpush3.bf16.msra.mxu0 %v1466_v4  ;;  %v1492_v30 = vld [vmem:[%s1984_s1 + $0x98] sm:$0xff]   ;;  %v1502_v32 = vld [vmem:[%s1589_s14 + $0x40] sm:$0xff]   ;;  %v1496_v36 = vld [vmem:[%s1984_s1 + $0xa8] sm:$0xff]  }
  0x18   : > { %1387 = vmatpush3.bf16.msra.mxu1 %v1467_v5  ;;  %1364 = vmatprep.subr.bf16.mxu0 %v1468_v6  ;;  %v1493_v31 = vld [vmem:[%s1984_s1 + $0xd8] sm:$0xff]   ;;  %v1503_v33 = vld [vmem:[%s1589_s14 + $0x60] sm:$0xff]   ;;  %v1497_v37 = vld [vmem:[%s1984_s1 + $0xe8] sm:$0xff]  }
  0x19   : > { %1388 = vmatprep.subr.bf16.mxu1 %v1469_v7  ;;  %v1494_v34 = vld [vmem:[%s1984_s1 + $0xa0] sm:$0xff]   ;;  %v1498_v38 = vld [vmem:[%s1984_s1 + $0xb0] sm:$0xff]   ;;  %v1500_v40 = vld [vmem:[%s1984_s1 + $0xb8] sm:$0xff]  }
  0x1a   : > { %v1495_v35 = vld [vmem:[%s1984_s1 + $0xe0] sm:$0xff]   ;;  %v1499_v39 = vld [vmem:[%s1984_s1 + $0xf0] sm:$0xff]   ;;  %v1501_v41 = vld [vmem:[%s1984_s1 + $0xf8] sm:$0xff]  }
  0x1b   : > { %1365 = vmatpush3.bf16.msra.mxu0 %v1468_v6  ;;  %v1504_v42 = vld [vmem:[%s1589_s14 + $0x48] sm:$0xff]   ;;  %v1506_v44 = vld [vmem:[%s1589_s14 + $0x50] sm:$0xff]   ;;  %v1508_v46 = vld [vmem:[%s1589_s14 + $0x58] sm:$0xff]  }
  0x1c   : > { %1389 = vmatpush3.bf16.msra.mxu1 %v1469_v7  ;;  %1366 = vmatprep.subr.bf16.mxu0 %v1470_v8  ;;  %v1505_v43 = vld [vmem:[%s1589_s14 + $0x68] sm:$0xff]   ;;  %v1507_v45 = vld [vmem:[%s1589_s14 + $0x70] sm:$0xff]   ;;  %v1509_v47 = vld [vmem:[%s1589_s14 + $0x78] sm:$0xff]  }
  0x1d   : > { %1390 = vmatprep.subr.bf16.mxu1 %v1471_v9 }
  0x1f   : > { %1367 = vmatpush3.bf16.msra.mxu0 %v1470_v8 }
  0x20   : > { %1391 = vmatpush3.bf16.msra.mxu1 %v1471_v9  ;;  %1368 = vmatprep.subr.bf16.mxu0 %v1472_v10 }
  0x21   : > { %1392 = vmatprep.subr.bf16.mxu1 %v1473_v11 }
  0x23   : > { %1369 = vmatpush3.bf16.msra.mxu0 %v1472_v10 }
  0x24   : > { %1393 = vmatpush3.bf16.msra.mxu1 %v1473_v11  ;;  %1370 = vmatprep.subr.bf16.mxu0 %v1474_v14 }
  0x25   : > { %1394 = vmatprep.subr.bf16.mxu1 %v1475_v15 }
  0x27   : > { %1371 = vmatpush3.bf16.msra.mxu0 %v1474_v14 }
  0x28   : > { %1395 = vmatpush3.bf16.msra.mxu1 %v1475_v15  ;;  %1372 = vmatprep.subr.bf16.mxu0 %v1476_v16 }
  0x29   : > { %1396 = vmatprep.subr.bf16.mxu1 %v1477_v17 }
  0x2b   : > { %1373 = vmatpush3.bf16.msra.mxu0 %v1476_v16 }
  0x2c   : > { %1397 = vmatpush3.bf16.msra.mxu1 %v1477_v17  ;;  %1406 = vmatprep.subr.bf16.mxu0 %v1482_v19 }
  0x2d   : > { %1430 = vmatprep.subr.bf16.mxu1 %v1483_v20 }
  0x2e   : > { %1375 = vmatmul.mubr.bf16.vlgmr.msra.gmra.mrb[0].mxu0 %v1480_v18 }
  0x2f   : > { %1399 = vmatmul.mubr.bf16.vlgmr.msra.gmra.mrb[0].mxu1 %v1481_v21  ;;  %1407 = vmatpush3.bf16.msra.mxu0 %v1482_v19 }
  0x30   : > { %1431 = vmatpush3.bf16.msra.mxu1 %v1483_v20  ;;  %1408 = vmatprep.subr.bf16.mxu0 %v1484_v22 }
  0x31   : > { %1432 = vmatprep.subr.bf16.mxu1 %v1485_v23  ;;  %1378 = vmatprep.mubr.bf16.mxu0 %v1486_v24 }
  0x32   : > { %1402 = vmatprep.mubr.bf16.mxu1 %v1487_v25 }
  0x33   : > { %1409 = vmatpush3.bf16.msra.mxu0 %v1484_v22 }
  0x34   : > { %1433 = vmatpush3.bf16.msra.mxu1 %v1485_v23  ;;  %1410 = vmatprep.subr.bf16.mxu0 %v1490_v27 }
  0x35   : > { %1434 = vmatprep.subr.bf16.mxu1 %v1491_v28 }
  0x36   : > { %1379 = vmatmul.mubr.bf16.gmra.mrb[4].mxu0 %v1488_v26 }
  0x37   : > { %1403 = vmatmul.mubr.bf16.gmra.mrb[4].mxu1 %v1489_v29  ;;  %1411 = vmatpush3.bf16.msra.mxu0 %v1490_v27 }
  0x38   : > { %1435 = vmatpush3.bf16.msra.mxu1 %v1491_v28  ;;  %1412 = vmatprep.subr.bf16.mxu0 %v1492_v30 }
  0x39   : > { %1436 = vmatprep.subr.bf16.mxu1 %v1493_v31  ;;  %1422 = vmatprep.mubr.bf16.mxu0 %v1502_v32 }
  0x3a   : > { %1446 = vmatprep.mubr.bf16.mxu1 %v1503_v33 }
  0x3b   : > { %1413 = vmatpush3.bf16.msra.mxu0 %v1492_v30 }
  0x3c   : > { %1437 = vmatpush3.bf16.msra.mxu1 %v1493_v31  ;;  %1414 = vmatprep.subr.bf16.mxu0 %v1494_v34 }
  0x3d   : > { %1438 = vmatprep.subr.bf16.mxu1 %v1495_v35 }
  0x3f   : > { %1415 = vmatpush3.bf16.msra.mxu0 %v1494_v34 }
  0x40   : > { %1439 = vmatpush3.bf16.msra.mxu1 %v1495_v35  ;;  %1416 = vmatprep.subr.bf16.mxu0 %v1496_v36 }
  0x41   : > { %1440 = vmatprep.subr.bf16.mxu1 %v1497_v37 }
  0x43   : > { %1417 = vmatpush3.bf16.msra.mxu0 %v1496_v36 }
  0x44   : > { %1441 = vmatpush3.bf16.msra.mxu1 %v1497_v37  ;;  %1418 = vmatprep.subr.bf16.mxu0 %v1498_v38 }
  0x45   : > { %1442 = vmatprep.subr.bf16.mxu1 %v1499_v39 }
  0x47   : > { %1419 = vmatpush3.bf16.msra.mxu0 %v1498_v38 }
  0x48   : > { %1443 = vmatpush3.bf16.msra.mxu1 %v1499_v39  ;;  %1420 = vmatprep.subr.bf16.mxu0 %v1500_v40 }
  0x49   : > { %1444 = vmatprep.subr.bf16.mxu1 %v1501_v41 }
  0x4b   : > { %1421 = vmatpush3.bf16.msra.mxu0 %v1500_v40 }
  0x4c   : > { %1445 = vmatpush3.bf16.msra.mxu1 %v1501_v41 }
  0x4e   : > { %1423 = vmatmul.mubr.bf16.vlgmr.msra.gmra.mrb[8].mxu0 %v1504_v42 }
  0x4f   : > { %1447 = vmatmul.mubr.bf16.vlgmr.msra.gmra.mrb[8].mxu1 %v1505_v43  ;;  %1426 = vmatprep.mubr.bf16.mxu0 %v1506_v44 }
  0x50   : > { %1450 = vmatprep.mubr.bf16.mxu1 %v1507_v45 }
  0x56   : > { %1427 = vmatmul.mubr.bf16.gmra.mrb[12].mxu0 %v1508_v46 }
  0x57   : > { %1451 = vmatmul.mubr.bf16.gmra.mrb[12].mxu1 %v1509_v47 }
 0x101   : > { %v1673_v48 = vpop.f32.mrb[0].mxu0 }
 0x102   : > { %v1675_v49 = vpop.f32.mrb[0].mxu1  ;;  %v1677_v50 = vpop.f32.mrb[1].mxu0 }
 0x103   : > { %v1679_v51 = vpop.f32.mrb[1].mxu1  ;;  %v1681_v52 = vpop.f32.mrb[2].mxu0 }
 0x104   : > { %v1683_v53 = vpop.f32.mrb[2].mxu1  ;;  %v1685_v54 = vpop.f32.mrb[3].mxu0 }
 0x105   : > { %v843_v55 = vadd.f32 %v1685_v54, %v1677_v50  ;;  %v1689_v56 = vpop.f32.mrb[3].mxu1 }
 0x106   : > { %v857_v57 = vadd.f32 %v1689_v56, %v1679_v51 }
 0x107   : > { %v844_v58 = vadd.f32 %v1673_v48, %v843_v55 }
 0x108   : > { %v858_v59 = vadd.f32 %v1675_v49, %v857_v57 }
 0x109   : > { %v1695_v60 = vpop.f32.mrb[4].mxu0  ;;  %v845_v61 = vadd.f32 %v1681_v52, %v844_v58 }
 0x10a   : > { %v1698_v62 = vpop.f32.mrb[4].mxu1  ;;  %v1700_v63 = vpop.f32.mrb[5].mxu0  ;;  %v859_v0 = vadd.f32 %v1683_v53, %v858_v59 }
 0x10b   : > { %v846_v1 = vadd.f32 %v845_v61, %v1700_v63  ;;  %v1704_v2 = vpop.f32.mrb[5].mxu1  ;;  %v1706_v3 = vpop.f32.mrb[6].mxu0 }
 0x10c   : > { %v860_v4 = vadd.f32 %v859_v0, %v1704_v2  ;;  %v1709_v5 = vpop.f32.mrb[6].mxu1  ;;  %v1711_v6 = vpop.f32.mrb[7].mxu0 }
 0x10d   : > { %v847_v7 = vadd.f32 %v846_v1, %v1711_v6  ;;  %v1714_v8 = vpop.f32.mrb[7].mxu1 }
 0x10e   : > { %v861_v9 = vadd.f32 %v860_v4, %v1714_v8 }
 0x10f   : > { %v848_v10 = vadd.f32 %v1695_v60, %v847_v7 }
 0x110   : > { %v862_v11 = vadd.f32 %v1698_v62, %v861_v9 }
 0x111   : > { %v849_v12 = vadd.f32 %v1706_v3, %v848_v10 }
 0x112   : > { %v863_v13 = vadd.f32 %v1709_v5, %v862_v11 }
 0x113   : > { %v850_v14 = vrot.slane %v849_v12, 4 }
 0x114   : > { %v864_v15 = vrot.slane %v863_v13, 4 }
 0x115   : > { %v851_v16 = vadd.f32 %v850_v14, %v849_v12 }
 0x116   : > { %v865_v17 = vadd.f32 %v864_v15, %v863_v13 }
 0x117   : > { %v852_v18 = vrot.slane %v851_v16, 2 }
 0x118   : > { %v866_v19 = vrot.slane %v865_v17, 2 }
 0x119   : > { %v853_v20 = vadd.f32 %v852_v18, %v851_v16 }
 0x11a   : > { %v867_v21 = vadd.f32 %v866_v19, %v865_v17 }
 0x11b   : > { %v854_v22 = vrot.slane %v853_v20, 1 }
 0x11c   : > { %v868_v23 = vrot.slane %v867_v21, 1 }
 0x11d   : > { %v855_v24 = vadd.f32 %v854_v22, %v853_v20 }
 0x11e   : > { %v869_v25 = vadd.f32 %v868_v23, %v867_v21 }
 0x120   : > { %v870_v26 = vadd.f32 %v869_v25, %v855_v24 }
 0x121   : > { %v1721_v27 = vpop.f32.mrb[8].mxu0 }
 0x122   : > { %v1723_v28 = vpop.f32.mrb[8].mxu1  ;;  %v1725_v29 = vpop.f32.mrb[9].mxu0 }
 0x123   : > { %1996 = vst [vmem:[#allocation2_spill] sm:$0xff] %v1723_v28  ;;  %v1727_v30 = vpop.f32.mrb[9].mxu1  ;;  %v1729_v31 = vpop.f32.mrb[10].mxu0 }
 0x124   : > { %v1731_v32 = vpop.f32.mrb[10].mxu1  ;;  %v1733_v33 = vpop.f32.mrb[11].mxu0 }
 0x125   : > { %1997 = vst [vmem:[#allocation3_spill] sm:$0xff] %v1731_v32  ;;  %v871_v34 = vadd.f32 %v1733_v33, %v1725_v29  ;;  %v1737_v35 = vpop.f32.mrb[11].mxu1 }
 0x126   : > { %v885_v36 = vadd.f32 %v1737_v35, %v1727_v30 }
 0x127   : > { %v872_v37 = vadd.f32 %v1721_v27, %v871_v34 }
 0x128   : > { %v886_v38 = vadd.f32 %v1723_v28, %v885_v36 }
 0x129   : > { %v1743_v39 = vpop.f32.mrb[12].mxu0  ;;  %v873_v40 = vadd.f32 %v1729_v31, %v872_v37 }
 0x12a   : > { %1998 = vst [vmem:[#allocation4_spill] sm:$0xff] %v1743_v39  ;;  %v1746_v41 = vpop.f32.mrb[12].mxu1  ;;  %v1748_v42 = vpop.f32.mrb[13].mxu0  ;;  %v887_v43 = vadd.f32 %v1731_v32, %v886_v38 }
 0x12b   : > { %1999 = vst [vmem:[#allocation5_spill] sm:$0xff] %v1746_v41  ;;  %v874_v44 = vadd.f32 %v873_v40, %v1748_v42  ;;  %v1752_v45 = vpop.f32.mrb[13].mxu1  ;;  %v1754_v46 = vpop.f32.mrb[14].mxu0 }
 0x12c   : > { %2000 = vst [vmem:[#allocation6_spill] sm:$0xff] %v1752_v45  ;;  %v888_v47 = vadd.f32 %v887_v43, %v1752_v45  ;;  %v1757_v55 = vpop.f32.mrb[14].mxu1  ;;  %v1759_v57 = vpop.f32.mrb[15].mxu0 }
 0x12d   : > { %2001 = vst [vmem:[#allocation7_spill] sm:$0xff] %v1757_v55  ;;  %2002 = vst [vmem:[#allocation8_spill] sm:$0xff] %v1759_v57  ;;  %v875_v58 = vadd.f32 %v874_v44, %v1759_v57  ;;  %v1762_v59 = vpop.f32.mrb[15].mxu1 }
 0x12e   : > { %2003 = vst [vmem:[#allocation9_spill] sm:$0xff] %v1762_v59  ;;  %v889_v61 = vadd.f32 %v888_v47, %v1762_v59 }
 0x12f   : > { %v876_v0 = vadd.f32 %v1743_v39, %v875_v58 }
 0x130   : > { %v890_v1 = vadd.f32 %v1746_v41, %v889_v61 }
 0x131   : > { %v877_v4 = vadd.f32 %v1754_v46, %v876_v0 }
 0x132   : > { %v891_v7 = vadd.f32 %v1757_v55, %v890_v1 }
 0x133   : > { %v878_v9 = vrot.slane %v877_v4, 4 }
 0x134   : > { %v892_v10 = vrot.slane %v891_v7, 4 }
 0x135   : > { %v879_v11 = vadd.f32 %v878_v9, %v877_v4 }
 0x136   : > { %v893_v12 = vadd.f32 %v892_v10, %v891_v7 }
 0x137   : > { %v880_v13 = vrot.slane %v879_v11, 2 }
 0x138   : > { %v894_v14 = vrot.slane %v893_v12, 2 }
 0x139   : > { %v881_v15 = vadd.f32 %v880_v13, %v879_v11 }
 0x13a   : > { %v895_v16 = vadd.f32 %v894_v14, %v893_v12 }
 0x13b   : > { %v882_v17 = vrot.slane %v881_v15, 1 }
 0x13c   : > { %v896_v18 = vrot.slane %v895_v16, 1 }
 0x13d   : > { %v883_v19 = vadd.f32 %v882_v17, %v881_v15 }
 0x13e   : > { %v897_v21 = vadd.f32 %v896_v18, %v895_v16 }
 0x13f   : > { %v884_v20 = vadd.f32 %v883_v19, %v870_v26 }
 0x141   : > { %v898_v22 = vadd.f32 %v897_v21, %v884_v20 }
 0x143   : > { %v1769_v23 = vmul.f32 0.00390625, %v898_v22 }
 0x145   : > { %v901_v24 = vsub.f32 %v1677_v50, %v1769_v23  ;;  %v902_v25 = vsub.f32 %v1685_v54, %v1769_v23  ;;  %v903_v34 = vsub.f32 %v1673_v48, %v1769_v23  ;;  %v904_v36 = vsub.f32 %v1681_v52, %v1769_v23 }
 0x146   : > { %v905_v37 = vsub.f32 %v1700_v63, %v1769_v23  ;;  %v906_v26 = vsub.f32 %v1711_v6, %v1769_v23  ;;  %v907_v38 = vsub.f32 %v1695_v60, %v1769_v23  ;;  %v908_v40 = vsub.f32 %v1706_v3, %v1769_v23 }
 0x147   : > { %v909_v43 = vmul.f32 %v901_v24, %v901_v24  ;;  %v910_v44 = vmul.f32 %v902_v25, %v902_v25  ;;  %v911_v47 = vmul.f32 %v903_v34, %v903_v34  ;;  %v912_v58 = vmul.f32 %v904_v36, %v904_v36 }
 0x148   : > { %v931_v0 = vsub.f32 %v1679_v51, %v1769_v23  ;;  %v932_v1 = vsub.f32 %v1689_v56, %v1769_v23  ;;  %v933_v4 = vsub.f32 %v1675_v49, %v1769_v23  ;;  %v934_v7 = vsub.f32 %v1683_v53, %v1769_v23 }
 0x149   : > { %v917_v61 = vadd.f32 %v910_v44, %v909_v43  ;;  %v935_v9 = vsub.f32 %v1704_v2, %v1769_v23  ;;  %v936_v10 = vsub.f32 %v1714_v8, %v1769_v23  ;;  %v937_v11 = vsub.f32 %v1698_v62, %v1769_v23 }
 0x14a   : > { %v938_v13 = vsub.f32 %v1709_v5, %v1769_v23  ;;  %v939_v14 = vmul.f32 %v931_v0, %v931_v0  ;;  %v940_v15 = vmul.f32 %v932_v1, %v932_v1  ;;  %v913_v16 = vmul.f32 %v905_v37, %v905_v37 }
 0x14b   : > { %v918_v12 = vadd.f32 %v917_v61, %v911_v47  ;;  %v914_v17 = vmul.f32 %v906_v26, %v906_v26  ;;  %v915_v18 = vmul.f32 %v907_v38, %v907_v38  ;;  %v916_v19 = vmul.f32 %v908_v40, %v908_v40 }
 0x14c   : > { %v941_v21 = vmul.f32 %v933_v4, %v933_v4  ;;  %v942_v22 = vmul.f32 %v934_v7, %v934_v7  ;;  %v947_v24 = vadd.f32 %v940_v15, %v939_v14  ;;  %v961_v25 = vsub.f32 %v1725_v29, %v1769_v23 }
 0x14d   : > { %v919_v20 = vadd.f32 %v918_v12, %v912_v58  ;;  %v962_v34 = vsub.f32 %v1733_v33, %v1769_v23  ;;  %v963_v36 = vsub.f32 %v1721_v27, %v1769_v23  ;;  %v964_v43 = vsub.f32 %v1729_v31, %v1769_v23 }
 0x14e   : > { %v948_v26 = vadd.f32 %v947_v24, %v941_v21  ;;  %v965_v38 = vsub.f32 %v1748_v42, %v1769_v23  ;;  %v966_v40 = vsub.f32 %v1759_v57, %v1769_v23  ;;  %v967_v44 = vsub.f32 %v1743_v39, %v1769_v23 }
 0x14f   : > { %v920_v37 = vadd.f32 %v919_v20, %v913_v16  ;;  %v968_v47 = vsub.f32 %v1754_v46, %v1769_v23  ;;  %v969_v58 = vmul.f32 %v961_v25, %v961_v25  ;;  %v970_v61 = vmul.f32 %v962_v34, %v962_v34 }
 0x150   : > { %v943_v1 = vmul.f32 %v935_v9, %v935_v9  ;;  %v944_v4 = vmul.f32 %v936_v10, %v936_v10  ;;  %v949_v7 = vadd.f32 %v948_v26, %v942_v22  ;;  %v945_v12 = vmul.f32 %v937_v11, %v937_v11 }
 0x151   : > { %v921_v0 = vadd.f32 %v920_v37, %v914_v17  ;;  %v946_v14 = vmul.f32 %v938_v13, %v938_v13  ;;  %v971_v15 = vmul.f32 %v963_v36, %v963_v36  ;;  %v972_v16 = vmul.f32 %v964_v43, %v964_v43 }
 0x152   : > { %v950_v21 = vadd.f32 %v949_v7, %v943_v1  ;;  %v977_v24 = vadd.f32 %v970_v61, %v969_v58  ;;  %v991_v57 = vsub.f32 %v1727_v30, %v1769_v23  ;;  %v992_v39 = vsub.f32 %v1737_v35, %v1769_v23 }
 0x153   : > { %v922_v20 = vadd.f32 %v921_v0, %v915_v18  ;;  %v993_v25 = vsub.f32 %v1723_v28, %v1769_v23  ;;  %v994_v9 = vsub.f32 %v1731_v32, %v1769_v23  ;;  %v995_v10 = vsub.f32 %v1752_v45, %v1769_v23 }
 0x154   : > { %v951_v13 = vadd.f32 %v950_v21, %v944_v4  ;;  %v978_v17 = vadd.f32 %v977_v24, %v971_v15  ;;  %v996_v18 = vsub.f32 %v1762_v59, %v1769_v23  ;;  %v997_v22 = vsub.f32 %v1746_v41, %v1769_v23 }
 0x155   : > { %v923_v11 = vadd.f32 %v922_v20, %v916_v19  ;;  %v998_v34 = vsub.f32 %v1757_v55, %v1769_v23  ;;  %v999_v36 = vmul.f32 %v991_v57, %v991_v57  ;;  %v1000_v43 = vmul.f32 %v992_v39, %v992_v39 }
 0x156   : > { %v952_v26 = vadd.f32 %v951_v13, %v945_v12  ;;  %v973_v58 = vmul.f32 %v965_v38, %v965_v38  ;;  %v979_v61 = vadd.f32 %v978_v17, %v972_v16  ;;  %v974_v19 = vmul.f32 %v966_v40, %v966_v40 }
 0x157   : > { %v924_v37 = vrot.slane %v923_v11, 4  ;;  %v1001_v7 = vmul.f32 %v993_v25, %v993_v25  ;;  %v1007_v15 = vadd.f32 %v1000_v43, %v999_v36  ;;  %v975_v24 = vmul.f32 %v967_v44, %v967_v44 }
 0x158   : > { %v953_v1 = vadd.f32 %v952_v26, %v946_v14  ;;  %v980_v4 = vadd.f32 %v979_v61, %v973_v58  ;;  %v1002_v41 = vmul.f32 %v994_v9, %v994_v9  ;;  %v976_v57 = vmul.f32 %v968_v47, %v968_v47 }
 0x159   : > { %v925_v0 = vadd.f32 %v924_v37, %v923_v11  ;;  %v1008_v45 = vadd.f32 %v1007_v15, %v1001_v7  ;;  %v1003_v28 = vmul.f32 %v995_v10, %v995_v10  ;;  %v1004_v14 = vmul.f32 %v996_v18, %v996_v18 }
 0x15a   : > { %v954_v21 = vrot.slane %v953_v1, 4  ;;  %v981_v59 = vadd.f32 %v980_v4, %v974_v19  ;;  %v1005_v17 = vmul.f32 %v997_v22, %v997_v22  ;;  %v1006_v9 = vmul.f32 %v998_v34, %v998_v34 }
 0x15b   : > { %v926_v20 = vrot.slane %v925_v0, 2  ;;  %v1009_v12 = vadd.f32 %v1008_v45, %v1002_v41  ;;  %v1029_v34 = vlaneseq }
 0x15c   : > { %v955_v55 = vadd.f32 %v954_v21, %v953_v1  ;;  %v982_v39 = vadd.f32 %v981_v59, %v975_v24 }
 0x15d   : > { %v927_v32 = vadd.f32 %v926_v20, %v925_v0  ;;  %v1010_v40 = vadd.f32 %v1009_v12, %v1003_v28  ;;  %v1030_v15 = vshrl.u32 %v1029_v34, 7  ;;  %v1024_v20 = vld [vmem:[%s1985_s2] sm:$0x1] }
 0x15e   : > { %v956_v16 = vrot.slane %v955_v55, 2  ;;  %v983_v11 = vadd.f32 %v982_v39, %v976_v57  ;;  %v1026_v39 = vld [vmem:[%s1986_s3] sm:$0x1] }
 0x15f   : > { %v928_v38 = vrot.slane %v927_v32, 1  ;;  %v1011_v36 = vadd.f32 %v1010_v40, %v1004_v14  ;;  %v1031_v21 = vsub.s32 0, %v1030_v15 }
 0x160   : > { %v957_v13 = vadd.f32 %v956_v16, %v955_v55  ;;  %v984_v25 = vrot.slane %v983_v11, 4 }
 0x161   : > { %v929_v43 = vadd.f32 %v928_v38, %v927_v32  ;;  %v1012_v26 = vadd.f32 %v1011_v36, %v1005_v17 }
 0x162   : > { %v958_v44 = vrot.slane %v957_v13, 1  ;;  %v985_v37 = vadd.f32 %v984_v25, %v983_v11 }
 0x163   : > { %v1013_v47 = vadd.f32 %v1012_v26, %v1006_v9 }
 0x164   : > { %v959_v58 = vadd.f32 %v958_v44, %v957_v13  ;;  %v986_v61 = vrot.slane %v985_v37, 2 }
 0x165   : > { %v1014_v41 = vrot.slane %v1013_v47, 4 }
 0x166   : > { %v960_v59 = vadd.f32 %v959_v58, %v929_v43  ;;  %v987_v10 = vadd.f32 %v986_v61, %v985_v37 }
 0x167   : > { %v1015_v0 = vadd.f32 %v1014_v41, %v1013_v47 }
 0x168   : > { %v988_v45 = vrot.slane %v987_v10, 1 }
 0x169   : > { %v1016_v18 = vrot.slane %v1015_v0, 2 }
 0x16a   : > { %v989_v1 = vadd.f32 %v988_v45, %v987_v10 }
 0x16b   : > { %v1017_v55 = vadd.f32 %v1016_v18, %v1015_v0 }
 0x16c   : > { %v990_v28 = vadd.f32 %v989_v1, %v960_v59 }
 0x16d   : > { %v1018_v19 = vrot.slane %v1017_v55, 1 }
 0x16f   : > { %v1019_v22 = vadd.f32 %v1018_v19, %v1017_v55 }
 0x171   : > { %v1020_v4 = vadd.f32 %v1019_v22, %v990_v28 }
 0x173   : > { %v1021_v32 = vmul.f32 0.00390625, %v1020_v4 }
 0x175   : > { %v1022_v7 = vadd.f32 1e-05, %v1021_v32 }
 0x177   : > { %1510 = vrsqrt.f32 %v1022_v7 }
 0x181   : > { %v1511_v24 = vpop.eup %1510 }
 0x182   : > { %v1025_v57 = vmul.f32 %v1511_v24, %v1024_v20 }
 0x184   : > { %v1027_v12 = vmul.f32 %v1025_v57, %v1769_v23  ;;  %v1842_v38 = vrot.slane %v1025_v57, %v1031_v21 }
 0x186   : > { %v1028_v16 = vsub.f32 %v1026_v39, %v1027_v12  ;;  %v1033_v11 = vmul.f32 %v1842_v38, %v1677_v50  ;;  %v1034_v14 = vmul.f32 %v1842_v38, %v1685_v54  ;;  %v1035_v40 = vmul.f32 %v1673_v48, %v1842_v38 }
 0x187   : > { %v1036_v13 = vmul.f32 %v1681_v52, %v1842_v38  ;;  %v1037_v25 = vmul.f32 %v1842_v38, %v1700_v63  ;;  %v1038_v23 = vmul.f32 %v1842_v38, %v1711_v6  ;;  %v1039_v17 = vmul.f32 %v1695_v60, %v1842_v38 }
 0x188   : > { %v1040_v50 = vmul.f32 %v1706_v3, %v1842_v38  ;;  %v1861_v54 = vrot.slane %v1028_v16, %v1031_v21  ;;  %v1071_v48 = vmul.f32 %v1842_v38, %v1679_v51  ;;  %v1072_v52 = vmul.f32 %v1842_v38, %v1689_v56  ;;  %v2004_v16 = vld [vmem:[#allocation8_spill] sm:$0xff] }
 0x189   : > { %v1073_v63 = vmul.f32 %v1675_v49, %v1842_v38  ;;  %v1074_v6 = vmul.f32 %v1683_v53, %v1842_v38  ;;  %v1075_v60 = vmul.f32 %v1842_v38, %v1704_v2  ;;  %v1076_v3 = vmul.f32 %v1842_v38, %v1714_v8 }
 0x18a   : > { %v1047_v36 = vadd.f32 %v1861_v54, %v1033_v11  ;;  %v1048_v43 = vadd.f32 %v1861_v54, %v1034_v14  ;;  %v1049_v51 = vadd.f32 %v1861_v54, %v1035_v40  ;;  %v1050_v56 = vadd.f32 %v1861_v54, %v1036_v13 }
 0x18b   : > { %v1051_v49 = vadd.f32 %v1861_v54, %v1037_v25  ;;  %v1052_v53 = vadd.f32 %v1861_v54, %v1038_v23  ;;  %v1053_v2 = vadd.f32 %v1861_v54, %v1039_v17  ;;  %v1054_v8 = vadd.f32 %v1861_v54, %v1040_v50 }
 0x18c   : > { %v1055_v44 = vmax.f32 %v1047_v36, 0.0  ;;  %v1056_v37 = vmax.f32 %v1048_v43, 0.0  ;;  %v1057_v9 = vmax.f32 %v1049_v51, 0.0  ;;  %v1058_v26 = vmax.f32 %v1050_v56, 0.0  ;;  %v2006_v51 = vld [vmem:[#allocation2_spill] sm:$0xff] }
 0x18d   : > { %v1059_v58 = vmax.f32 %v1051_v49, 0.0  ;;  %v1060_v61 = vmax.f32 %v1052_v53, 0.0  ;;  %v1061_v47 = vmax.f32 %v1053_v2, 0.0  ;;  %v1062_v59 = vmax.f32 %v1054_v8, 0.0  ;;  %v2007_v49 = vld [vmem:[#allocation3_spill] sm:$0xff]  ;;  %v2008_v2 = vld [vmem:[#allocation6_spill] sm:$0xff] }
 0x18e   : > { %1063 = vst [vmem:[%s1882_s20] sm:$0xff] %v1055_v44  ;;  %1064 = vst [vmem:[%s1882_s20 + $0x8] sm:$0xff] %v1056_v37  ;;  %v1077_v10 = vmul.f32 %v1698_v62, %v1842_v38  ;;  %v1078_v41 = vmul.f32 %v1709_v5, %v1842_v38  ;;  %v1079_v45 = vadd.f32 %v1071_v48, %v1861_v54  ;;  %v2009_v44 = vld [vmem:[#allocation9_spill] sm:$0xff] }
 0x18f   : > { %1065 = vst [vmem:[%s1882_s20 + $0x10] sm:$0xff] %v1057_v9  ;;  %1066 = vst [vmem:[%s1882_s20 + $0x18] sm:$0xff] %v1058_v26  ;;  %v1080_v0 = vadd.f32 %v1072_v52, %v1861_v54  ;;  %v1081_v1 = vadd.f32 %v1073_v63, %v1861_v54  ;;  %v1082_v18 = vadd.f32 %v1074_v6, %v1861_v54  ;;  %v2011_v9 = vld [vmem:[#allocation7_spill] sm:$0xff] }
 0x190   : > { %1067 = vst [vmem:[%s1882_s20 + $0x20] sm:$0xff] %v1059_v58  ;;  %1068 = vst [vmem:[%s1882_s20 + $0x28] sm:$0xff] %v1060_v61  ;;  %v1083_v28 = vadd.f32 %v1075_v60, %v1861_v54  ;;  %v1084_v62 = vadd.f32 %v1076_v3, %v1861_v54  ;;  %v1085_v5 = vadd.f32 %v1077_v10, %v1861_v54  ;;  %v1087_v19 = vmax.f32 %v1079_v45, 0.0 }
 0x191   : > { %1069 = vst [vmem:[%s1882_s20 + $0x30] sm:$0xff] %v1061_v47  ;;  %1070 = vst [vmem:[%s1882_s20 + $0x38] sm:$0xff] %v1062_v59  ;;  %v1086_v55 = vadd.f32 %v1078_v41, %v1861_v54  ;;  %v1088_v22 = vmax.f32 %v1080_v0, 0.0  ;;  %v1089_v4 = vmax.f32 %v1081_v1, 0.0  ;;  %v1090_v32 = vmax.f32 %v1082_v18, 0.0 }
 0x192   : > { %v1091_v7 = vmax.f32 %v1083_v28, 0.0  ;;  %v1092_v34 = vmax.f32 %v1084_v62, 0.0  ;;  %v1093_v15 = vmax.f32 %v1085_v5, 0.0  ;;  %1282 = vst [vmem:[%s1882_s20 + $0x40] sm:$0xff] %v1087_v19  ;;  %v1104_v21 = vmul.f32 %v1842_v38, %v1725_v29  ;;  %v2005_v29 = vld [vmem:[#allocation4_spill] sm:$0xff] }
 0x193   : > { %v1094_v20 = vmax.f32 %v1086_v55, 0.0  ;;  %1283 = vst [vmem:[%s1882_s20 + $0x48] sm:$0xff] %v1088_v22  ;;  %v1105_v24 = vmul.f32 %v1842_v38, %v1733_v33  ;;  %1284 = vst [vmem:[%s1882_s20 + $0x50] sm:$0xff] %v1089_v4  ;;  %v1106_v57 = vmul.f32 %v1721_v27, %v1842_v38  ;;  %v1107_v39 = vmul.f32 %v1729_v31, %v1842_v38 }
 0x194   : > { %1285 = vst [vmem:[%s1882_s20 + $0x58] sm:$0xff] %v1090_v32  ;;  %1286 = vst [vmem:[%s1882_s20 + $0x60] sm:$0xff] %v1091_v7  ;;  %v1108_v12 = vmul.f32 %v1842_v38, %v1748_v42  ;;  %v1109_v11 = vmul.f32 %v1842_v38, %v2004_v16  ;;  %v1110_v33 = vmul.f32 %v2005_v29, %v1842_v38 }
 0x195   : > { %1287 = vst [vmem:[%s1882_s20 + $0x68] sm:$0xff] %v1092_v34  ;;  %1288 = vst [vmem:[%s1882_s20 + $0x70] sm:$0xff] %v1093_v15  ;;  %v1111_v14 = vmul.f32 %v1754_v46, %v1842_v38  ;;  %v1112_v40 = vadd.f32 %v1104_v21, %v1861_v54  ;;  %v1113_v27 = vadd.f32 %v1105_v24, %v1861_v54 }
 0x196   : > { %1289 = vst [vmem:[%s1882_s20 + $0x78] sm:$0xff] %v1094_v20  ;;  %v1114_v31 = vadd.f32 %v1106_v57, %v1861_v54  ;;  %v1115_v42 = vadd.f32 %v1107_v39, %v1861_v54  ;;  %v1116_v13 = vadd.f32 %v1108_v12, %v1861_v54  ;;  %v1117_v25 = vadd.f32 %v1109_v11, %v1861_v54 }
 0x197   : > { %v1118_v23 = vadd.f32 %v1110_v33, %v1861_v54  ;;  %v1119_v46 = vadd.f32 %v1111_v14, %v1861_v54  ;;  %v1120_v17 = vmax.f32 %v1112_v40, 0.0  ;;  %v1121_v50 = vmax.f32 %v1113_v27, 0.0 }
 0x198   : > { %v1122_v48 = vmax.f32 %v1114_v31, 0.0  ;;  %v1123_v52 = vmax.f32 %v1115_v42, 0.0  ;;  %v1124_v63 = vmax.f32 %v1116_v13, 0.0  ;;  %v1125_v6 = vmax.f32 %v1117_v25, 0.0 }
 0x199   : > { %v1126_v60 = vmax.f32 %v1118_v23, 0.0  ;;  %v1127_v3 = vmax.f32 %v1119_v46, 0.0  ;;  %1290 = vst [vmem:[%s1882_s20 + $0x80] sm:$0xff] %v1120_v17  ;;  %1291 = vst [vmem:[%s1882_s20 + $0x88] sm:$0xff] %v1121_v50  ;;  %v1137_v36 = vmul.f32 %v1842_v38, %v1727_v30  ;;  %v1138_v43 = vmul.f32 %v1842_v38, %v1737_v35  ;;  %v2010_v30 = vld [vmem:[#allocation5_spill] sm:$0xff] }
 0x19a   : > { %1292 = vst [vmem:[%s1882_s20 + $0x90] sm:$0xff] %v1122_v48  ;;  %1293 = vst [vmem:[%s1882_s20 + $0x98] sm:$0xff] %v1123_v52  ;;  %v1139_v56 = vmul.f32 %v2006_v51, %v1842_v38  ;;  %v1140_v53 = vmul.f32 %v2007_v49, %v1842_v38  ;;  %v1141_v8 = vmul.f32 %v1842_v38, %v2008_v2 }
 0x19b   : > { %1294 = vst [vmem:[%s1882_s20 + $0xa0] sm:$0xff] %v1124_v63  ;;  %1295 = vst [vmem:[%s1882_s20 + $0xa8] sm:$0xff] %v1125_v6  ;;  %v1142_v37 = vmul.f32 %v1842_v38, %v2009_v44  ;;  %v1143_v35 = vmul.f32 %v2010_v30, %v1842_v38  ;;  %v1144_v26 = vmul.f32 %v2011_v9, %v1842_v38 }
 0x19c   : > { %1296 = vst [vmem:[%s1882_s20 + $0xb0] sm:$0xff] %v1126_v60  ;;  %1297 = vst [vmem:[%s1882_s20 + $0xb8] sm:$0xff] %v1127_v3  ;;  %v1145_v58 = vadd.f32 %v1137_v36, %v1861_v54  ;;  %v1146_v61 = vadd.f32 %v1138_v43, %v1861_v54  ;;  %v1147_v47 = vadd.f32 %v1139_v56, %v1861_v54 }
 0x19d   : > { %v1148_v59 = vadd.f32 %v1140_v53, %v1861_v54  ;;  %v1149_v10 = vadd.f32 %v1141_v8, %v1861_v54  ;;  %v1150_v41 = vadd.f32 %v1142_v37, %v1861_v54  ;;  %v1151_v38 = vadd.f32 %v1143_v35, %v1861_v54 }
 0x19e   : > { %v1152_v45 = vadd.f32 %v1144_v26, %v1861_v54  ;;  %v1153_v0 = vmax.f32 %v1145_v58, 0.0  ;;  %v1154_v1 = vmax.f32 %v1146_v61, 0.0  ;;  %v1155_v18 = vmax.f32 %v1147_v47, 0.0 }
 0x19f   : > { %v1156_v28 = vmax.f32 %v1148_v59, 0.0  ;;  %v1157_v62 = vmax.f32 %v1149_v10, 0.0  ;;  %v1158_v5 = vmax.f32 %v1150_v41, 0.0  ;;  %v1159_v55 = vmax.f32 %v1151_v38, 0.0 }
 0x1a0   : > { %v1160_v19 = vmax.f32 %v1152_v45, 0.0  ;;  %1298 = vst [vmem:[%s1882_s20 + $0xc0] sm:$0xff] %v1153_v0  ;;  %1299 = vst [vmem:[%s1882_s20 + $0xc8] sm:$0xff] %v1154_v1 }
 0x1a1   : > { %1300 = vst [vmem:[%s1882_s20 + $0xd0] sm:$0xff] %v1155_v18  ;;  %1301 = vst [vmem:[%s1882_s20 + $0xd8] sm:$0xff] %v1156_v28 }
 0x1a2   : > { %1302 = vst [vmem:[%s1882_s20 + $0xe0] sm:$0xff] %v1157_v62  ;;  %1303 = vst [vmem:[%s1882_s20 + $0xe8] sm:$0xff] %v1158_v5 }
 0x1a3   : > { %1304 = vst [vmem:[%s1882_s20 + $0xf0] sm:$0xff] %v1159_v55  ;;  %1305 = vst [vmem:[%s1882_s20 + $0xf8] sm:$0xff] %v1160_v19 }
 0x1a4 PF: > { %s14_s15 = sadd.s32 1, %s1518_s15  }
 0x1a5   : > { %p11_p4 = scmp.ge.s32.totalorder %s14_s15, 4  }
 0x1a7   :  { %13 = sbr.rel (!%p11_p4) target bundleno = 1 (0x1), region = 69 }

// kernel: generator_forward.19
= control target key start
LH: loop header
LB: loop body
LE: loop exit
PB: predicated region body
PF: predicated region fallthrough
CT: control target
= control target key end

     0   :  { %s2933_s9 = smov 0   ;;  %s3466_s0 = inlined_call_operand.vmem [shape: bf16[2,256,784], index: 0, kind: input, shape index: {}]   ;;  %s3467_s1 = inlined_call_operand.vmem [shape: bf16[784,128], index: 1, kind: input, shape index: {}]   ;;  %s3468_s2 = inlined_call_operand.vmem [shape: f32[2,256,128], index: 2, kind: output, shape index: {}]  }
   0x1 LB: > { %s2037_s10 = sadd.s32 4294967295, %s2916_s9   ;;  %p2041_p0 = scmp.ge.s32.totalorder %s2916_s9, 1  ;;  %s2916_s9 = sphi %s2933_s9, %s12_s9  }
   0x2   : > { %p112_p1 = scmp.lt.s32.totalorder %s2916_s9, 3 }
   0x4   : > { %p113_p2 = pnand %p2041_p0, %p112_p1 }
   0x5   : > { %v2637_v0 = vld [vmem:[%s3467_s1 + $0x40] sm:$0xff] (!%p113_p2)   ;;  %v2639_v2 = vld [vmem:[%s3467_s1 + $0x48] sm:$0xff] (!%p113_p2)   ;;  %p134_p3 = scmp.lt.s32.totalorder (!%p113_p2), %s2037_s10, 1  ;;  %v2641_v4 = vld [vmem:[%s3467_s1 + $0x50] sm:$0xff] (!%p113_p2)   ;;  %vm1225_vm0 = vcmask (!%p113_p2), 130048  }
   0x6   : > { %116 = sbr.rel (%p113_p2) target bundleno = 488 (0x1e8), region = 28  ;;  %v2638_v1 = vld [vmem:[%s3467_s1] sm:$0xff] (!%p113_p2)   ;;  %2225 = vmatprep.subr.bf16.mxu0 (!%p113_p2), %v2637_v0  ;;  %2612 = vmatprep.subr.bf16.mxu1 (!%p113_p2), %v2637_v0  ;;  %v2640_v3 = vld [vmem:[%s3467_s1 + $0x8] sm:$0xff] (!%p113_p2)   ;;  %v2642_v5 = vld [vmem:[%s3467_s1 + $0x10] sm:$0xff] (!%p113_p2)  }
   0x7   : > { %2226 = vmatpush3.bf16.msra.mxu0 (!%p113_p2), %v2638_v1  ;;  %2620 = vmatpush3.bf16.msra.mxu1 (!%p113_p2), %v2638_v1  ;;  %v2643_v6 = vld [vmem:[%s3467_s1 + $0x58] sm:$0xff] (!%p113_p2)   ;;  %v2645_v8 = vld [vmem:[%s3467_s1 + $0x60] sm:$0xff] (!%p113_p2)   ;;  %v2647_v10 = vld [vmem:[%s3467_s1 + $0x68] sm:$0xff] (!%p113_p2)  }
   0x8   : > { %2227 = vmatprep.subr.bf16.mxu0 (!%p113_p2), %v2639_v2  ;;  %2613 = vmatprep.subr.bf16.mxu1 (!%p113_p2), %v2639_v2  ;;  %v2644_v7 = vld [vmem:[%s3467_s1 + $0x18] sm:$0xff] (!%p113_p2)   ;;  %v2646_v9 = vld [vmem:[%s3467_s1 + $0x20] sm:$0xff] (!%p113_p2)   ;;  %v2648_v13 = vld [vmem:[%s3467_s1 + $0x28] sm:$0xff] (!%p113_p2)  }
   0x9   : > { %v2649_v14 = vld [vmem:[%s3467_s1 + $0x70] sm:$0xff] (!%p113_p2)   ;;  %v2651_v16 = vld [vmem:[%s3467_s1 + $0x78] sm:$0xff] (!%p113_p2)   ;;  %v2659_v18 = vld [vmem:[%s3467_s1 + $0xc0] sm:$0xff] (!%p113_p2)  }
   0xa   : > { %v2650_v15 = vld [vmem:[%s3467_s1 + $0x30] sm:$0xff] (!%p113_p2)   ;;  %v2652_v17 = vld [vmem:[%s3467_s1 + $0x38] sm:$0xff] (!%p113_p2)   ;;  %v2660_v21 = vld [vmem:[%s3467_s1 + $0x140] sm:$0xff] (!%p113_p2)  }
   0xb   : > { %2228 = vmatpush3.bf16.msra.mxu0 (!%p113_p2), %v2640_v3  ;;  %2621 = vmatpush3.bf16.msra.mxu1 (!%p113_p2), %v2640_v3  ;;  %v2661_v22 = vld [vmem:[%s3467_s1 + $0x80] sm:$0xff] (!%p113_p2)   ;;  %v2663_v24 = vld [vmem:[%s3467_s1 + $0xc8] sm:$0xff] (!%p113_p2)   ;;  %v2671_v32 = vld [vmem:[%s3467_s1 + $0xd0] sm:$0xff] (!%p113_p2)  }
   0xc   : > { %2229 = vmatprep.subr.bf16.mxu0 (!%p113_p2), %v2641_v4  ;;  %2614 = vmatprep.subr.bf16.mxu1 (!%p113_p2), %v2641_v4  ;;  %v2662_v23 = vld [vmem:[%s3467_s1 + $0x100] sm:$0xff] (!%p113_p2)   ;;  %v2674_v27 = vld [vmem:[%s3467_s1 + $0x148] sm:$0xff] (!%p113_p2)   ;;  %v2672_v33 = vld [vmem:[%s3467_s1 + $0x90] sm:$0xff] (!%p113_p2)  }
   0xd   : > { %s3470_s10 = smov (!%p134_p3, %s2037_s10), 1  ;;  %v2664_v28 = vld [vmem:[%s3467_s1 + $0x88] sm:$0xff]   ;;  %v2673_v34 = vld [vmem:[%s3467_s1 + $0xd8] sm:$0xff]   ;;  %v2683_v38 = vld [vmem:[%s3467_s1 + $0xe0] sm:$0xff]  }
   0xe   : > { %s2628_s25 = smul.u32 896, %s3470_s10  ;;  %v2676_v29 = vld [vmem:[%s3467_s1 + $0x108] sm:$0xff]   ;;  %v2675_v37 = vld [vmem:[%s3467_s1 + $0x98] sm:$0xff]   ;;  %v2694_v41 = vld [vmem:[%s3467_s1 + $0x150] sm:$0xff]  }
   0xf   : > { %2230 = vmatpush3.bf16.msra.mxu0 %v2642_v5  ;;  %2622 = vmatpush3.bf16.msra.mxu1 %v2642_v5  ;;  %v2684_v42 = vld [vmem:[%s3467_s1 + $0xa0] sm:$0xff]   ;;  %v2685_v43 = vld [vmem:[%s3467_s1 + $0xe8] sm:$0xff]   ;;  %v2696_v44 = vld [vmem:[%s3467_s1 + $0x110] sm:$0xff]  }
  0x10   : > { %2231 = vmatprep.subr.bf16.mxu0 %v2643_v6  ;;  %2615 = vmatprep.subr.bf16.mxu1 %v2643_v6  ;;  %s2974_s4 = scalar_lea.vmem %s3466_s0, %s2628_s25  ;;  %v2686_v47 = vld [vmem:[%s3467_s1 + $0xa8] sm:$0xff]   ;;  %v2693_v48 = vld [vmem:[%s3467_s1 + $0xf0] sm:$0xff]   ;;  %v2705_v51 = vld [vmem:[%s3467_s1 + $0x158] sm:$0xff]  }
  0x11   : > { %v2655_v11 = vld [vmem:[%s2974_s4 + $0x4] ss:$28 sps:$4 sm:$0xff]   ;;  %v2665_v25 = vld [vmem:[%s2974_s4 + $0x3c] ss:$28 sps:$4 sm:$0xff]   ;;  %v2677_v35 = vld [vmem:[%s2974_s4 + $0x74] ss:$28 sps:$4 sm:$0xff]  }
  0x12   : > { %v2658_v12 = vld [vmem:[%s2974_s4 + $0x2a4] ss:$28 sps:$4 sm:$0xff]   ;;  %1306 = vmatprep.mubr.bf16.mxu0 %v2655_v11  ;;  %v2667_v26 = vld [vmem:[%s2974_s4 + $0x2dc] ss:$28 sps:$4 sm:$0xff]   ;;  %v2679_v36 = vld [vmem:[%s2974_s4 + $0x314] ss:$28 sps:$4 sm:$0xff]  }
  0x13   : > { %2232 = vmatpush3.bf16.msra.mxu0 %v2644_v7  ;;  %2623 = vmatpush3.bf16.msra.mxu1 %v2644_v7  ;;  %v2653_v19 = vld [vmem:[%s2974_s4] ss:$28 sps:$4 sm:$0xff]   ;;  %v2669_v30 = vld [vmem:[%s2974_s4 + $0x38] ss:$28 sps:$4 sm:$0xff]   ;;  %v2681_v39 = vld [vmem:[%s2974_s4 + $0x70] ss:$28 sps:$4 sm:$0xff]  }
  0x14   : > { %2233 = vmatprep.subr.bf16.mxu0 %v2645_v8  ;;  %2616 = vmatprep.subr.bf16.mxu1 %v2645_v8  ;;  %v2656_v20 = vld [vmem:[%s2974_s4 + $0x2a0] ss:$28 sps:$4 sm:$0xff]   ;;  %v2670_v31 = vld [vmem:[%s2974_s4 + $0x2d8] ss:$28 sps:$4 sm:$0xff]   ;;  %v2682_v40 = vld [vmem:[%s2974_s4 + $0x310] ss:$28 sps:$4 sm:$0xff]  }
  0x15   : > { %1402 = vmatprep.mubr.bf16.mxu1 %v2658_v12  ;;  %v2687_v45 = vld [vmem:[%s2974_s4 + $0xac] ss:$28 sps:$4 sm:$0xff]   ;;  %v2695_v52 = vld [vmem:[%s3467_s1 + $0xb0] sm:$0xff]   ;;  %v2707_v53 = vld [vmem:[%s3467_s1 + $0x118] sm:$0xff]  }
  0x16   : > { %v2689_v46 = vld [vmem:[%s2974_s4 + $0x34c] ss:$28 sps:$4 sm:$0xff]   ;;  %v2699_v54 = vld [vmem:[%s2974_s4 + $0xe4] ss:$28 sps:$4 sm:$0xff]   ;;  %v2697_v55 = vld [vmem:[%s3467_s1 + $0xf8] sm:$0xff]  }
  0x17   : > { %2234 = vmatpush3.bf16.msra.mxu0 %v2646_v9  ;;  %2624 = vmatpush3.bf16.msra.mxu1 %v2646_v9  ;;  %v2691_v49 = vld [vmem:[%s2974_s4 + $0xa8] ss:$28 sps:$4 sm:$0xff]   ;;  %v2698_v57 = vld [vmem:[%s3467_s1 + $0xb8] sm:$0xff]   ;;  %v2714_v5 = vld [vmem:[%s2974_s4 + $0x154] ss:$28 sps:$4 sm:$0xff]  }
  0x18   : > { %2235 = vmatprep.subr.bf16.mxu0 %v2647_v10  ;;  %2617 = vmatprep.subr.bf16.mxu1 %v2647_v10  ;;  %v2692_v50 = vld [vmem:[%s2974_s4 + $0x348] ss:$28 sps:$4 sm:$0xff]   ;;  %v2704_v62 = vld [vmem:[%s2974_s4 + $0xe0] ss:$28 sps:$4 sm:$0xff]   ;;  %v2712_v3 = vld [vmem:[%s2974_s4 + $0x118] ss:$28 sps:$4 sm:$0xff]  }
  0x19   : > { %v2703_v56 = vld [vmem:[%s2974_s4 + $0xc] ss:$28 sps:$4 sm:$0xff]   ;;  %v2706_v58 = vld [vmem:[%s3467_s1 + $0x180] sm:$0xff]   ;;  %v2708_v63 = vld [vmem:[%s2974_s4 + $0x11c] ss:$28 sps:$4 sm:$0xff]  }
  0x1a   : > { %v2701_v59 = vld [vmem:[%s2974_s4 + $0x8] ss:$28 sps:$4 sm:$0xff]   ;;  %v2713_v4 = vld [vmem:[%s2974_s4 + $0x40] ss:$28 sps:$4 sm:$0xff]   ;;  %v2742_v7 = vld [vmem:[%s3467_s1 + $0x170] sm:$0xff]  }
  0x1b   : > { %2236 = vmatpush3.bf16.msra.mxu0 %v2648_v13  ;;  %2625 = vmatpush3.bf16.msra.mxu1 %v2648_v13  ;;  %v2720_v60 = vld [vmem:[%s3467_s1 + $0x160] sm:$0xff]   ;;  %v2728_v1 = vld [vmem:[%s3467_s1 + $0x168] sm:$0xff]   ;;  %v2716_v6 = vld [vmem:[%s2974_s4 + $0x7c] ss:$28 sps:$4 sm:$0xff]  }
  0x1c   : > { %2237 = vmatprep.subr.bf16.mxu0 %v2649_v14  ;;  %2618 = vmatprep.subr.bf16.mxu1 %v2649_v14  ;;  %v2721_v61 = vld [vmem:[%s3467_s1 + $0x120] sm:$0xff]   ;;  %v2729_v2 = vld [vmem:[%s3467_s1 + $0x128] sm:$0xff]   ;;  %v2743_v8 = vld [vmem:[%s3467_s1 + $0x130] sm:$0xff]  }
  0x1d   : > { %v2710_v0 = vld [vmem:[%s2974_s4 + $0x44] ss:$28 sps:$4 sm:$0xff]   ;;  %v2718_v9 = vld [vmem:[%s2974_s4 + $0x150] ss:$28 sps:$4 sm:$0xff]   ;;  %v2719_v10 = vld [vmem:[%s2974_s4 + $0x78] ss:$28 sps:$4 sm:$0xff]  }
  0x1e   : > { %v2722_v11 = vld [vmem:[%s2974_s4 + $0x18c] ss:$28 sps:$4 sm:$0xff]   ;;  %v2750_v12 = vld [vmem:[%s3467_s1 + $0x178] sm:$0xff]   ;;  %v2724_v14 = vld [vmem:[%s2974_s4 + $0xb4] ss:$28 sps:$4 sm:$0xff]  }
  0x1f   : > { %2238 = vmatpush3.bf16.msra.mxu0 %v2650_v15  ;;  %2626 = vmatpush3.bf16.msra.mxu1 %v2650_v15  ;;  %v2751_v13 = vld [vmem:[%s3467_s1 + $0x138] sm:$0xff]   ;;  %v2726_v15 = vld [vmem:[%s2974_s4 + $0x188] ss:$28 sps:$4 sm:$0xff]  }
  0x20   : > { %2239 = vmatprep.subr.bf16.mxu0 %v2651_v16  ;;  %2619 = vmatprep.subr.bf16.mxu1 %v2651_v16  ;;  %v2727_v16 = vld [vmem:[%s2974_s4 + $0xb0] ss:$28 sps:$4 sm:$0xff]  }
  0x23   : > { %2240 = vmatpush3.bf16.msra.mxu0 %v2652_v17  ;;  %2627 = vmatpush3.bf16.msra.mxu1 %v2652_v17  ;;  %v2730_v17 = vld [vmem:[%s2974_s4 + $0x1c4] ss:$28 sps:$4 sm:$0xff]  }
  0x24   : > { %2337 = vmatprep.subr.bf16.mxu1 %v2659_v18  ;;  %2449 = vmatprep.subr.bf16.mxu0 %v2660_v21  ;;  %v2732_v18 = vld [vmem:[%s2974_s4 + $0xec] ss:$28 sps:$4 sm:$0xff]   ;;  %v2736_v21 = vld [vmem:[%s2974_s4 + $0x1fc] ss:$28 sps:$4 sm:$0xff]  }
  0x26   : > { %1307 = vmatmul.mubr.bf16.vlgmr.msra.gmra.mrb[0].mxu0 %v2653_v19  ;;  %1403 = vmatmul.mubr.bf16.vlgmr.msra.gmra.mrb[0].mxu1 %v2656_v20  ;;  %v2734_v19 = vld [vmem:[%s2974_s4 + $0x1c0] ss:$28 sps:$4 sm:$0xff]   ;;  %v2735_v20 = vld [vmem:[%s2974_s4 + $0xe8] ss:$28 sps:$4 sm:$0xff]  }
  0x27   : > { %2338 = vmatpush3.bf16.msra.mxu1 %v2661_v22  ;;  %2450 = vmatpush3.bf16.msra.mxu0 %v2662_v23  ;;  %v2738_v22 = vld [vmem:[%s2974_s4 + $0x124] ss:$28 sps:$4 sm:$0xff]   ;;  %v2740_v23 = vld [vmem:[%s2974_s4 + $0x1f8] ss:$28 sps:$4 sm:$0xff]  }
  0x28   : > { %2339 = vmatprep.subr.bf16.mxu1 %v2663_v24  ;;  %1314 = vmatprep.mubr.bf16.mxu0 %v2665_v25  ;;  %v2741_v24 = vld [vmem:[%s2974_s4 + $0x120] ss:$28 sps:$4 sm:$0xff]   ;;  %v2744_v25 = vld [vmem:[%s2974_s4 + $0x234] ss:$28 sps:$4 sm:$0xff]  }
  0x29   : > { %1410 = vmatprep.mubr.bf16.mxu1 %v2667_v26  ;;  %2451 = vmatprep.subr.bf16.mxu0 %v2674_v27  ;;  %v2746_v26 = vld [vmem:[%s2974_s4 + $0x15c] ss:$28 sps:$4 sm:$0xff]   ;;  %v2748_v27 = vld [vmem:[%s2974_s4 + $0x230] ss:$28 sps:$4 sm:$0xff]  }
  0x2b   : > { %2340 = vmatpush3.bf16.msra.mxu1 %v2664_v28  ;;  %2452 = vmatpush3.bf16.msra.mxu0 %v2676_v29  ;;  %v2749_v28 = vld [vmem:[%s2974_s4 + $0x158] ss:$28 sps:$4 sm:$0xff]   ;;  %v2752_v29 = vld [vmem:[%s2974_s4 + $0x26c] ss:$28 sps:$4 sm:$0xff]  }
  0x2c   : > { %2341 = vmatprep.subr.bf16.mxu1 %v2671_v32  ;;  %2453 = vmatprep.subr.bf16.mxu0 %v2694_v41  ;;  %v2757_v32 = vld [vmem:[%s2974_s4 + $0x190] ss:$28 sps:$4 sm:$0xff]   ;;  %v2770_v41 = vld [vmem:[%s2974_s4 + $0x23c] ss:$28 sps:$4 sm:$0xff]  }
  0x2e   : > { %1315 = vmatmul.mubr.bf16.gmra.mrb[4].mxu0 %v2669_v30  ;;  %1411 = vmatmul.mubr.bf16.gmra.mrb[4].mxu1 %v2670_v31  ;;  %v2754_v30 = vld [vmem:[%s2974_s4 + $0x194] ss:$28 sps:$4 sm:$0xff]   ;;  %v2756_v31 = vld [vmem:[%s2974_s4 + $0x268] ss:$28 sps:$4 sm:$0xff]  }
  0x2f   : > { %2342 = vmatpush3.bf16.msra.mxu1 %v2672_v33  ;;  %1322 = vmatprep.mubr.bf16.mxu0 %v2677_v35  ;;  %v2758_v33 = vld [vmem:[%s2974_s4 + $0x1cc] ss:$28 sps:$4 sm:$0xff]  }
  0x30   : > { %2343 = vmatprep.subr.bf16.mxu1 %v2673_v34  ;;  %1418 = vmatprep.mubr.bf16.mxu1 %v2679_v36  ;;  %v2762_v34 = vld [vmem:[%s2974_s4 + $0x14] ss:$28 sps:$4 sm:$0xff]   ;;  %v2763_v36 = vld [vmem:[%s2974_s4 + $0x1c8] ss:$28 sps:$4 sm:$0xff]  }
  0x31   : > { %2454 = vmatpush3.bf16.msra.mxu0 %v2696_v44  ;;  %v2760_v35 = vld [vmem:[%s2974_s4 + $0x10] ss:$28 sps:$4 sm:$0xff]   ;;  %v2775_v44 = vld [vmem:[%s2974_s4 + $0x80] ss:$28 sps:$4 sm:$0xff]  }
  0x32   : > { %2455 = vmatprep.subr.bf16.mxu0 %v2705_v51  ;;  %v2786_v51 = vld [vmem:[%s2974_s4 + $0x2a8] ss:$28 sps:$4 sm:$0xff]  }
  0x33   : > { %2344 = vmatpush3.bf16.msra.mxu1 %v2675_v37  ;;  %v2764_v37 = vld [vmem:[%s2974_s4 + $0x204] ss:$28 sps:$4 sm:$0xff]  }
  0x34   : > { %2345 = vmatprep.subr.bf16.mxu1 %v2683_v38  ;;  %v2766_v38 = vld [vmem:[%s2974_s4 + $0x4c] ss:$28 sps:$4 sm:$0xff]  }
  0x35   : > { %2456 = vmatpush3.bf16.msra.mxu0 %v2707_v53  ;;  %v2788_v53 = vld [vmem:[%s2974_s4 + $0x2e4] ss:$28 sps:$4 sm:$0xff]  }
  0x36   : > { %1323 = vmatmul.mubr.bf16.gmra.mrb[8].mxu0 %v2681_v39  ;;  %1419 = vmatmul.mubr.bf16.gmra.mrb[8].mxu1 %v2682_v40  ;;  %v2768_v39 = vld [vmem:[%s2974_s4 + $0x200] ss:$28 sps:$4 sm:$0xff]   ;;  %v2769_v40 = vld [vmem:[%s2974_s4 + $0x48] ss:$28 sps:$4 sm:$0xff]  }
  0x37   : > { %2346 = vmatpush3.bf16.msra.mxu1 %v2684_v42  ;;  %1330 = vmatprep.mubr.bf16.mxu0 %v2687_v45  ;;  %v2772_v42 = vld [vmem:[%s2974_s4 + $0x84] ss:$28 sps:$4 sm:$0xff]   ;;  %v2776_v45 = vld [vmem:[%s2974_s4 + $0x274] ss:$28 sps:$4 sm:$0xff]  }
  0x38   : > { %2347 = vmatprep.subr.bf16.mxu1 %v2685_v43  ;;  %1426 = vmatprep.mubr.bf16.mxu1 %v2689_v46  ;;  %v2774_v43 = vld [vmem:[%s2974_s4 + $0x238] ss:$28 sps:$4 sm:$0xff]  }
  0x39   : > { %2457 = vmatprep.subr.bf16.mxu0 %v2720_v60  ;;  %v2778_v46 = vld [vmem:[%s2974_s4 + $0xbc] ss:$28 sps:$4 sm:$0xff]  }
  0x3a   : > { %2458 = vmatpush3.bf16.msra.mxu0 %v2721_v61  ;;  %v2799_v60 = vld [vmem:[%s2974_s4 + $0x160] ss:$28 sps:$4 sm:$0xff]   ;;  %v2800_v61 = vld [vmem:[%s2974_s4 + $0x354] ss:$28 sps:$4 sm:$0xff]  }
  0x3b   : > { %2348 = vmatpush3.bf16.msra.mxu1 %v2686_v47  ;;  %2459 = vmatprep.subr.bf16.mxu0 %v2728_v1  ;;  %v2780_v47 = vld [vmem:[%s2974_s4 + $0x270] ss:$28 sps:$4 sm:$0xff]  }
  0x3c   : > { %2349 = vmatprep.subr.bf16.mxu1 %v2693_v48  ;;  %v2781_v48 = vld [vmem:[%s2974_s4 + $0xb8] ss:$28 sps:$4 sm:$0xff]  }
  0x3d   : > { %v2806_v1 = vld [vmem:[%s2974_s4 + $0x1d4] ss:$28 sps:$4 sm:$0xff]  }
  0x3e   : > { %1331 = vmatmul.mubr.bf16.gmra.mrb[12].mxu0 %v2691_v49  ;;  %1427 = vmatmul.mubr.bf16.gmra.mrb[12].mxu1 %v2692_v50  ;;  %v2782_v49 = vld [vmem:[%s2974_s4 + $0x2ac] ss:$28 sps:$4 sm:$0xff]   ;;  %v2784_v50 = vld [vmem:[%s2974_s4 + $0xf4] ss:$28 sps:$4 sm:$0xff]  }
  0x3f   : > { %2350 = vmatpush3.bf16.msra.mxu1 %v2695_v52  ;;  %1338 = vmatprep.mubr.bf16.mxu0 %v2699_v54  ;;  %v2787_v52 = vld [vmem:[%s2974_s4 + $0xf0] ss:$28 sps:$4 sm:$0xff]  }
  0x40   : > { %2351 = vmatprep.subr.bf16.mxu1 %v2697_v55  ;;  %1467 = vmatprep.mubr.bf16.mxu1 %v2703_v56  ;;  %v2790_v54 = vld [vmem:[%s2974_s4 + $0x12c] ss:$28 sps:$4 sm:$0xff]   ;;  %v2792_v55 = vld [vmem:[%s2974_s4 + $0x2e0] ss:$28 sps:$4 sm:$0xff]  }
  0x41   : > { %2460 = vmatpush3.bf16.msra.mxu0 %v2729_v2  ;;  %v2793_v56 = vld [vmem:[%s2974_s4 + $0x128] ss:$28 sps:$4 sm:$0xff]   ;;  %v2808_v2 = vld [vmem:[%s2974_s4 + $0x18] ss:$28 sps:$4 sm:$0xff]  }
  0x42   : > { %2461 = vmatprep.subr.bf16.mxu0 %v2742_v7  ;;  %v2814_v7 = vld [vmem:[%s2974_s4 + $0x208] ss:$28 sps:$4 sm:$0xff]  }
  0x43   : > { %2352 = vmatpush3.bf16.msra.mxu1 %v2698_v57  ;;  %v2794_v57 = vld [vmem:[%s2974_s4 + $0x31c] ss:$28 sps:$4 sm:$0xff]  }
  0x44   : > { %2578 = vmatprep.subr.bf16.mxu1 %v2706_v58 }
  0x45   : > { %2462 = vmatpush3.bf16.msra.mxu0 %v2743_v8  ;;  %v2815_v8 = vld [vmem:[%s2974_s4 + $0xc0] ss:$28 sps:$4 sm:$0xff]  }
  0x46   : > { %1339 = vmatmul.mubr.bf16.gmra.mrb[16].mxu0 %v2704_v62  ;;  %1468 = vmatmul.mubr.bf16.vlgmr.msra.gmra.mrb[16].mxu1 %v2701_v59  ;;  %v2798_v59 = vld [vmem:[%s2974_s4 + $0x318] ss:$28 sps:$4 sm:$0xff]  }
  0x47   : > { %2579 = vmatpush3.bf16.msra.mxu1 %v2706_v58  ;;  %1346 = vmatprep.mubr.bf16.mxu0 %v2708_v63  ;;  %v2796_v58 = vld [vmem:[%s2974_s4 + $0x164] ss:$28 sps:$4 sm:$0xff]   ;;  %v2802_v62 = vld [vmem:[%s2974_s4 + $0x19c] ss:$28 sps:$4 sm:$0xff]   ;;  %v2804_v63 = vld [vmem:[%s2974_s4 + $0x350] ss:$28 sps:$4 sm:$0xff]  }
  0x48   : > { %1475 = vmatprep.mubr.bf16.mxu1 %v2710_v0  ;;  %2463 = vmatprep.subr.bf16.mxu0 %v2750_v12  ;;  %v2805_v0 = vld [vmem:[%s2974_s4 + $0x198] ss:$28 sps:$4 sm:$0xff]   ;;  %v2820_v12 = vld [vmem:[%s2974_s4 + $0x130] ss:$28 sps:$4 sm:$0xff]  }
  0x49   : > { %2464 = vmatpush3.bf16.msra.mxu0 %v2751_v13  ;;  %v2821_v13 = vld [vmem:[%s2974_s4 + $0x27c] ss:$28 sps:$4 sm:$0xff]  }
  0x4e   : > { %1347 = vmatmul.mubr.bf16.gmra.mrb[20].mxu0 %v2712_v3  ;;  %1476 = vmatmul.mubr.bf16.gmra.mrb[20].mxu1 %v2713_v4  ;;  %v2809_v3 = vld [vmem:[%s2974_s4 + $0x1d0] ss:$28 sps:$4 sm:$0xff]  }
  0x4f   : > { %1354 = vmatprep.mubr.bf16.mxu0 %v2714_v5  ;;  %1483 = vmatprep.mubr.bf16.mxu1 %v2716_v6  ;;  %v2810_v4 = vld [vmem:[%s2974_s4 + $0x50] ss:$28 sps:$4 sm:$0xff]   ;;  %v2813_v6 = vld [vmem:[%s2974_s4 + $0x88] ss:$28 sps:$4 sm:$0xff]  }
  0x50   : > { %v2811_v5 = vld [vmem:[%s2974_s4 + $0x20c] ss:$28 sps:$4 sm:$0xff]  }
  0x56   : > { %1355 = vmatmul.mubr.bf16.gmra.mrb[24].mxu0 %v2718_v9  ;;  %1484 = vmatmul.mubr.bf16.gmra.mrb[24].mxu1 %v2719_v10  ;;  %v2816_v9 = vld [vmem:[%s2974_s4 + $0x244] ss:$28 sps:$4 sm:$0xff]   ;;  %v2818_v10 = vld [vmem:[%s2974_s4 + $0xf8] ss:$28 sps:$4 sm:$0xff]  }
  0x57   : > { %1362 = vmatprep.mubr.bf16.mxu0 %v2722_v11  ;;  %1491 = vmatprep.mubr.bf16.mxu1 %v2724_v14  ;;  %v2819_v11 = vld [vmem:[%s2974_s4 + $0x240] ss:$28 sps:$4 sm:$0xff]   ;;  %v2823_v14 = vld [vmem:[%s2974_s4 + $0x168] ss:$28 sps:$4 sm:$0xff]  }
  0x5e   : > { %1363 = vmatmul.mubr.bf16.gmra.mrb[28].mxu0 %v2726_v15  ;;  %1492 = vmatmul.mubr.bf16.gmra.mrb[28].mxu1 %v2727_v16  ;;  %v2824_v15 = vld [vmem:[%s2974_s4 + $0x278] ss:$28 sps:$4 sm:$0xff]   ;;  %v2825_v16 = vld [vmem:[%s2974_s4 + $0x1a0] ss:$28 sps:$4 sm:$0xff]  }
  0x5f   : > { %1370 = vmatprep.mubr.bf16.mxu0 %v2730_v17  ;;  %1499 = vmatprep.mubr.bf16.mxu1 %v2732_v18  ;;  %v2826_v17 = vld [vmem:[%s2974_s4 + $0x2b4] ss:$28 sps:$4 sm:$0xff]  }
  0x60   : > { %v2828_v18 = vld [vmem:[%s2974_s4 + $0x1d8] ss:$28 sps:$4 sm:$0xff]  }
  0x66   : > { %1371 = vmatmul.mubr.bf16.gmra.mrb[32].mxu0 %v2734_v19  ;;  %1500 = vmatmul.mubr.bf16.gmra.mrb[32].mxu1 %v2735_v20  ;;  %v2829_v19 = vld [vmem:[%s2974_s4 + $0x2b0] ss:$28 sps:$4 sm:$0xff]  }
  0x67   : > { %1378 = vmatprep.mubr.bf16.mxu0 %v2736_v21  ;;  %1507 = vmatprep.mubr.bf16.mxu1 %v2738_v22  ;;  %v2830_v20 = vld [vmem:[%s2974_s4 + $0x210] ss:$28 sps:$4 sm:$0xff]   ;;  %v2833_v22 = vld [vmem:[%s2974_s4 + $0x248] ss:$28 sps:$4 sm:$0xff]  }
  0x68   : > { %v2831_v21 = vld [vmem:[%s2974_s4 + $0x2ec] ss:$28 sps:$4 sm:$0xff]  }
  0x6e   : > { %1379 = vmatmul.mubr.bf16.gmra.mrb[36].mxu0 %v2740_v23  ;;  %1508 = vmatmul.mubr.bf16.gmra.mrb[36].mxu1 %v2741_v24  ;;  %v2834_v23 = vld [vmem:[%s2974_s4 + $0x2e8] ss:$28 sps:$4 sm:$0xff]   ;;  %v2835_v24 = vld [vmem:[%s2974_s4 + $0x280] ss:$28 sps:$4 sm:$0xff]  }
  0x6f   : > { %1386 = vmatprep.mubr.bf16.mxu0 %v2744_v25  ;;  %1515 = vmatprep.mubr.bf16.mxu1 %v2746_v26  ;;  %v2836_v25 = vld [vmem:[%s2974_s4 + $0x324] ss:$28 sps:$4 sm:$0xff]   ;;  %v2838_v26 = vld [vmem:[%s2974_s4 + $0x2b8] ss:$28 sps:$4 sm:$0xff]  }
  0x76   : > { %1387 = vmatmul.mubr.bf16.gmra.mrb[40].mxu0 %v2748_v27  ;;  %1516 = vmatmul.mubr.bf16.gmra.mrb[40].mxu1 %v2749_v28  ;;  %v2839_v27 = vld [vmem:[%s2974_s4 + $0x320] ss:$28 sps:$4 sm:$0xff]   ;;  %v2840_v28 = vld [vmem:[%s2974_s4 + $0x2f0] ss:$28 sps:$4 sm:$0xff]  }
  0x77   : > { %1394 = vmatprep.mubr.bf16.mxu0 %v2752_v29  ;;  %1523 = vmatprep.mubr.bf16.mxu1 %v2754_v30  ;;  %v2841_v29 = vld [vmem:[%s2974_s4 + $0x35c] ss:$28 sps:$4 sm:$0xff]   ;;  %v2843_v30 = vld [vmem:[%s2974_s4 + $0x328] ss:$28 sps:$4 sm:$0xff]  }
  0x7e   : > { %1395 = vmatmul.mubr.bf16.gmra.mrb[44].mxu0 %v2756_v31  ;;  %1524 = vmatmul.mubr.bf16.gmra.mrb[44].mxu1 %v2757_v32 }
  0x7f   : > { %1531 = vmatprep.mubr.bf16.mxu1 %v2758_v33  ;;  %1628 = vmatprep.mubr.bf16.mxu0 %v2762_v34 }
  0x86   : > { %1532 = vmatmul.mubr.bf16.gmra.mrb[48].mxu1 %v2763_v36  ;;  %1629 = vmatmul.mubr.bf16.vlgmr.msra.gmra.mrb[48].mxu0 %v2760_v35  ;;  %v2844_v35 = vld [vmem:[%s2974_s4 + $0x358] ss:$28 sps:$4 sm:$0xff]   ;;  %v2845_v36 = vld [vmem:[%s2974_s4 + $0x360] ss:$28 sps:$4 sm:$0xff]   ;;  %s2224_s4 = sshll.u32 %s3470_s10, 8 }
  0x87   : > { %1539 = vmatprep.mubr.bf16.mxu1 %v2764_v37  ;;  %1636 = vmatprep.mubr.bf16.mxu0 %v2766_v38  ;;  %s3391_s14 = scalar_lea.vmem %s3468_s2, %s2224_s4 }
  0x8e   : > { %1540 = vmatmul.mubr.bf16.gmra.mrb[52].mxu1 %v2768_v39  ;;  %1637 = vmatmul.mubr.bf16.gmra.mrb[52].mxu0 %v2769_v40 }
  0x8f   : > { %1547 = vmatprep.mubr.bf16.mxu1 %v2770_v41  ;;  %1644 = vmatprep.mubr.bf16.mxu0 %v2772_v42 }
  0x96   : > { %1548 = vmatmul.mubr.bf16.gmra.mrb[56].mxu1 %v2774_v43  ;;  %1645 = vmatmul.mubr.bf16.gmra.mrb[56].mxu0 %v2775_v44 }
  0x97   : > { %1555 = vmatprep.mubr.bf16.mxu1 %v2776_v45  ;;  %1652 = vmatprep.mubr.bf16.mxu0 %v2778_v46 }
  0x9e   : > { %1556 = vmatmul.mubr.bf16.gmra.mrb[60].mxu1 %v2780_v47  ;;  %1653 = vmatmul.mubr.bf16.gmra.mrb[60].mxu0 %v2781_v48 }
  0x9f   : > { %1563 = vmatprep.mubr.bf16.mxu1 %v2782_v49  ;;  %1660 = vmatprep.mubr.bf16.mxu0 %v2784_v50 }
  0xa6   : > { %1564 = vmatmul.mubr.bf16.gmra.mrb[64].mxu1 %v2786_v51  ;;  %1661 = vmatmul.mubr.bf16.gmra.mrb[64].mxu0 %v2787_v52 }
  0xa7   : > { %1571 = vmatprep.mubr.bf16.mxu1 %v2788_v53  ;;  %1668 = vmatprep.mubr.bf16.mxu0 %v2790_v54 }
  0xae   : > { %1572 = vmatmul.mubr.bf16.gmra.mrb[68].mxu1 %v2792_v55  ;;  %1669 = vmatmul.mubr.bf16.gmra.mrb[68].mxu0 %v2793_v56 }
  0xaf   : > { %1579 = vmatprep.mubr.bf16.mxu1 %v2794_v57  ;;  %1676 = vmatprep.mubr.bf16.mxu0 %v2796_v58 }
  0xb6   : > { %1580 = vmatmul.mubr.bf16.gmra.mrb[72].mxu1 %v2798_v59  ;;  %1677 = vmatmul.mubr.bf16.gmra.mrb[72].mxu0 %v2799_v60 }
  0xb7   : > { %1587 = vmatprep.mubr.bf16.mxu1 %v2800_v61  ;;  %1684 = vmatprep.mubr.bf16.mxu0 %v2802_v62 }
  0xbe   : > { %1588 = vmatmul.mubr.bf16.gmra.mrb[76].mxu1 %v2804_v63  ;;  %1685 = vmatmul.mubr.bf16.gmra.mrb[76].mxu0 %v2805_v0 }
  0xbf   : > { %1692 = vmatprep.mubr.bf16.mxu0 %v2806_v1  ;;  %2580 = vmatprep.mubr.msk.bf16.mxu1 %vm1225_vm0, %v2808_v2 }
  0xc6   : > { %1693 = vmatmul.mubr.bf16.gmra.mrb[80].mxu0 %v2809_v3  ;;  %2581 = vmatmul.mubr.msk.bf16.vlgmr.msra.gmra.mrb[80].mxu1 %vm1225_vm0, %v2810_v4 }
  0xc7   : > { %1700 = vmatprep.mubr.bf16.mxu0 %v2811_v5  ;;  %2584 = vmatprep.mubr.msk.bf16.mxu1 %vm1225_vm0, %v2813_v6 }
  0xce   : > { %1701 = vmatmul.mubr.bf16.gmra.mrb[84].mxu0 %v2814_v7  ;;  %2585 = vmatmul.mubr.msk.bf16.gmra.mrb[84].mxu1 %vm1225_vm0, %v2815_v8 }
  0xcf   : > { %1708 = vmatprep.mubr.bf16.mxu0 %v2816_v9  ;;  %2588 = vmatprep.mubr.msk.bf16.mxu1 %vm1225_vm0, %v2818_v10 }
  0xd6   : > { %1709 = vmatmul.mubr.bf16.gmra.mrb[88].mxu0 %v2819_v11  ;;  %2589 = vmatmul.mubr.msk.bf16.gmra.mrb[88].mxu1 %vm1225_vm0, %v2820_v12 }
  0xd7   : > { %1716 = vmatprep.mubr.bf16.mxu0 %v2821_v13  ;;  %2592 = vmatprep.mubr.msk.bf16.mxu1 %vm1225_vm0, %v2823_v14 }
  0xde   : > { %1717 = vmatmul.mubr.bf16.gmra.mrb[92].mxu0 %v2824_v15  ;;  %2593 = vmatmul.mubr.msk.bf16.gmra.mrb[92].mxu1 %vm1225_vm0, %v2825_v16 }
  0xdf   : > { %1724 = vmatprep.mubr.bf16.mxu0 %v2826_v17  ;;  %2596 = vmatprep.mubr.msk.bf16.mxu1 %vm1225_vm0, %v2828_v18 }
  0xe6   : > { %1725 = vmatmul.mubr.bf16.gmra.mrb[96].mxu0 %v2829_v19  ;;  %2597 = vmatmul.mubr.msk.bf16.gmra.mrb[96].mxu1 %vm1225_vm0, %v2830_v20 }
  0xe7   : > { %1732 = vmatprep.mubr.bf16.mxu0 %v2831_v21  ;;  %2600 = vmatprep.mubr.msk.bf16.mxu1 %vm1225_vm0, %v2833_v22 }
  0xee   : > { %1733 = vmatmul.mubr.bf16.gmra.mrb[100].mxu0 %v2834_v23  ;;  %2601 = vmatmul.mubr.msk.bf16.gmra.mrb[100].mxu1 %vm1225_vm0, %v2835_v24 }
  0xef   : > { %1740 = vmatprep.mubr.bf16.mxu0 %v2836_v25  ;;  %2604 = vmatprep.mubr.msk.bf16.mxu1 %vm1225_vm0, %v2838_v26 }
  0xf6   : > { %1741 = vmatmul.mubr.bf16.gmra.mrb[104].mxu0 %v2839_v27  ;;  %2605 = vmatmul.mubr.msk.bf16.gmra.mrb[104].mxu1 %vm1225_vm0, %v2840_v28 }
  0xf7   : > { %1748 = vmatprep.mubr.bf16.mxu0 %v2841_v29  ;;  %2608 = vmatprep.mubr.msk.bf16.mxu1 %vm1225_vm0, %v2843_v30 }
  0xf9   : > { %v2241_v31 = vpop.f32.mrb[0].mxu0  ;;  %v2313_v32 = vpop.f32.mrb[0].mxu1 }
  0xfa   : > { %v2242_v33 = vpop.f32.mrb[1].mxu0  ;;  %v2314_v34 = vpop.f32.mrb[1].mxu1 }
  0xfb   : > { %v2243_v37 = vadd.f32 %v2242_v33, %v2241_v31  ;;  %v2244_v38 = vpop.f32.mrb[2].mxu0  ;;  %v3223_v39 = vadd.f32 %v2314_v34, %v2313_v32  ;;  %v2316_v40 = vpop.f32.mrb[2].mxu1 }
  0xfc   : > { %v2245_v41 = vpop.f32.mrb[3].mxu0  ;;  %v2317_v42 = vpop.f32.mrb[3].mxu1 }
  0xfd   : > { %v2246_v43 = vadd.f32 %v2245_v41, %v2244_v38  ;;  %v3225_v44 = vadd.f32 %v2317_v42, %v2316_v40 }
  0xfe   : > { %1749 = vmatmul.mubr.bf16.gmra.mrb[108].mxu0 %v2844_v35  ;;  %2609 = vmatmul.mubr.msk.bf16.gmra.mrb[108].mxu1 %vm1225_vm0, %v2845_v36 }
 0x101   : > { %v2247_v45 = vpop.f32.mrb[4].mxu0  ;;  %v2319_v46 = vpop.f32.mrb[4].mxu1 }
 0x102   : > { %v2248_v47 = vpop.f32.mrb[5].mxu0  ;;  %v2320_v48 = vpop.f32.mrb[5].mxu1 }
 0x103   : > { %v2249_v49 = vadd.f32 %v2248_v47, %v2247_v45  ;;  %v2250_v50 = vpop.f32.mrb[6].mxu0  ;;  %v3228_v51 = vadd.f32 %v2320_v48, %v2319_v46  ;;  %v2322_v52 = vpop.f32.mrb[6].mxu1 }
 0x104   : > { %v2251_v53 = vpop.f32.mrb[7].mxu0  ;;  %v2323_v54 = vpop.f32.mrb[7].mxu1 }
 0x105   : > { %v2252_v55 = vadd.f32 %v2251_v53, %v2250_v50  ;;  %v3230_v56 = vadd.f32 %v2323_v54, %v2322_v52 }
 0x109   : > { %v2253_v57 = vpop.f32.mrb[8].mxu0  ;;  %v2325_v58 = vpop.f32.mrb[8].mxu1 }
 0x10a   : > { %v2254_v59 = vpop.f32.mrb[9].mxu0  ;;  %v2326_v60 = vpop.f32.mrb[9].mxu1 }
 0x10b   : > { %v2255_v61 = vadd.f32 %v2254_v59, %v2253_v57  ;;  %v2256_v62 = vpop.f32.mrb[10].mxu0  ;;  %v3232_v63 = vadd.f32 %v2326_v60, %v2325_v58  ;;  %v2328_v0 = vpop.f32.mrb[10].mxu1 }
 0x10c   : > { %v2257_v1 = vpop.f32.mrb[11].mxu0  ;;  %v2329_v2 = vpop.f32.mrb[11].mxu1 }
 0x10d   : > { %v2258_v3 = vadd.f32 %v2257_v1, %v2256_v62  ;;  %v3234_v4 = vadd.f32 %v2329_v2, %v2328_v0 }
 0x111   : > { %v2259_v5 = vpop.f32.mrb[12].mxu0  ;;  %v2331_v6 = vpop.f32.mrb[12].mxu1 }
 0x112   : > { %v2260_v7 = vpop.f32.mrb[13].mxu0  ;;  %v2332_v8 = vpop.f32.mrb[13].mxu1 }
 0x113   : > { %v2261_v9 = vadd.f32 %v2260_v7, %v2259_v5  ;;  %v2262_v10 = vpop.f32.mrb[14].mxu0  ;;  %v3236_v11 = vadd.f32 %v2332_v8, %v2331_v6  ;;  %v2334_v12 = vpop.f32.mrb[14].mxu1 }
 0x114   : > { %v2263_v13 = vpop.f32.mrb[15].mxu0  ;;  %v2335_v14 = vpop.f32.mrb[15].mxu1 }
 0x115   : > { %v2264_v15 = vadd.f32 %v2263_v13, %v2262_v10  ;;  %v3238_v16 = vadd.f32 %v2335_v14, %v2334_v12 }
 0x119   : > { %v2265_v17 = vpop.f32.mrb[16].mxu0  ;;  %v2353_v18 = vpop.f32.mrb[16].mxu1 }
 0x11a   : > { %v2266_v19 = vpop.f32.mrb[17].mxu0  ;;  %v2354_v20 = vpop.f32.mrb[17].mxu1 }
 0x11b   : > { %v2267_v21 = vadd.f32 %v2266_v19, %v2265_v17  ;;  %v2355_v22 = vadd.f32 %v2354_v20, %v2353_v18  ;;  %v2268_v23 = vpop.f32.mrb[18].mxu0  ;;  %v2356_v24 = vpop.f32.mrb[18].mxu1 }
 0x11c   : > { %v2269_v25 = vpop.f32.mrb[19].mxu0  ;;  %v2357_v26 = vpop.f32.mrb[19].mxu1 }
 0x11d   : > { %v3240_v27 = vadd.f32 %v2355_v22, %v2243_v37  ;;  %v2270_v28 = vadd.f32 %v2269_v25, %v2268_v23  ;;  %v2358_v29 = vadd.f32 %v2357_v26, %v2356_v24 }
 0x11f   : > { %v3242_v30 = vadd.f32 %v2358_v29, %v2246_v43 }
 0x121   : > { %v2271_v31 = vpop.f32.mrb[20].mxu0  ;;  %v2359_v32 = vpop.f32.mrb[20].mxu1 }
 0x122   : > { %v2272_v33 = vpop.f32.mrb[21].mxu0  ;;  %v2360_v34 = vpop.f32.mrb[21].mxu1 }
 0x123   : > { %v2273_v35 = vadd.f32 %v2272_v33, %v2271_v31  ;;  %v2361_v36 = vadd.f32 %v2360_v34, %v2359_v32  ;;  %v2274_v38 = vpop.f32.mrb[22].mxu0  ;;  %v2362_v40 = vpop.f32.mrb[22].mxu1 }
 0x124   : > { %v2275_v41 = vpop.f32.mrb[23].mxu0  ;;  %v2363_v42 = vpop.f32.mrb[23].mxu1 }
 0x125   : > { %v3244_v45 = vadd.f32 %v2361_v36, %v2249_v49  ;;  %v2276_v46 = vadd.f32 %v2275_v41, %v2274_v38  ;;  %v2364_v47 = vadd.f32 %v2363_v42, %v2362_v40 }
 0x127   : > { %v3246_v37 = vadd.f32 %v2364_v47, %v2252_v55 }
 0x129   : > { %v2277_v48 = vpop.f32.mrb[24].mxu0  ;;  %v2365_v50 = vpop.f32.mrb[24].mxu1 }
 0x12a   : > { %v2278_v43 = vpop.f32.mrb[25].mxu0  ;;  %v2366_v52 = vpop.f32.mrb[25].mxu1 }
 0x12b   : > { %v2279_v53 = vadd.f32 %v2278_v43, %v2277_v48  ;;  %v2367_v54 = vadd.f32 %v2366_v52, %v2365_v50  ;;  %v2280_v57 = vpop.f32.mrb[26].mxu0  ;;  %v2368_v58 = vpop.f32.mrb[26].mxu1 }
 0x12c   : > { %v2281_v59 = vpop.f32.mrb[27].mxu0  ;;  %v2369_v60 = vpop.f32.mrb[27].mxu1 }
 0x12d   : > { %v3248_v62 = vadd.f32 %v2367_v54, %v2255_v61  ;;  %v2282_v0 = vadd.f32 %v2281_v59, %v2280_v57  ;;  %v2370_v1 = vadd.f32 %v2369_v60, %v2368_v58 }
 0x12f   : > { %v3250_v49 = vadd.f32 %v2370_v1, %v2258_v3 }
 0x131   : > { %v2283_v2 = vpop.f32.mrb[28].mxu0  ;;  %v2371_v5 = vpop.f32.mrb[28].mxu1 }
 0x132   : > { %v2284_v55 = vpop.f32.mrb[29].mxu0  ;;  %v2372_v6 = vpop.f32.mrb[29].mxu1 }
 0x133   : > { %v2285_v7 = vadd.f32 %v2284_v55, %v2283_v2  ;;  %v2373_v8 = vadd.f32 %v2372_v6, %v2371_v5  ;;  %v2286_v10 = vpop.f32.mrb[30].mxu0  ;;  %v2374_v12 = vpop.f32.mrb[30].mxu1 }
 0x134   : > { %v2287_v13 = vpop.f32.mrb[31].mxu0  ;;  %v2375_v14 = vpop.f32.mrb[31].mxu1 }
 0x135   : > { %v3252_v17 = vadd.f32 %v2373_v8, %v2261_v9  ;;  %v2288_v18 = vadd.f32 %v2287_v13, %v2286_v10  ;;  %v2376_v19 = vadd.f32 %v2375_v14, %v2374_v12 }
 0x137   : > { %v3254_v61 = vadd.f32 %v2376_v19, %v2264_v15 }
 0x139   : > { %v2289_v20 = vpop.f32.mrb[32].mxu0  ;;  %v2377_v22 = vpop.f32.mrb[32].mxu1 }
 0x13a   : > { %v2290_v3 = vpop.f32.mrb[33].mxu0  ;;  %v2378_v23 = vpop.f32.mrb[33].mxu1 }
 0x13b   : > { %v2291_v24 = vadd.f32 %v2290_v3, %v2289_v20  ;;  %v2379_v25 = vadd.f32 %v2378_v23, %v2377_v22  ;;  %v2292_v26 = vpop.f32.mrb[34].mxu0  ;;  %v2380_v29 = vpop.f32.mrb[34].mxu1 }
 0x13c   : > { %v2293_v31 = vpop.f32.mrb[35].mxu0  ;;  %v2381_v32 = vpop.f32.mrb[35].mxu1 }
 0x13d   : > { %v3256_v33 = vadd.f32 %v2379_v25, %v2267_v21  ;;  %v2294_v34 = vadd.f32 %v2293_v31, %v2292_v26  ;;  %v2382_v36 = vadd.f32 %v2381_v32, %v2380_v29 }
 0x13f   : > { %v3258_v9 = vadd.f32 %v2382_v36, %v2270_v28 }
 0x141   : > { %v2295_v38 = vpop.f32.mrb[36].mxu0  ;;  %v2383_v40 = vpop.f32.mrb[36].mxu1 }
 0x142   : > { %v2296_v15 = vpop.f32.mrb[37].mxu0  ;;  %v2384_v41 = vpop.f32.mrb[37].mxu1 }
 0x143   : > { %v3260_v42 = vadd.f32 %v2296_v15, %v2295_v38  ;;  %v2385_v47 = vadd.f32 %v2384_v41, %v2383_v40  ;;  %v2298_v48 = vpop.f32.mrb[38].mxu0  ;;  %v2386_v50 = vpop.f32.mrb[38].mxu1 }
 0x144   : > { %v2299_v43 = vpop.f32.mrb[39].mxu0  ;;  %v2387_v52 = vpop.f32.mrb[39].mxu1 }
 0x145   : > { %v3262_v54 = vadd.f32 %v2385_v47, %v2273_v35  ;;  %v2300_v57 = vadd.f32 %v2299_v43, %v2298_v48  ;;  %v2388_v21 = vadd.f32 %v2387_v52, %v2386_v50 }
 0x147   : > { %v3264_v58 = vadd.f32 %v2388_v21, %v2276_v46 }
 0x149   : > { %v2301_v59 = vpop.f32.mrb[40].mxu0  ;;  %v2389_v28 = vpop.f32.mrb[40].mxu1 }
 0x14a   : > { %v2302_v60 = vpop.f32.mrb[41].mxu0  ;;  %v2390_v1 = vpop.f32.mrb[41].mxu1 }
 0x14b   : > { %v3266_v2 = vadd.f32 %v2302_v60, %v2301_v59  ;;  %v2391_v5 = vadd.f32 %v2390_v1, %v2389_v28  ;;  %v2304_v55 = vpop.f32.mrb[42].mxu0  ;;  %v2392_v6 = vpop.f32.mrb[42].mxu1 }
 0x14c   : > { %v2305_v8 = vpop.f32.mrb[43].mxu0  ;;  %v2393_v10 = vpop.f32.mrb[43].mxu1 }
 0x14d   : > { %v3268_v12 = vadd.f32 %v2391_v5, %v2279_v53  ;;  %v3270_v13 = vadd.f32 %v2305_v8, %v2304_v55  ;;  %v2394_v35 = vadd.f32 %v2393_v10, %v2392_v6 }
 0x14f   : > { %v3272_v14 = vadd.f32 %v2394_v35, %v2282_v0 }
 0x151   : > { %v2307_v46 = vpop.f32.mrb[44].mxu0  ;;  %v2395_v19 = vpop.f32.mrb[44].mxu1 }
 0x152   : > { %v2308_v20 = vpop.f32.mrb[45].mxu0  ;;  %v2396_v22 = vpop.f32.mrb[45].mxu1 }
 0x153   : > { %v3274_v3 = vadd.f32 %v2308_v20, %v2307_v46  ;;  %v2397_v23 = vadd.f32 %v2396_v22, %v2395_v19  ;;  %v2310_v25 = vpop.f32.mrb[46].mxu0  ;;  %v2398_v26 = vpop.f32.mrb[46].mxu1 }
 0x154   : > { %v2311_v29 = vpop.f32.mrb[47].mxu0  ;;  %v2399_v31 = vpop.f32.mrb[47].mxu1 }
 0x155   : > { %v3276_v32 = vadd.f32 %v2397_v23, %v2285_v7  ;;  %v3278_v53 = vadd.f32 %v2311_v29, %v2310_v25  ;;  %v2400_v36 = vadd.f32 %v2399_v31, %v2398_v26 }
 0x157   : > { %v3280_v38 = vadd.f32 %v2400_v36, %v2288_v18 }
 0x159   : > { %v2401_v0 = vpop.f32.mrb[48].mxu1  ;;  %v2465_v40 = vpop.f32.mrb[48].mxu0 }
 0x15a   : > { %v2402_v15 = vpop.f32.mrb[49].mxu1  ;;  %v2466_v41 = vpop.f32.mrb[49].mxu0 }
 0x15b   : > { %v2403_v47 = vadd.f32 %v2402_v15, %v2401_v0  ;;  %v2467_v48 = vadd.f32 %v2466_v41, %v2465_v40  ;;  %v2404_v50 = vpop.f32.mrb[50].mxu1  ;;  %v2468_v43 = vpop.f32.mrb[50].mxu0 }
 0x15c   : > { %v2405_v52 = vpop.f32.mrb[51].mxu1  ;;  %v2469_v21 = vpop.f32.mrb[51].mxu0 }
 0x15d   : > { %v3282_v59 = vadd.f32 %v2403_v47, %v2291_v24  ;;  %v2406_v28 = vadd.f32 %v2405_v52, %v2404_v50  ;;  %v2470_v7 = vadd.f32 %v2469_v21, %v2468_v43  ;;  %v3285_v60 = vadd.f32 %v2467_v48, %v3240_v27 }
 0x15f   : > { %v3287_v1 = vadd.f32 %v2406_v28, %v2294_v34  ;;  %v3290_v18 = vadd.f32 %v2470_v7, %v3242_v30 }
 0x161   : > { %v2407_v5 = vpop.f32.mrb[52].mxu1  ;;  %v2471_v55 = vpop.f32.mrb[52].mxu0 }
 0x162   : > { %v2408_v6 = vpop.f32.mrb[53].mxu1  ;;  %v2472_v8 = vpop.f32.mrb[53].mxu0 }
 0x163   : > { %v2409_v10 = vadd.f32 %v2408_v6, %v2407_v5  ;;  %v2473_v35 = vadd.f32 %v2472_v8, %v2471_v55  ;;  %v2410_v46 = vpop.f32.mrb[54].mxu1  ;;  %v2474_v19 = vpop.f32.mrb[54].mxu0 }
 0x164   : > { %v2411_v24 = vpop.f32.mrb[55].mxu1  ;;  %v2475_v20 = vpop.f32.mrb[55].mxu0 }
 0x165   : > { %v3293_v22 = vadd.f32 %v2409_v10, %v3260_v42  ;;  %v2412_v27 = vadd.f32 %v2411_v24, %v2410_v46  ;;  %v2476_v23 = vadd.f32 %v2475_v20, %v2474_v19  ;;  %v3296_v34 = vadd.f32 %v2473_v35, %v3244_v45 }
 0x167   : > { %v3298_v30 = vadd.f32 %v2412_v27, %v2300_v57  ;;  %v3301_v25 = vadd.f32 %v2476_v23, %v3246_v37 }
 0x169   : > { %v2413_v26 = vpop.f32.mrb[56].mxu1  ;;  %v2477_v29 = vpop.f32.mrb[56].mxu0 }
 0x16a   : > { %v2414_v31 = vpop.f32.mrb[57].mxu1  ;;  %v2478_v36 = vpop.f32.mrb[57].mxu0 }
 0x16b   : > { %v2415_v0 = vadd.f32 %v2414_v31, %v2413_v26  ;;  %v2479_v40 = vadd.f32 %v2478_v36, %v2477_v29  ;;  %v2416_v15 = vpop.f32.mrb[58].mxu1  ;;  %v2480_v41 = vpop.f32.mrb[58].mxu0 }
 0x16c   : > { %v2417_v42 = vpop.f32.mrb[59].mxu1  ;;  %v2481_v47 = vpop.f32.mrb[59].mxu0 }
 0x16d   : > { %v3304_v48 = vadd.f32 %v2415_v0, %v3266_v2  ;;  %v2418_v45 = vadd.f32 %v2417_v42, %v2416_v15  ;;  %v2482_v50 = vadd.f32 %v2481_v47, %v2480_v41  ;;  %v3307_v57 = vadd.f32 %v2479_v40, %v3248_v62 }
 0x16f   : > { %v3310_v37 = vadd.f32 %v2418_v45, %v3270_v13  ;;  %v3313_v43 = vadd.f32 %v2482_v50, %v3250_v49 }
 0x171   : > { %v2419_v52 = vpop.f32.mrb[60].mxu1  ;;  %v2483_v21 = vpop.f32.mrb[60].mxu0 }
 0x172   : > { %v2420_v28 = vpop.f32.mrb[61].mxu1  ;;  %v2484_v7 = vpop.f32.mrb[61].mxu0 }
 0x173   : > { %v2421_v5 = vadd.f32 %v2420_v28, %v2419_v52  ;;  %v2485_v55 = vadd.f32 %v2484_v7, %v2483_v21  ;;  %v2422_v6 = vpop.f32.mrb[62].mxu1  ;;  %v2486_v2 = vpop.f32.mrb[62].mxu0 }
 0x174   : > { %v2423_v8 = vpop.f32.mrb[63].mxu1  ;;  %v2487_v10 = vpop.f32.mrb[63].mxu0 }
 0x175   : > { %v3316_v35 = vadd.f32 %v2421_v5, %v3274_v3  ;;  %v2424_v62 = vadd.f32 %v2423_v8, %v2422_v6  ;;  %v2488_v46 = vadd.f32 %v2487_v10, %v2486_v2  ;;  %v3319_v13 = vadd.f32 %v2485_v55, %v3252_v17 }
 0x177   : > { %v3322_v49 = vadd.f32 %v2424_v62, %v3278_v53  ;;  %v3325_v19 = vadd.f32 %v2488_v46, %v3254_v61 }
 0x179   : > { %v2425_v24 = vpop.f32.mrb[64].mxu1  ;;  %v2489_v20 = vpop.f32.mrb[64].mxu0 }
 0x17a   : > { %v2426_v27 = vpop.f32.mrb[65].mxu1  ;;  %v2490_v23 = vpop.f32.mrb[65].mxu0 }
 0x17b   : > { %v2427_v26 = vadd.f32 %v2426_v27, %v2425_v24  ;;  %v2491_v29 = vadd.f32 %v2490_v23, %v2489_v20  ;;  %v2428_v31 = vpop.f32.mrb[66].mxu1  ;;  %v2492_v3 = vpop.f32.mrb[66].mxu0 }
 0x17c   : > { %v2429_v36 = vpop.f32.mrb[67].mxu1  ;;  %v2493_v0 = vpop.f32.mrb[67].mxu0 }
 0x17d   : > { %v3328_v40 = vadd.f32 %v2427_v26, %v3223_v39  ;;  %v2430_v17 = vadd.f32 %v2429_v36, %v2428_v31  ;;  %v2494_v15 = vadd.f32 %v2493_v0, %v2492_v3  ;;  %v3331_v53 = vadd.f32 %v2491_v29, %v3256_v33 }
 0x17f   : > { %v3334_v61 = vadd.f32 %v2430_v17, %v3225_v44  ;;  %v3337_v41 = vadd.f32 %v2494_v15, %v3258_v9 }
 0x181   : > { %v2431_v42 = vpop.f32.mrb[68].mxu1  ;;  %v2495_v47 = vpop.f32.mrb[68].mxu0 }
 0x182   : > { %v2432_v45 = vpop.f32.mrb[69].mxu1  ;;  %v2496_v50 = vpop.f32.mrb[69].mxu0 }
 0x183   : > { %v2433_v52 = vadd.f32 %v2432_v45, %v2431_v42  ;;  %v2497_v21 = vadd.f32 %v2496_v50, %v2495_v47  ;;  %v2434_v28 = vpop.f32.mrb[70].mxu1  ;;  %v2498_v39 = vpop.f32.mrb[70].mxu0 }
 0x184   : > { %v2435_v7 = vpop.f32.mrb[71].mxu1  ;;  %v2499_v5 = vpop.f32.mrb[71].mxu0 }
 0x185   : > { %v3340_v55 = vadd.f32 %v2433_v52, %v3228_v51  ;;  %v2436_v33 = vadd.f32 %v2435_v7, %v2434_v28  ;;  %v2500_v6 = vadd.f32 %v2499_v5, %v2498_v39  ;;  %v3343_v44 = vadd.f32 %v2497_v21, %v3262_v54 }
 0x187   : > { %v3346_v9 = vadd.f32 %v2436_v33, %v3230_v56  ;;  %v3349_v2 = vadd.f32 %v2500_v6, %v3264_v58 }
 0x189   : > { %v2437_v8 = vpop.f32.mrb[72].mxu1  ;;  %v2501_v10 = vpop.f32.mrb[72].mxu0 }
 0x18a   : > { %v2438_v62 = vpop.f32.mrb[73].mxu1  ;;  %v2502_v46 = vpop.f32.mrb[73].mxu0 }
 0x18b   : > { %v2439_v24 = vadd.f32 %v2438_v62, %v2437_v8  ;;  %v2503_v20 = vadd.f32 %v2502_v46, %v2501_v10  ;;  %v2440_v27 = vpop.f32.mrb[74].mxu1  ;;  %v2504_v51 = vpop.f32.mrb[74].mxu0 }
 0x18c   : > { %v2441_v23 = vpop.f32.mrb[75].mxu1  ;;  %v2505_v26 = vpop.f32.mrb[75].mxu0 }
 0x18d   : > { %v3352_v29 = vadd.f32 %v2439_v24, %v3232_v63  ;;  %v2442_v54 = vadd.f32 %v2441_v23, %v2440_v27  ;;  %v2506_v31 = vadd.f32 %v2505_v26, %v2504_v51  ;;  %v3355_v56 = vadd.f32 %v2503_v20, %v3268_v12 }
 0x18f   : > { %v3358_v58 = vadd.f32 %v2442_v54, %v3234_v4  ;;  %v3361_v3 = vadd.f32 %v2506_v31, %v3272_v14 }
 0x191   : > { %v2443_v36 = vpop.f32.mrb[76].mxu1  ;;  %v2507_v0 = vpop.f32.mrb[76].mxu0 }
 0x192   : > { %v2444_v17 = vpop.f32.mrb[77].mxu1  ;;  %v2508_v15 = vpop.f32.mrb[77].mxu0 }
 0x193   : > { %v2445_v42 = vadd.f32 %v2444_v17, %v2443_v36  ;;  %v2509_v47 = vadd.f32 %v2508_v15, %v2507_v0  ;;  %v2446_v45 = vpop.f32.mrb[78].mxu1  ;;  %v2510_v63 = vpop.f32.mrb[78].mxu0 }
 0x194   : > { %v2447_v50 = vpop.f32.mrb[79].mxu1  ;;  %v2511_v52 = vpop.f32.mrb[79].mxu0 }
 0x195   : > { %v3364_v21 = vadd.f32 %v2445_v42, %v3236_v11  ;;  %v2448_v12 = vadd.f32 %v2447_v50, %v2446_v45  ;;  %v2512_v28 = vadd.f32 %v2511_v52, %v2510_v63  ;;  %v3367_v4 = vadd.f32 %v2509_v47, %v3276_v32 }
 0x197   : > { %v3370_v14 = vadd.f32 %v2448_v12, %v3238_v16  ;;  %v3373_v39 = vadd.f32 %v2512_v28, %v3280_v38 }
 0x199   : > { %v2513_v7 = vpop.f32.mrb[80].mxu0  ;;  %v2582_v5 = vpop.f32.mrb[80].mxu1 }
 0x19a   : > { %v1800_v33 = vadd.f32 %v2582_v5, %v3296_v34  ;;  %v2514_v6 = vpop.f32.mrb[81].mxu0  ;;  %v1791_v8 = vpop.f32.mrb[81].mxu1 }
 0x19b   : > { %v2515_v11 = vadd.f32 %v2514_v6, %v2513_v7  ;;  %v1792_v10 = vadd.f32 %v1791_v8, %v3285_v60  ;;  %v2516_v62 = vpop.f32.mrb[82].mxu0  ;;  %v2583_v46 = vpop.f32.mrb[82].mxu1 }
 0x19c   : > { %2846 = vtanh.f32 %v1800_v33  ;;  %v1803_v32 = vadd.f32 %v2583_v46, %v3301_v25  ;;  %v2517_v16 = vpop.f32.mrb[83].mxu0  ;;  %v1794_v24 = vpop.f32.mrb[83].mxu1 }
 0x19d   : > { %2848 = vtanh.f32 %v1792_v10  ;;  %v2518_v38 = vadd.f32 %v2517_v16, %v2516_v62  ;;  %v1795_v20 = vadd.f32 %v1794_v24, %v3290_v18  ;;  %v3380_v27 = vadd.f32 %v2515_v11, %v3282_v59 }
 0x19e   : > { %2850 = vtanh.f32 %v1803_v32 }
 0x19f   : > { %2852 = vtanh.f32 %v1795_v20  ;;  %v3383_v34 = vadd.f32 %v2518_v38, %v3287_v1 }
 0x1a1   : > { %v2519_v60 = vpop.f32.mrb[84].mxu0  ;;  %v2586_v51 = vpop.f32.mrb[84].mxu1 }
 0x1a2   : > { %v1816_v23 = vadd.f32 %v2586_v51, %v3319_v13  ;;  %v2520_v25 = vpop.f32.mrb[85].mxu0  ;;  %v1807_v26 = vpop.f32.mrb[85].mxu1 }
 0x1a3   : > { %v2521_v54 = vadd.f32 %v2520_v25, %v2519_v60  ;;  %v1808_v31 = vadd.f32 %v1807_v26, %v3307_v57  ;;  %v2522_v36 = vpop.f32.mrb[86].mxu0  ;;  %v2587_v18 = vpop.f32.mrb[86].mxu1 }
 0x1a4   : > { %2854 = vtanh.f32 %v1816_v23  ;;  %v1819_v59 = vadd.f32 %v2587_v18, %v3325_v19  ;;  %v2523_v1 = vpop.f32.mrb[87].mxu0  ;;  %v1810_v13 = vpop.f32.mrb[87].mxu1 }
 0x1a5   : > { %2856 = vtanh.f32 %v1808_v31  ;;  %v2524_v0 = vadd.f32 %v2523_v1, %v2522_v36  ;;  %v1811_v57 = vadd.f32 %v1810_v13, %v3313_v43  ;;  %v3396_v17 = vadd.f32 %v2521_v54, %v3293_v22 }
 0x1a6   : > { %v2847_v15 = vpop.eup %2846  ;;  %2858 = vtanh.f32 %v1819_v59 }
 0x1a7   : > { %v2849_v42 = vpop.eup %2848  ;;  %1952 = vst [vmem:[%s3391_s14 + $0x10] sm:$0xff] %v2847_v15  ;;  %2860 = vtanh.f32 %v1811_v57  ;;  %v3400_v47 = vadd.f32 %v2524_v0, %v3298_v30 }
 0x1a8   : > { %v2851_v19 = vpop.eup %2850  ;;  %1950 = vst [vmem:[%s3391_s14] sm:$0xff] %v2849_v42 }
 0x1a9   : > { %v2853_v45 = vpop.eup %2852  ;;  %1953 = vst [vmem:[%s3391_s14 + $0x18] sm:$0xff] %v2851_v19  ;;  %v2525_v63 = vpop.f32.mrb[88].mxu0 }
 0x1aa   : > { %v2590_v50 = vpop.f32.mrb[88].mxu1  ;;  %1951 = vst [vmem:[%s3391_s14 + $0x8] sm:$0xff] %v2853_v45  ;;  %v2526_v52 = vpop.f32.mrb[89].mxu0 }
 0x1ab   : > { %v1832_v43 = vadd.f32 %v2590_v50, %v3343_v44  ;;  %v1823_v22 = vpop.f32.mrb[89].mxu1  ;;  %v2527_v12 = vadd.f32 %v2526_v52, %v2525_v63  ;;  %v2528_v7 = vpop.f32.mrb[90].mxu0 }
 0x1ac   : > { %v1824_v28 = vadd.f32 %v1823_v22, %v3331_v53  ;;  %v2591_v5 = vpop.f32.mrb[90].mxu1  ;;  %v2529_v33 = vpop.f32.mrb[91].mxu0 }
 0x1ad   : > { %2862 = vtanh.f32 %v1832_v43  ;;  %v1835_v30 = vadd.f32 %v2591_v5, %v3349_v2  ;;  %v1826_v6 = vpop.f32.mrb[91].mxu1  ;;  %v2530_v8 = vadd.f32 %v2529_v33, %v2528_v7  ;;  %v3410_v11 = vadd.f32 %v2527_v12, %v3304_v48 }
 0x1ae   : > { %2864 = vtanh.f32 %v1824_v28  ;;  %v1827_v44 = vadd.f32 %v1826_v6, %v3337_v41  ;;  %v2855_v10 = vpop.eup %2854 }
 0x1af   : > { %2866 = vtanh.f32 %v1835_v30  ;;  %v2857_v53 = vpop.eup %2856  ;;  %1956 = vst [vmem:[%s3391_s14 + $0x30] sm:$0xff] %v2855_v10  ;;  %v3414_v62 = vadd.f32 %v2530_v8, %v3310_v37 }
 0x1b0   : > { %2868 = vtanh.f32 %v1827_v44  ;;  %v2859_v2 = vpop.eup %2858  ;;  %1954 = vst [vmem:[%s3391_s14 + $0x20] sm:$0xff] %v2857_v53 }
 0x1b1   : > { %v2861_v46 = vpop.eup %2860  ;;  %1957 = vst [vmem:[%s3391_s14 + $0x38] sm:$0xff] %v2859_v2  ;;  %v2531_v32 = vpop.f32.mrb[92].mxu0 }
 0x1b2   : > { %v2594_v16 = vpop.f32.mrb[92].mxu1  ;;  %1955 = vst [vmem:[%s3391_s14 + $0x28] sm:$0xff] %v2861_v46  ;;  %v2532_v24 = vpop.f32.mrb[93].mxu0 }
 0x1b3   : > { %v1848_v41 = vadd.f32 %v2594_v16, %v3367_v4  ;;  %v1839_v48 = vpop.f32.mrb[93].mxu1  ;;  %v2533_v38 = vadd.f32 %v2532_v24, %v2531_v32  ;;  %v2534_v60 = vpop.f32.mrb[94].mxu0 }
 0x1b4   : > { %v1840_v20 = vadd.f32 %v1839_v48, %v3355_v56  ;;  %v2595_v51 = vpop.f32.mrb[94].mxu1  ;;  %v2535_v23 = vpop.f32.mrb[95].mxu0 }
 0x1b5   : > { %2870 = vtanh.f32 %v1848_v41  ;;  %v1851_v37 = vadd.f32 %v2595_v51, %v3373_v39  ;;  %v1842_v25 = vpop.f32.mrb[95].mxu1  ;;  %v2536_v26 = vadd.f32 %v2535_v23, %v2534_v60  ;;  %v1719_v54 = vadd.f32 %v2533_v38, %v3316_v35 }
 0x1b6   : > { %2872 = vtanh.f32 %v1840_v20  ;;  %v1843_v4 = vadd.f32 %v1842_v25, %v3361_v3 }
 0x1b7   : > { %v2863_v31 = vpop.eup %2862  ;;  %2874 = vtanh.f32 %v1851_v37  ;;  %v1722_v56 = vadd.f32 %v2536_v26, %v3322_v49 }
 0x1b8   : > { %v2865_v36 = vpop.eup %2864  ;;  %1960 = vst [vmem:[%s3391_s14 + $0x50] sm:$0xff] %v2863_v31  ;;  %2876 = vtanh.f32 %v1843_v4 }
 0x1b9   : > { %v2867_v18 = vpop.eup %2866  ;;  %1958 = vst [vmem:[%s3391_s14 + $0x40] sm:$0xff] %v2865_v36  ;;  %v2537_v59 = vpop.f32.mrb[96].mxu0 }
 0x1ba   : > { %v2869_v39 = vpop.eup %2868  ;;  %1961 = vst [vmem:[%s3391_s14 + $0x58] sm:$0xff] %v2867_v18  ;;  %v2598_v1 = vpop.f32.mrb[96].mxu1 }
 0x1bb   : > { %1959 = vst [vmem:[%s3391_s14 + $0x48] sm:$0xff] %v2869_v39  ;;  %v1864_v13 = vadd.f32 %v2598_v1, %v3396_v17  ;;  %v2538_v0 = vpop.f32.mrb[97].mxu0  ;;  %v1855_v3 = vpop.f32.mrb[97].mxu1 }
 0x1bc   : > { %v2539_v35 = vadd.f32 %v2538_v0, %v2537_v59  ;;  %v1856_v57 = vadd.f32 %v1855_v3, %v3380_v27  ;;  %v2540_v15 = vpop.f32.mrb[98].mxu0  ;;  %v2599_v42 = vpop.f32.mrb[98].mxu1 }
 0x1bd   : > { %2878 = vtanh.f32 %v1864_v13  ;;  %v1867_v49 = vadd.f32 %v2599_v42, %v3400_v47  ;;  %v2541_v19 = vpop.f32.mrb[99].mxu0  ;;  %v1858_v45 = vpop.f32.mrb[99].mxu1 }
 0x1be   : > { %2880 = vtanh.f32 %v1856_v57  ;;  %v2542_v63 = vadd.f32 %v2541_v19, %v2540_v15  ;;  %v1859_v17 = vadd.f32 %v1858_v45, %v3383_v34  ;;  %v1727_v50 = vadd.f32 %v2539_v35, %v3328_v40 }
 0x1bf   : > { %v2871_v43 = vpop.eup %2870  ;;  %2882 = vtanh.f32 %v1867_v49 }
 0x1c0   : > { %v2873_v52 = vpop.eup %2872  ;;  %1964 = vst [vmem:[%s3391_s14 + $0x70] sm:$0xff] %v2871_v43  ;;  %2884 = vtanh.f32 %v1859_v17  ;;  %v1730_v27 = vadd.f32 %v2542_v63, %v3334_v61 }
 0x1c1   : > { %v2875_v22 = vpop.eup %2874  ;;  %1962 = vst [vmem:[%s3391_s14 + $0x60] sm:$0xff] %v2873_v52  ;;  %v2543_v12 = vpop.f32.mrb[100].mxu0 }
 0x1c2   : > { %v2877_v47 = vpop.eup %2876  ;;  %1965 = vst [vmem:[%s3391_s14 + $0x78] sm:$0xff] %v2875_v22  ;;  %v2602_v28 = vpop.f32.mrb[100].mxu1 }
 0x1c3   : > { %1963 = vst [vmem:[%s3391_s14 + $0x68] sm:$0xff] %v2877_v47  ;;  %v1880_v7 = vadd.f32 %v2602_v28, %v1719_v54  ;;  %v2544_v5 = vpop.f32.mrb[101].mxu0  ;;  %v1871_v30 = vpop.f32.mrb[101].mxu1 }
 0x1c4   : > { %v2545_v34 = vadd.f32 %v2544_v5, %v2543_v12  ;;  %v1872_v40 = vadd.f32 %v1871_v30, %v3410_v11  ;;  %v2546_v33 = vpop.f32.mrb[102].mxu0  ;;  %v2603_v6 = vpop.f32.mrb[102].mxu1 }
 0x1c5   : > { %2886 = vtanh.f32 %v1880_v7  ;;  %v1883_v8 = vadd.f32 %v2603_v6, %v1722_v56  ;;  %v2547_v61 = vpop.f32.mrb[103].mxu0  ;;  %v1874_v44 = vpop.f32.mrb[103].mxu1 }
 0x1c6   : > { %2888 = vtanh.f32 %v1872_v40  ;;  %v2548_v10 = vadd.f32 %v2547_v61, %v2546_v33  ;;  %v1875_v53 = vadd.f32 %v1874_v44, %v3414_v62  ;;  %v1735_v2 = vadd.f32 %v2545_v34, %v3340_v55 }
 0x1c7   : > { %v2879_v46 = vpop.eup %2878  ;;  %2890 = vtanh.f32 %v1883_v8 }
 0x1c8   : > { %v2881_v32 = vpop.eup %2880  ;;  %1968 = vst [vmem:[%s3391_s14 + $0x90] sm:$0xff] %v2879_v46  ;;  %2892 = vtanh.f32 %v1875_v53  ;;  %v1738_v11 = vadd.f32 %v2548_v10, %v3346_v9 }
 0x1c9   : > { %v2883_v16 = vpop.eup %2882  ;;  %1966 = vst [vmem:[%s3391_s14 + $0x80] sm:$0xff] %v2881_v32  ;;  %v2549_v24 = vpop.f32.mrb[104].mxu0 }
 0x1ca   : > { %v2885_v41 = vpop.eup %2884  ;;  %1969 = vst [vmem:[%s3391_s14 + $0x98] sm:$0xff] %v2883_v16  ;;  %v2606_v48 = vpop.f32.mrb[104].mxu1 }
 0x1cb   : > { %1967 = vst [vmem:[%s3391_s14 + $0x88] sm:$0xff] %v2885_v41  ;;  %v1896_v38 = vadd.f32 %v2606_v48, %v1735_v2  ;;  %v2550_v20 = vpop.f32.mrb[105].mxu0  ;;  %v1887_v60 = vpop.f32.mrb[105].mxu1 }
 0x1cc   : > { %v2551_v62 = vadd.f32 %v2550_v20, %v2549_v24  ;;  %v1888_v55 = vadd.f32 %v1887_v60, %v1727_v50  ;;  %v2552_v51 = vpop.f32.mrb[106].mxu0  ;;  %v2607_v37 = vpop.f32.mrb[106].mxu1 }
 0x1cd   : > { %2894 = vtanh.f32 %v1896_v38  ;;  %v1899_v23 = vadd.f32 %v2607_v37, %v1738_v11  ;;  %v2553_v9 = vpop.f32.mrb[107].mxu0  ;;  %v1890_v25 = vpop.f32.mrb[107].mxu1 }
 0x1ce   : > { %2896 = vtanh.f32 %v1888_v55  ;;  %v2554_v26 = vadd.f32 %v2553_v9, %v2552_v51  ;;  %v1891_v4 = vadd.f32 %v1890_v25, %v1730_v27  ;;  %v1743_v54 = vadd.f32 %v2551_v62, %v3352_v29 }
 0x1cf   : > { %v2887_v31 = vpop.eup %2886  ;;  %2898 = vtanh.f32 %v1899_v23 }
 0x1d0   : > { %v2889_v36 = vpop.eup %2888  ;;  %1972 = vst [vmem:[%s3391_s14 + $0xb0] sm:$0xff] %v2887_v31  ;;  %2900 = vtanh.f32 %v1891_v4  ;;  %v1746_v56 = vadd.f32 %v2554_v26, %v3358_v58 }
 0x1d1   : > { %v2891_v18 = vpop.eup %2890  ;;  %1970 = vst [vmem:[%s3391_s14 + $0xa0] sm:$0xff] %v2889_v36  ;;  %v2555_v59 = vpop.f32.mrb[108].mxu0 }
 0x1d2   : > { %v2893_v39 = vpop.eup %2892  ;;  %1973 = vst [vmem:[%s3391_s14 + $0xb8] sm:$0xff] %v2891_v18  ;;  %v2610_v1 = vpop.f32.mrb[108].mxu1 }
 0x1d3   : > { %1971 = vst [vmem:[%s3391_s14 + $0xa8] sm:$0xff] %v2893_v39  ;;  %v2556_v13 = vpop.f32.mrb[109].mxu0  ;;  %v1903_v0 = vpop.f32.mrb[109].mxu1 }
 0x1d4   : > { %v2557_v3 = vadd.f32 %v2556_v13, %v2555_v59  ;;  %v1904_v35 = vadd.f32 %v1903_v0, %v1743_v54  ;;  %v2558_v29 = vpop.f32.mrb[110].mxu0  ;;  %v2611_v57 = vpop.f32.mrb[110].mxu1 }
 0x1d5   : > { %v2559_v15 = vpop.f32.mrb[111].mxu0  ;;  %v1906_v42 = vpop.f32.mrb[111].mxu1 }
 0x1d6   : > { %v1751_v58 = vadd.f32 %v2557_v3, %v3364_v21  ;;  %2902 = vtanh.f32 %v1904_v35  ;;  %v2560_v49 = vadd.f32 %v2559_v15, %v2558_v29  ;;  %v1907_v19 = vadd.f32 %v1906_v42, %v1746_v56 }
 0x1d7   : > { %v2895_v45 = vpop.eup %2894 }
 0x1d8   : > { %v2897_v63 = vpop.eup %2896  ;;  %1976 = vst [vmem:[%s3391_s14 + $0xd0] sm:$0xff] %v2895_v45  ;;  %v1912_v17 = vadd.f32 %v2610_v1, %v1751_v58  ;;  %v1754_v50 = vadd.f32 %v2560_v49, %v3370_v14  ;;  %2904 = vtanh.f32 %v1907_v19 }
 0x1d9   : > { %v2899_v43 = vpop.eup %2898  ;;  %1974 = vst [vmem:[%s3391_s14 + $0xc0] sm:$0xff] %v2897_v63 }
 0x1da   : > { %v2901_v52 = vpop.eup %2900  ;;  %1977 = vst [vmem:[%s3391_s14 + $0xd8] sm:$0xff] %v2899_v43  ;;  %2906 = vtanh.f32 %v1912_v17  ;;  %v1915_v21 = vadd.f32 %v2611_v57, %v1754_v50 }
 0x1db   : > { %1975 = vst [vmem:[%s3391_s14 + $0xc8] sm:$0xff] %v2901_v52 }
 0x1dc   : > { %2908 = vtanh.f32 %v1915_v21 }
 0x1e0   : > { %v2903_v27 = vpop.eup %2902 }
 0x1e1   : > { %1978 = vst [vmem:[%s3391_s14 + $0xe0] sm:$0xff] %v2903_v27 }
 0x1e2   : > { %v2905_v22 = vpop.eup %2904 }
 0x1e3   : > { %1979 = vst [vmem:[%s3391_s14 + $0xe8] sm:$0xff] %v2905_v22 }
 0x1e4   : > { %v2907_v47 = vpop.eup %2906 }
 0x1e5   : > { %1980 = vst [vmem:[%s3391_s14 + $0xf0] sm:$0xff] %v2907_v47 }
 0x1e6   : > { %v2909_v12 = vpop.eup %2908 }
 0x1e7   : > { %1981 = vst [vmem:[%s3391_s14 + $0xf8] sm:$0xff] %v2909_v12 }
 0x1e8 PF: > { %s12_s9 = sadd.s32 1, %s2916_s9  }
 0x1e9   : > { %p9_p4 = scmp.ge.s32.totalorder %s12_s9, 4  }
 0x1eb   :  { %11 = sbr.rel (!%p9_p4) target bundleno = 1 (0x1), region = 58 }

</bundles_post_ra>
